<compile_context>
chip_gen: v6e
topology: v6e:2x2x1
jax: 0.10.0
libtpu: 0.0.40
codegen_flags: <defaults>
</compile_context>

<pallas_src>
import jax
import jax.numpy as jnp
from jax.experimental import pallas as pl
from jax.experimental.pallas import tpu as pltpu

D = 256          # d_model
NHEAD = 2
HEAD_DIM = D // NHEAD   # 128
DFF = 256        # dim_feedforward
NLAYERS = 2
LN_EPS = 1e-5
NEG_INF = -1e30


def _layer_norm(x, g, b):
    mu = jnp.mean(x, axis=-1, keepdims=True)
    xc = x - mu
    var = jnp.mean(xc * xc, axis=-1, keepdims=True)
    return xc * jax.lax.rsqrt(var + LN_EPS) * g + b


def encoder_kernel(x_ref, mask_ref,
                   w_in_ref, b_in_ref, w_out_ref, b_out_ref,
                   ln1_g_ref, ln1_b_ref,
                   w_ff1_ref, b_ff1_ref, w_ff2_ref, b_ff2_ref,
                   ln2_g_ref, ln2_b_ref,
                   out_ref):
    # x_ref:    (S_pad, D)          padded stepwise features
    # mask_ref: (S_pad, S_pad)      additive attention mask (padded keys = -1e30)
    # w_in:     (NL, D, 3D)  b_in: (NL, 1, 3D)     in_proj (q|k|v), transposed
    # w_out:    (NL, D, D)   b_out:(NL, 1, D)      attention out_proj, transposed
    # ln1_g/b:  (NL, 1, D)                          LayerNorm after attention
    # w_ff1:    (NL, D, DFF) b_ff1:(NL, 1, DFF)    linear1, transposed
    # w_ff2:    (NL, DFF, D) b_ff2:(NL, 1, D)      linear2, transposed
    # ln2_g/b:  (NL, 1, D)                          LayerNorm after FFN
    # out_ref:  (S_pad, D)          src + encoder(src)
    x0 = x_ref[...]                      # (S_pad, D)
    mask = mask_ref[...]                 # (S_pad, S_pad)
    scale = jnp.float32(1.0 / (HEAD_DIM ** 0.5))

    h = x0
    for layer in range(NLAYERS):         # static unroll over layers
        # ---- multi-head self-attention (all rows at once, M = S_pad) ----
        qkv = (jnp.dot(h, w_in_ref[layer], preferred_element_type=jnp.float32)
               + b_in_ref[layer])        # (S_pad, 3D)
        heads = []
        for hd in range(NHEAD):          # static unroll over heads
            q = qkv[:, hd * HEAD_DIM:(hd + 1) * HEAD_DIM] * scale
            k = qkv[:, D + hd * HEAD_DIM:D + (hd + 1) * HEAD_DIM]
            v = qkv[:, 2 * D + hd * HEAD_DIM:2 * D + (hd + 1) * HEAD_DIM]
            s = jax.lax.dot_general(q, k, (((1,), (1,)), ((), ())),
                                    preferred_element_type=jnp.float32)
            s = s + mask                                       # (S_pad, S_pad)
            s = s - jnp.max(s, axis=-1, keepdims=True)
            p = jnp.exp(s)
            p = p / jnp.sum(p, axis=-1, keepdims=True)
            heads.append(jnp.dot(p, v, preferred_element_type=jnp.float32))
        attn = jnp.concatenate(heads, axis=-1)                 # (S_pad, D)
        attn = (jnp.dot(attn, w_out_ref[layer],
                        preferred_element_type=jnp.float32)
                + b_out_ref[layer])
        # post-norm residual (norm_first=False)
        h = _layer_norm(h + attn, ln1_g_ref[layer], ln1_b_ref[layer])

        # ---- feed-forward: 256 -> 256 -> 256, ReLU ----
        ff = (jnp.dot(h, w_ff1_ref[layer], preferred_element_type=jnp.float32)
              + b_ff1_ref[layer])
        ff = jnp.maximum(ff, 0.0)
        ff = (jnp.dot(ff, w_ff2_ref[layer], preferred_element_type=jnp.float32)
              + b_ff2_ref[layer])
        h = _layer_norm(h + ff, ln2_g_ref[layer], ln2_b_ref[layer])

    # outer residual of the module: h_feat = stepwise_feat + encoder(...)
    out_ref[...] = x0 + h


def stepwise_transformer_forward(stepwise_feat, mask, params):
    """stepwise_feat: (S, 256), mask: (S, S) additive float mask -> (S, 1, 256)."""
    S, d = stepwise_feat.shape
    assert d == D
    S_pad = max(8, ((S + 7) // 8) * 8)

    x_pad = jnp.zeros((S_pad, D), jnp.float32).at[:S].set(
        stepwise_feat.astype(jnp.float32))
    mask_pad = jnp.zeros((S_pad, S_pad), jnp.float32)
    mask_pad = mask_pad.at[:S, :S].set(mask.astype(jnp.float32))
    mask_pad = mask_pad.at[:, S:].set(NEG_INF)   # padded keys never attended

    (w_in, b_in, w_out, b_out, ln1_g, ln1_b,
     w_ff1, b_ff1, w_ff2, b_ff2, ln2_g, ln2_b) = params

    def full(shape):
        return pl.BlockSpec(shape, lambda i, n=len(shape): (0,) * n)

    out = pl.pallas_call(
        encoder_kernel,
        out_shape=jax.ShapeDtypeStruct((S_pad, D), jnp.float32),
        grid_spec=pltpu.PrefetchScalarGridSpec(
            num_scalar_prefetch=0,
            grid=(1,),
            in_specs=[
                full((S_pad, D)),
                full((S_pad, S_pad)),
                full((NLAYERS, D, 3 * D)),
                full((NLAYERS, 1, 3 * D)),
                full((NLAYERS, D, D)),
                full((NLAYERS, 1, D)),
                full((NLAYERS, 1, D)),
                full((NLAYERS, 1, D)),
                full((NLAYERS, D, DFF)),
                full((NLAYERS, 1, DFF)),
                full((NLAYERS, DFF, D)),
                full((NLAYERS, 1, D)),
                full((NLAYERS, 1, D)),
                full((NLAYERS, 1, D)),
            ],
            out_specs=full((S_pad, D)),
        ),
        compiler_params=pltpu.CompilerParams(
            dimension_semantics=("arbitrary",)),
    )(x_pad, mask_pad, w_in, b_in, w_out, b_out, ln1_g, ln1_b,
      w_ff1, b_ff1, w_ff2, b_ff2, ln2_g, ln2_b)

    return out[:S].reshape(S, 1, D)


def init_params(key):
    """Deterministic xavier-uniform-style init matching the module's shapes."""
    ks = jax.random.split(key, 12)

    def xav(k, shape, fan_in, fan_out):
        lim = (6.0 / (fan_in + fan_out)) ** 0.5
        return jax.random.uniform(k, shape, jnp.float32, -lim, lim)

    w_in = xav(ks[0], (NLAYERS, D, 3 * D), D, 3 * D)      # in_proj_weight^T
    b_in = 0.01 * jax.random.normal(ks[1], (NLAYERS, 1, 3 * D), jnp.float32)
    w_out = xav(ks[2], (NLAYERS, D, D), D, D)             # out_proj.weight^T
    b_out = 0.01 * jax.random.normal(ks[3], (NLAYERS, 1, D), jnp.float32)
    ln1_g = 1.0 + 0.01 * jax.random.normal(ks[4], (NLAYERS, 1, D), jnp.float32)
    ln1_b = 0.01 * jax.random.normal(ks[5], (NLAYERS, 1, D), jnp.float32)
    w_ff1 = xav(ks[6], (NLAYERS, D, DFF), D, DFF)         # linear1.weight^T
    b_ff1 = 0.01 * jax.random.normal(ks[7], (NLAYERS, 1, DFF), jnp.float32)
    w_ff2 = xav(ks[8], (NLAYERS, DFF, D), DFF, D)         # linear2.weight^T
    b_ff2 = 0.01 * jax.random.normal(ks[9], (NLAYERS, 1, D), jnp.float32)
    ln2_g = 1.0 + 0.01 * jax.random.normal(ks[10], (NLAYERS, 1, D), jnp.float32)
    ln2_b = 0.01 * jax.random.normal(ks[11], (NLAYERS, 1, D), jnp.float32)
    return (w_in, b_in, w_out, b_out, ln1_g, ln1_b,
            w_ff1, b_ff1, w_ff2, b_ff2, ln2_g, ln2_b)


def ref_forward(stepwise_feat, mask, params):
    """Plain-JAX reference reproducing eval-mode PyTorch TransformerEncoder."""
    (w_in, b_in, w_out, b_out, ln1_g, ln1_b,
     w_ff1, b_ff1, w_ff2, b_ff2, ln2_g, ln2_b) = params
    x0 = stepwise_feat.astype(jnp.float32)
    scale = 1.0 / (HEAD_DIM ** 0.5)

    def ln(x, g, b):
        mu = jnp.mean(x, axis=-1, keepdims=True)
        var = jnp.mean((x - mu) ** 2, axis=-1, keepdims=True)
        return (x - mu) / jnp.sqrt(var + LN_EPS) * g + b

    h = x0
    for layer in range(NLAYERS):
        qkv = h @ w_in[layer] + b_in[layer]
        heads = []
        for hd in range(NHEAD):
            q = qkv[:, hd * HEAD_DIM:(hd + 1) * HEAD_DIM] * scale
            k = qkv[:, D + hd * HEAD_DIM:D + (hd + 1) * HEAD_DIM]
            v = qkv[:, 2 * D + hd * HEAD_DIM:2 * D + (hd + 1) * HEAD_DIM]
            p = jax.nn.softmax(q @ k.T + mask, axis=-1)
            heads.append(p @ v)
        attn = jnp.concatenate(heads, axis=-1) @ w_out[layer] + b_out[layer]
        h = ln(h + attn, ln1_g[layer], ln1_b[layer])
        ff = jnp.maximum(h @ w_ff1[layer] + b_ff1[layer], 0.0)
        ff = ff @ w_ff2[layer] + b_ff2[layer]
        h = ln(h + ff, ln2_g[layer], ln2_b[layer])
    return (x0 + h).reshape(stepwise_feat.shape[0], 1, D)


if __name__ == "__main__":
    key = jax.random.PRNGKey(0)
    k_param, k_x = jax.random.split(key)
    params = init_params(k_param)

    B = 2                                # batch_size == attention "sequence" length
    x = jax.random.normal(k_x, (B, D), jnp.float32)
    # additive float attn mask over the B positions (causal here, finite -1e9)
    mask = jnp.where(jnp.tril(jnp.ones((B, B), dtype=bool)), 0.0, -1e9
                     ).astype(jnp.float32)

    out = stepwise_transformer_forward(x, mask, params)
    out = jax.block_until_ready(out)

    ref = ref_forward(x, mask, params)
    assert out.shape == (B, 1, D)
    err = jnp.max(jnp.abs(out - ref))
    assert jnp.allclose(out, ref, atol=1e-4, rtol=1e-4), f"max abs err {err}"

    print("KERNEL_OK")
</pallas_src>

<mosaic_0001>
module attributes {stable_mosaic.version = 11 : i64} {
  func.func @encoder_kernel(%arg0: i32, %arg1: memref<8x256xf32, #tpu.memory_space<vmem>>, %arg2: memref<8x8xf32, #tpu.memory_space<vmem>>, %arg3: memref<2x256x768xf32, #tpu.memory_space<vmem>>, %arg4: memref<2x1x768xf32, #tpu.memory_space<vmem>>, %arg5: memref<2x256x256xf32, #tpu.memory_space<vmem>>, %arg6: memref<2x1x256xf32, #tpu.memory_space<vmem>>, %arg7: memref<2x1x256xf32, #tpu.memory_space<vmem>>, %arg8: memref<2x1x256xf32, #tpu.memory_space<vmem>>, %arg9: memref<2x256x256xf32, #tpu.memory_space<vmem>>, %arg10: memref<2x1x256xf32, #tpu.memory_space<vmem>>, %arg11: memref<2x256x256xf32, #tpu.memory_space<vmem>>, %arg12: memref<2x1x256xf32, #tpu.memory_space<vmem>>, %arg13: memref<2x1x256xf32, #tpu.memory_space<vmem>>, %arg14: memref<2x1x256xf32, #tpu.memory_space<vmem>>, %arg15: memref<8x256xf32, #tpu.memory_space<vmem>>) attributes {dimension_semantics = [#tpu.dimension_semantics<arbitrary>], iteration_bounds = array<i64: 1>, scalar_prefetch = 0 : i64, scratch_operands = 0 : i64, tpu.core_type = #tpu.core_type<tc>, window_params = [{pipeline_mode = #tpu.pipeline_mode<synchronous>, transform_indices = @transform_0, window_bounds = array<i64: 8, 256>}, {pipeline_mode = #tpu.pipeline_mode<synchronous>, transform_indices = @transform_1, window_bounds = array<i64: 8, 8>}, {pipeline_mode = #tpu.pipeline_mode<synchronous>, transform_indices = @transform_2, window_bounds = array<i64: 2, 256, 768>}, {pipeline_mode = #tpu.pipeline_mode<synchronous>, transform_indices = @transform_3, window_bounds = array<i64: 2, 1, 768>}, {pipeline_mode = #tpu.pipeline_mode<synchronous>, transform_indices = @transform_4, window_bounds = array<i64: 2, 256, 256>}, {pipeline_mode = #tpu.pipeline_mode<synchronous>, transform_indices = @transform_5, window_bounds = array<i64: 2, 1, 256>}, {pipeline_mode = #tpu.pipeline_mode<synchronous>, transform_indices = @transform_6, window_bounds = array<i64: 2, 1, 256>}, {pipeline_mode = #tpu.pipeline_mode<synchronous>, transform_indices = @transform_7, window_bounds = array<i64: 2, 1, 256>}, {pipeline_mode = #tpu.pipeline_mode<synchronous>, transform_indices = @transform_8, window_bounds = array<i64: 2, 256, 256>}, {pipeline_mode = #tpu.pipeline_mode<synchronous>, transform_indices = @transform_9, window_bounds = array<i64: 2, 1, 256>}, {pipeline_mode = #tpu.pipeline_mode<synchronous>, transform_indices = @transform_10, window_bounds = array<i64: 2, 256, 256>}, {pipeline_mode = #tpu.pipeline_mode<synchronous>, transform_indices = @transform_11, window_bounds = array<i64: 2, 1, 256>}, {pipeline_mode = #tpu.pipeline_mode<synchronous>, transform_indices = @transform_12, window_bounds = array<i64: 2, 1, 256>}, {pipeline_mode = #tpu.pipeline_mode<synchronous>, transform_indices = @transform_13, window_bounds = array<i64: 2, 1, 256>}, {pipeline_mode = #tpu.pipeline_mode<synchronous>, transform_indices = @transform_14, window_bounds = array<i64: 8, 256>}]} {
    %c0 = arith.constant 0 : index
    %c0_0 = arith.constant 0 : index
    %0 = vector.load %arg1[%c0, %c0_0] : memref<8x256xf32, #tpu.memory_space<vmem>>, vector<8x256xf32>
    %c0_1 = arith.constant 0 : index
    %c0_2 = arith.constant 0 : index
    %1 = vector.load %arg2[%c0_1, %c0_2] : memref<8x8xf32, #tpu.memory_space<vmem>>, vector<8x8xf32>
    %c0_3 = arith.constant 0 : index
    %c0_4 = arith.constant 0 : index
    %c0_5 = arith.constant 0 : index
    %2 = vector.load %arg3[%c0_3, %c0_4, %c0_5] : memref<2x256x768xf32, #tpu.memory_space<vmem>>, vector<1x256x768xf32>
    %3 = vector.shape_cast %2 : vector<1x256x768xf32> to vector<256x768xf32>
    %cst = arith.constant dense<0.000000e+00> : vector<8x768xf32>
    %4 = tpu.matmul %0, %3, %cst {dimension_numbers = #tpu.dot_dimension_numbers<[1], [0], [0], [1], [0, 0, 1, 1], [], []>} : vector<8x256xf32>, vector<256x768xf32>, vector<8x768xf32> -> vector<8x768xf32>
    %c0_6 = arith.constant 0 : index
    %c0_7 = arith.constant 0 : index
    %c0_8 = arith.constant 0 : index
    %5 = vector.load %arg4[%c0_6, %c0_7, %c0_8] : memref<2x1x768xf32, #tpu.memory_space<vmem>>, vector<1x1x768xf32>
    %6 = vector.shape_cast %5 : vector<1x1x768xf32> to vector<1x768xf32>
    %7 = vector.broadcast %6 : vector<1x768xf32> to vector<8x768xf32>
    %8 = arith.addf %4, %7 : vector<8x768xf32>
    %9 = vector.extract_strided_slice %8 {offsets = [0, 0], sizes = [8, 128], strides = [1, 1]} : vector<8x768xf32> to vector<8x128xf32>
    %cst_9 = arith.constant 0.0883883461 : f32
    %10 = vector.broadcast %cst_9 : f32 to vector<8x128xf32>
    %11 = arith.mulf %9, %10 : vector<8x128xf32>
    %12 = vector.extract_strided_slice %8 {offsets = [0, 256], sizes = [8, 128], strides = [1, 1]} : vector<8x768xf32> to vector<8x128xf32>
    %13 = vector.extract_strided_slice %8 {offsets = [0, 512], sizes = [8, 128], strides = [1, 1]} : vector<8x768xf32> to vector<8x128xf32>
    %cst_10 = arith.constant dense<0.000000e+00> : vector<8x8xf32>
    %14 = tpu.matmul %11, %12, %cst_10 {dimension_numbers = #tpu.dot_dimension_numbers<[1], [1], [0], [0], [0, 0, 1, 0], [], []>} : vector<8x128xf32>, vector<8x128xf32>, vector<8x8xf32> -> vector<8x8xf32>
    %15 = arith.addf %14, %1 : vector<8x8xf32>
    %cst_11 = arith.constant dense<0xFF800000> : vector<8xf32>
    %16 = vector.multi_reduction <maximumf>, %15, %cst_11 [1] : vector<8x8xf32> to vector<8xf32>
    %17 = vector.shape_cast %16 : vector<8xf32> to vector<8x1xf32>
    %18 = vector.broadcast %17 : vector<8x1xf32> to vector<8x8xf32>
    %19 = arith.subf %15, %18 : vector<8x8xf32>
    %20 = math.exp %19 : vector<8x8xf32>
    %cst_12 = arith.constant dense<0.000000e+00> : vector<8xf32>
    %21 = vector.multi_reduction <add>, %20, %cst_12 [1] : vector<8x8xf32> to vector<8xf32>
    %22 = vector.shape_cast %21 : vector<8xf32> to vector<8x1xf32>
    %23 = vector.broadcast %22 : vector<8x1xf32> to vector<8x8xf32>
    %24 = arith.divf %20, %23 : vector<8x8xf32>
    %cst_13 = arith.constant dense<0.000000e+00> : vector<8x128xf32>
    %25 = tpu.matmul %24, %13, %cst_13 {dimension_numbers = #tpu.dot_dimension_numbers<[1], [0], [0], [1], [0, 0, 1, 1], [], []>} : vector<8x8xf32>, vector<8x128xf32>, vector<8x128xf32> -> vector<8x128xf32>
    %26 = vector.extract_strided_slice %8 {offsets = [0, 128], sizes = [8, 128], strides = [1, 1]} : vector<8x768xf32> to vector<8x128xf32>
    %cst_14 = arith.constant 0.0883883461 : f32
    %27 = vector.broadcast %cst_14 : f32 to vector<8x128xf32>
    %28 = arith.mulf %26, %27 : vector<8x128xf32>
    %29 = vector.extract_strided_slice %8 {offsets = [0, 384], sizes = [8, 128], strides = [1, 1]} : vector<8x768xf32> to vector<8x128xf32>
    %30 = vector.extract_strided_slice %8 {offsets = [0, 640], sizes = [8, 128], strides = [1, 1]} : vector<8x768xf32> to vector<8x128xf32>
    %cst_15 = arith.constant dense<0.000000e+00> : vector<8x8xf32>
    %31 = tpu.matmul %28, %29, %cst_15 {dimension_numbers = #tpu.dot_dimension_numbers<[1], [1], [0], [0], [0, 0, 1, 0], [], []>} : vector<8x128xf32>, vector<8x128xf32>, vector<8x8xf32> -> vector<8x8xf32>
    %32 = arith.addf %31, %1 : vector<8x8xf32>
    %cst_16 = arith.constant dense<0xFF800000> : vector<8xf32>
    %33 = vector.multi_reduction <maximumf>, %32, %cst_16 [1] : vector<8x8xf32> to vector<8xf32>
    %34 = vector.shape_cast %33 : vector<8xf32> to vector<8x1xf32>
    %35 = vector.broadcast %34 : vector<8x1xf32> to vector<8x8xf32>
    %36 = arith.subf %32, %35 : vector<8x8xf32>
    %37 = math.exp %36 : vector<8x8xf32>
    %cst_17 = arith.constant dense<0.000000e+00> : vector<8xf32>
    %38 = vector.multi_reduction <add>, %37, %cst_17 [1] : vector<8x8xf32> to vector<8xf32>
    %39 = vector.shape_cast %38 : vector<8xf32> to vector<8x1xf32>
    %40 = vector.broadcast %39 : vector<8x1xf32> to vector<8x8xf32>
    %41 = arith.divf %37, %40 : vector<8x8xf32>
    %cst_18 = arith.constant dense<0.000000e+00> : vector<8x128xf32>
    %42 = tpu.matmul %41, %30, %cst_18 {dimension_numbers = #tpu.dot_dimension_numbers<[1], [0], [0], [1], [0, 0, 1, 1], [], []>} : vector<8x8xf32>, vector<8x128xf32>, vector<8x128xf32> -> vector<8x128xf32>
    %43 = tpu.concatenate %25, %42 in 1 : vector<8x128xf32>, vector<8x128xf32> -> vector<8x256xf32>
    %c0_19 = arith.constant 0 : index
    %c0_20 = arith.constant 0 : index
    %c0_21 = arith.constant 0 : index
    %44 = vector.load %arg5[%c0_19, %c0_20, %c0_21] : memref<2x256x256xf32, #tpu.memory_space<vmem>>, vector<1x256x256xf32>
    %45 = vector.shape_cast %44 : vector<1x256x256xf32> to vector<256x256xf32>
    %cst_22 = arith.constant dense<0.000000e+00> : vector<8x256xf32>
    %46 = tpu.matmul %43, %45, %cst_22 {dimension_numbers = #tpu.dot_dimension_numbers<[1], [0], [0], [1], [0, 0, 1, 1], [], []>} : vector<8x256xf32>, vector<256x256xf32>, vector<8x256xf32> -> vector<8x256xf32>
    %c0_23 = arith.constant 0 : index
    %c0_24 = arith.constant 0 : index
    %c0_25 = arith.constant 0 : index
    %47 = vector.load %arg6[%c0_23, %c0_24, %c0_25] : memref<2x1x256xf32, #tpu.memory_space<vmem>>, vector<1x1x256xf32>
    %48 = vector.shape_cast %47 : vector<1x1x256xf32> to vector<1x256xf32>
    %49 = vector.broadcast %48 : vector<1x256xf32> to vector<8x256xf32>
    %50 = arith.addf %46, %49 : vector<8x256xf32>
    %51 = arith.addf %0, %50 : vector<8x256xf32>
    %c0_26 = arith.constant 0 : index
    %c0_27 = arith.constant 0 : index
    %c0_28 = arith.constant 0 : index
    %52 = vector.load %arg7[%c0_26, %c0_27, %c0_28] : memref<2x1x256xf32, #tpu.memory_space<vmem>>, vector<1x1x256xf32>
    %53 = vector.shape_cast %52 : vector<1x1x256xf32> to vector<1x256xf32>
    %c0_29 = arith.constant 0 : index
    %c0_30 = arith.constant 0 : index
    %c0_31 = arith.constant 0 : index
    %54 = vector.load %arg8[%c0_29, %c0_30, %c0_31] : memref<2x1x256xf32, #tpu.memory_space<vmem>>, vector<1x1x256xf32>
    %55 = vector.shape_cast %54 : vector<1x1x256xf32> to vector<1x256xf32>
    %cst_32 = arith.constant dense<0.000000e+00> : vector<8xf32>
    %56 = vector.multi_reduction <add>, %51, %cst_32 [1] : vector<8x256xf32> to vector<8xf32>
    %57 = vector.shape_cast %56 : vector<8xf32> to vector<8x1xf32>
    %cst_33 = arith.constant 2.560000e+02 : f32
    %58 = vector.broadcast %cst_33 : f32 to vector<8x1xf32>
    %59 = arith.divf %57, %58 : vector<8x1xf32>
    %60 = vector.broadcast %59 : vector<8x1xf32> to vector<8x256xf32>
    %61 = arith.subf %51, %60 : vector<8x256xf32>
    %62 = arith.mulf %61, %61 : vector<8x256xf32>
    %cst_34 = arith.constant dense<0.000000e+00> : vector<8xf32>
    %63 = vector.multi_reduction <add>, %62, %cst_34 [1] : vector<8x256xf32> to vector<8xf32>
    %64 = vector.shape_cast %63 : vector<8xf32> to vector<8x1xf32>
    %cst_35 = arith.constant 2.560000e+02 : f32
    %65 = vector.broadcast %cst_35 : f32 to vector<8x1xf32>
    %66 = arith.divf %64, %65 : vector<8x1xf32>
    %cst_36 = arith.constant 9.99999974E-6 : f32
    %67 = vector.broadcast %cst_36 : f32 to vector<8x1xf32>
    %68 = arith.addf %66, %67 : vector<8x1xf32>
    %69 = math.rsqrt %68 : vector<8x1xf32>
    %70 = vector.broadcast %69 : vector<8x1xf32> to vector<8x256xf32>
    %71 = arith.mulf %61, %70 : vector<8x256xf32>
    %72 = vector.broadcast %53 : vector<1x256xf32> to vector<8x256xf32>
    %73 = arith.mulf %71, %72 : vector<8x256xf32>
    %74 = vector.broadcast %55 : vector<1x256xf32> to vector<8x256xf32>
    %75 = arith.addf %73, %74 : vector<8x256xf32>
    %c0_37 = arith.constant 0 : index
    %c0_38 = arith.constant 0 : index
    %c0_39 = arith.constant 0 : index
    %76 = vector.load %arg9[%c0_37, %c0_38, %c0_39] : memref<2x256x256xf32, #tpu.memory_space<vmem>>, vector<1x256x256xf32>
    %77 = vector.shape_cast %76 : vector<1x256x256xf32> to vector<256x256xf32>
    %cst_40 = arith.constant dense<0.000000e+00> : vector<8x256xf32>
    %78 = tpu.matmul %75, %77, %cst_40 {dimension_numbers = #tpu.dot_dimension_numbers<[1], [0], [0], [1], [0, 0, 1, 1], [], []>} : vector<8x256xf32>, vector<256x256xf32>, vector<8x256xf32> -> vector<8x256xf32>
    %c0_41 = arith.constant 0 : index
    %c0_42 = arith.constant 0 : index
    %c0_43 = arith.constant 0 : index
    %79 = vector.load %arg10[%c0_41, %c0_42, %c0_43] : memref<2x1x256xf32, #tpu.memory_space<vmem>>, vector<1x1x256xf32>
    %80 = vector.shape_cast %79 : vector<1x1x256xf32> to vector<1x256xf32>
    %81 = vector.broadcast %80 : vector<1x256xf32> to vector<8x256xf32>
    %82 = arith.addf %78, %81 : vector<8x256xf32>
    %cst_44 = arith.constant 0.000000e+00 : f32
    %83 = vector.broadcast %cst_44 : f32 to vector<8x256xf32>
    %84 = arith.maximumf %82, %83 : vector<8x256xf32>
    %c0_45 = arith.constant 0 : index
    %c0_46 = arith.constant 0 : index
    %c0_47 = arith.constant 0 : index
    %85 = vector.load %arg11[%c0_45, %c0_46, %c0_47] : memref<2x256x256xf32, #tpu.memory_space<vmem>>, vector<1x256x256xf32>
    %86 = vector.shape_cast %85 : vector<1x256x256xf32> to vector<256x256xf32>
    %cst_48 = arith.constant dense<0.000000e+00> : vector<8x256xf32>
    %87 = tpu.matmul %84, %86, %cst_48 {dimension_numbers = #tpu.dot_dimension_numbers<[1], [0], [0], [1], [0, 0, 1, 1], [], []>} : vector<8x256xf32>, vector<256x256xf32>, vector<8x256xf32> -> vector<8x256xf32>
    %c0_49 = arith.constant 0 : index
    %c0_50 = arith.constant 0 : index
    %c0_51 = arith.constant 0 : index
    %88 = vector.load %arg12[%c0_49, %c0_50, %c0_51] : memref<2x1x256xf32, #tpu.memory_space<vmem>>, vector<1x1x256xf32>
    %89 = vector.shape_cast %88 : vector<1x1x256xf32> to vector<1x256xf32>
    %90 = vector.broadcast %89 : vector<1x256xf32> to vector<8x256xf32>
    %91 = arith.addf %87, %90 : vector<8x256xf32>
    %92 = arith.addf %75, %91 : vector<8x256xf32>
    %c0_52 = arith.constant 0 : index
    %c0_53 = arith.constant 0 : index
    %c0_54 = arith.constant 0 : index
    %93 = vector.load %arg13[%c0_52, %c0_53, %c0_54] : memref<2x1x256xf32, #tpu.memory_space<vmem>>, vector<1x1x256xf32>
    %94 = vector.shape_cast %93 : vector<1x1x256xf32> to vector<1x256xf32>
    %c0_55 = arith.constant 0 : index
    %c0_56 = arith.constant 0 : index
    %c0_57 = arith.constant 0 : index
    %95 = vector.load %arg14[%c0_55, %c0_56, %c0_57] : memref<2x1x256xf32, #tpu.memory_space<vmem>>, vector<1x1x256xf32>
    %96 = vector.shape_cast %95 : vector<1x1x256xf32> to vector<1x256xf32>
    %cst_58 = arith.constant dense<0.000000e+00> : vector<8xf32>
    %97 = vector.multi_reduction <add>, %92, %cst_58 [1] : vector<8x256xf32> to vector<8xf32>
    %98 = vector.shape_cast %97 : vector<8xf32> to vector<8x1xf32>
    %cst_59 = arith.constant 2.560000e+02 : f32
    %99 = vector.broadcast %cst_59 : f32 to vector<8x1xf32>
    %100 = arith.divf %98, %99 : vector<8x1xf32>
    %101 = vector.broadcast %100 : vector<8x1xf32> to vector<8x256xf32>
    %102 = arith.subf %92, %101 : vector<8x256xf32>
    %103 = arith.mulf %102, %102 : vector<8x256xf32>
    %cst_60 = arith.constant dense<0.000000e+00> : vector<8xf32>
    %104 = vector.multi_reduction <add>, %103, %cst_60 [1] : vector<8x256xf32> to vector<8xf32>
    %105 = vector.shape_cast %104 : vector<8xf32> to vector<8x1xf32>
    %cst_61 = arith.constant 2.560000e+02 : f32
    %106 = vector.broadcast %cst_61 : f32 to vector<8x1xf32>
    %107 = arith.divf %105, %106 : vector<8x1xf32>
    %cst_62 = arith.constant 9.99999974E-6 : f32
    %108 = vector.broadcast %cst_62 : f32 to vector<8x1xf32>
    %109 = arith.addf %107, %108 : vector<8x1xf32>
    %110 = math.rsqrt %109 : vector<8x1xf32>
    %111 = vector.broadcast %110 : vector<8x1xf32> to vector<8x256xf32>
    %112 = arith.mulf %102, %111 : vector<8x256xf32>
    %113 = vector.broadcast %94 : vector<1x256xf32> to vector<8x256xf32>
    %114 = arith.mulf %112, %113 : vector<8x256xf32>
    %115 = vector.broadcast %96 : vector<1x256xf32> to vector<8x256xf32>
    %116 = arith.addf %114, %115 : vector<8x256xf32>
    %c1 = arith.constant 1 : index
    %c0_63 = arith.constant 0 : index
    %c0_64 = arith.constant 0 : index
    %117 = vector.load %arg3[%c1, %c0_63, %c0_64] : memref<2x256x768xf32, #tpu.memory_space<vmem>>, vector<1x256x768xf32>
    %118 = vector.shape_cast %117 : vector<1x256x768xf32> to vector<256x768xf32>
    %cst_65 = arith.constant dense<0.000000e+00> : vector<8x768xf32>
    %119 = tpu.matmul %116, %118, %cst_65 {dimension_numbers = #tpu.dot_dimension_numbers<[1], [0], [0], [1], [0, 0, 1, 1], [], []>} : vector<8x256xf32>, vector<256x768xf32>, vector<8x768xf32> -> vector<8x768xf32>
    %c1_66 = arith.constant 1 : index
    %c0_67 = arith.constant 0 : index
    %c0_68 = arith.constant 0 : index
    %120 = vector.load %arg4[%c1_66, %c0_67, %c0_68] : memref<2x1x768xf32, #tpu.memory_space<vmem>>, vector<1x1x768xf32>
    %121 = vector.shape_cast %120 : vector<1x1x768xf32> to vector<1x768xf32>
    %122 = vector.broadcast %121 : vector<1x768xf32> to vector<8x768xf32>
    %123 = arith.addf %119, %122 : vector<8x768xf32>
    %124 = vector.extract_strided_slice %123 {offsets = [0, 0], sizes = [8, 128], strides = [1, 1]} : vector<8x768xf32> to vector<8x128xf32>
    %cst_69 = arith.constant 0.0883883461 : f32
    %125 = vector.broadcast %cst_69 : f32 to vector<8x128xf32>
    %126 = arith.mulf %124, %125 : vector<8x128xf32>
    %127 = vector.extract_strided_slice %123 {offsets = [0, 256], sizes = [8, 128], strides = [1, 1]} : vector<8x768xf32> to vector<8x128xf32>
    %128 = vector.extract_strided_slice %123 {offsets = [0, 512], sizes = [8, 128], strides = [1, 1]} : vector<8x768xf32> to vector<8x128xf32>
    %cst_70 = arith.constant dense<0.000000e+00> : vector<8x8xf32>
    %129 = tpu.matmul %126, %127, %cst_70 {dimension_numbers = #tpu.dot_dimension_numbers<[1], [1], [0], [0], [0, 0, 1, 0], [], []>} : vector<8x128xf32>, vector<8x128xf32>, vector<8x8xf32> -> vector<8x8xf32>
    %130 = arith.addf %129, %1 : vector<8x8xf32>
    %cst_71 = arith.constant dense<0xFF800000> : vector<8xf32>
    %131 = vector.multi_reduction <maximumf>, %130, %cst_71 [1] : vector<8x8xf32> to vector<8xf32>
    %132 = vector.shape_cast %131 : vector<8xf32> to vector<8x1xf32>
    %133 = vector.broadcast %132 : vector<8x1xf32> to vector<8x8xf32>
    %134 = arith.subf %130, %133 : vector<8x8xf32>
    %135 = math.exp %134 : vector<8x8xf32>
    %cst_72 = arith.constant dense<0.000000e+00> : vector<8xf32>
    %136 = vector.multi_reduction <add>, %135, %cst_72 [1] : vector<8x8xf32> to vector<8xf32>
    %137 = vector.shape_cast %136 : vector<8xf32> to vector<8x1xf32>
    %138 = vector.broadcast %137 : vector<8x1xf32> to vector<8x8xf32>
    %139 = arith.divf %135, %138 : vector<8x8xf32>
    %cst_73 = arith.constant dense<0.000000e+00> : vector<8x128xf32>
    %140 = tpu.matmul %139, %128, %cst_73 {dimension_numbers = #tpu.dot_dimension_numbers<[1], [0], [0], [1], [0, 0, 1, 1], [], []>} : vector<8x8xf32>, vector<8x128xf32>, vector<8x128xf32> -> vector<8x128xf32>
    %141 = vector.extract_strided_slice %123 {offsets = [0, 128], sizes = [8, 128], strides = [1, 1]} : vector<8x768xf32> to vector<8x128xf32>
    %cst_74 = arith.constant 0.0883883461 : f32
    %142 = vector.broadcast %cst_74 : f32 to vector<8x128xf32>
    %143 = arith.mulf %141, %142 : vector<8x128xf32>
    %144 = vector.extract_strided_slice %123 {offsets = [0, 384], sizes = [8, 128], strides = [1, 1]} : vector<8x768xf32> to vector<8x128xf32>
    %145 = vector.extract_strided_slice %123 {offsets = [0, 640], sizes = [8, 128], strides = [1, 1]} : vector<8x768xf32> to vector<8x128xf32>
    %cst_75 = arith.constant dense<0.000000e+00> : vector<8x8xf32>
    %146 = tpu.matmul %143, %144, %cst_75 {dimension_numbers = #tpu.dot_dimension_numbers<[1], [1], [0], [0], [0, 0, 1, 0], [], []>} : vector<8x128xf32>, vector<8x128xf32>, vector<8x8xf32> -> vector<8x8xf32>
    %147 = arith.addf %146, %1 : vector<8x8xf32>
    %cst_76 = arith.constant dense<0xFF800000> : vector<8xf32>
    %148 = vector.multi_reduction <maximumf>, %147, %cst_76 [1] : vector<8x8xf32> to vector<8xf32>
    %149 = vector.shape_cast %148 : vector<8xf32> to vector<8x1xf32>
    %150 = vector.broadcast %149 : vector<8x1xf32> to vector<8x8xf32>
    %151 = arith.subf %147, %150 : vector<8x8xf32>
    %152 = math.exp %151 : vector<8x8xf32>
    %cst_77 = arith.constant dense<0.000000e+00> : vector<8xf32>
    %153 = vector.multi_reduction <add>, %152, %cst_77 [1] : vector<8x8xf32> to vector<8xf32>
    %154 = vector.shape_cast %153 : vector<8xf32> to vector<8x1xf32>
    %155 = vector.broadcast %154 : vector<8x1xf32> to vector<8x8xf32>
    %156 = arith.divf %152, %155 : vector<8x8xf32>
    %cst_78 = arith.constant dense<0.000000e+00> : vector<8x128xf32>
    %157 = tpu.matmul %156, %145, %cst_78 {dimension_numbers = #tpu.dot_dimension_numbers<[1], [0], [0], [1], [0, 0, 1, 1], [], []>} : vector<8x8xf32>, vector<8x128xf32>, vector<8x128xf32> -> vector<8x128xf32>
    %158 = tpu.concatenate %140, %157 in 1 : vector<8x128xf32>, vector<8x128xf32> -> vector<8x256xf32>
    %c1_79 = arith.constant 1 : index
    %c0_80 = arith.constant 0 : index
    %c0_81 = arith.constant 0 : index
    %159 = vector.load %arg5[%c1_79, %c0_80, %c0_81] : memref<2x256x256xf32, #tpu.memory_space<vmem>>, vector<1x256x256xf32>
    %160 = vector.shape_cast %159 : vector<1x256x256xf32> to vector<256x256xf32>
    %cst_82 = arith.constant dense<0.000000e+00> : vector<8x256xf32>
    %161 = tpu.matmul %158, %160, %cst_82 {dimension_numbers = #tpu.dot_dimension_numbers<[1], [0], [0], [1], [0, 0, 1, 1], [], []>} : vector<8x256xf32>, vector<256x256xf32>, vector<8x256xf32> -> vector<8x256xf32>
    %c1_83 = arith.constant 1 : index
    %c0_84 = arith.constant 0 : index
    %c0_85 = arith.constant 0 : index
    %162 = vector.load %arg6[%c1_83, %c0_84, %c0_85] : memref<2x1x256xf32, #tpu.memory_space<vmem>>, vector<1x1x256xf32>
    %163 = vector.shape_cast %162 : vector<1x1x256xf32> to vector<1x256xf32>
    %164 = vector.broadcast %163 : vector<1x256xf32> to vector<8x256xf32>
    %165 = arith.addf %161, %164 : vector<8x256xf32>
    %166 = arith.addf %116, %165 : vector<8x256xf32>
    %c1_86 = arith.constant 1 : index
    %c0_87 = arith.constant 0 : index
    %c0_88 = arith.constant 0 : index
    %167 = vector.load %arg7[%c1_86, %c0_87, %c0_88] : memref<2x1x256xf32, #tpu.memory_space<vmem>>, vector<1x1x256xf32>
    %168 = vector.shape_cast %167 : vector<1x1x256xf32> to vector<1x256xf32>
    %c1_89 = arith.constant 1 : index
    %c0_90 = arith.constant 0 : index
    %c0_91 = arith.constant 0 : index
    %169 = vector.load %arg8[%c1_89, %c0_90, %c0_91] : memref<2x1x256xf32, #tpu.memory_space<vmem>>, vector<1x1x256xf32>
    %170 = vector.shape_cast %169 : vector<1x1x256xf32> to vector<1x256xf32>
    %cst_92 = arith.constant dense<0.000000e+00> : vector<8xf32>
    %171 = vector.multi_reduction <add>, %166, %cst_92 [1] : vector<8x256xf32> to vector<8xf32>
    %172 = vector.shape_cast %171 : vector<8xf32> to vector<8x1xf32>
    %cst_93 = arith.constant 2.560000e+02 : f32
    %173 = vector.broadcast %cst_93 : f32 to vector<8x1xf32>
    %174 = arith.divf %172, %173 : vector<8x1xf32>
    %175 = vector.broadcast %174 : vector<8x1xf32> to vector<8x256xf32>
    %176 = arith.subf %166, %175 : vector<8x256xf32>
    %177 = arith.mulf %176, %176 : vector<8x256xf32>
    %cst_94 = arith.constant dense<0.000000e+00> : vector<8xf32>
    %178 = vector.multi_reduction <add>, %177, %cst_94 [1] : vector<8x256xf32> to vector<8xf32>
    %179 = vector.shape_cast %178 : vector<8xf32> to vector<8x1xf32>
    %cst_95 = arith.constant 2.560000e+02 : f32
    %180 = vector.broadcast %cst_95 : f32 to vector<8x1xf32>
    %181 = arith.divf %179, %180 : vector<8x1xf32>
    %cst_96 = arith.constant 9.99999974E-6 : f32
    %182 = vector.broadcast %cst_96 : f32 to vector<8x1xf32>
    %183 = arith.addf %181, %182 : vector<8x1xf32>
    %184 = math.rsqrt %183 : vector<8x1xf32>
    %185 = vector.broadcast %184 : vector<8x1xf32> to vector<8x256xf32>
    %186 = arith.mulf %176, %185 : vector<8x256xf32>
    %187 = vector.broadcast %168 : vector<1x256xf32> to vector<8x256xf32>
    %188 = arith.mulf %186, %187 : vector<8x256xf32>
    %189 = vector.broadcast %170 : vector<1x256xf32> to vector<8x256xf32>
    %190 = arith.addf %188, %189 : vector<8x256xf32>
    %c1_97 = arith.constant 1 : index
    %c0_98 = arith.constant 0 : index
    %c0_99 = arith.constant 0 : index
    %191 = vector.load %arg9[%c1_97, %c0_98, %c0_99] : memref<2x256x256xf32, #tpu.memory_space<vmem>>, vector<1x256x256xf32>
    %192 = vector.shape_cast %191 : vector<1x256x256xf32> to vector<256x256xf32>
    %cst_100 = arith.constant dense<0.000000e+00> : vector<8x256xf32>
    %193 = tpu.matmul %190, %192, %cst_100 {dimension_numbers = #tpu.dot_dimension_numbers<[1], [0], [0], [1], [0, 0, 1, 1], [], []>} : vector<8x256xf32>, vector<256x256xf32>, vector<8x256xf32> -> vector<8x256xf32>
    %c1_101 = arith.constant 1 : index
    %c0_102 = arith.constant 0 : index
    %c0_103 = arith.constant 0 : index
    %194 = vector.load %arg10[%c1_101, %c0_102, %c0_103] : memref<2x1x256xf32, #tpu.memory_space<vmem>>, vector<1x1x256xf32>
    %195 = vector.shape_cast %194 : vector<1x1x256xf32> to vector<1x256xf32>
    %196 = vector.broadcast %195 : vector<1x256xf32> to vector<8x256xf32>
    %197 = arith.addf %193, %196 : vector<8x256xf32>
    %cst_104 = arith.constant 0.000000e+00 : f32
    %198 = vector.broadcast %cst_104 : f32 to vector<8x256xf32>
    %199 = arith.maximumf %197, %198 : vector<8x256xf32>
    %c1_105 = arith.constant 1 : index
    %c0_106 = arith.constant 0 : index
    %c0_107 = arith.constant 0 : index
    %200 = vector.load %arg11[%c1_105, %c0_106, %c0_107] : memref<2x256x256xf32, #tpu.memory_space<vmem>>, vector<1x256x256xf32>
    %201 = vector.shape_cast %200 : vector<1x256x256xf32> to vector<256x256xf32>
    %cst_108 = arith.constant dense<0.000000e+00> : vector<8x256xf32>
    %202 = tpu.matmul %199, %201, %cst_108 {dimension_numbers = #tpu.dot_dimension_numbers<[1], [0], [0], [1], [0, 0, 1, 1], [], []>} : vector<8x256xf32>, vector<256x256xf32>, vector<8x256xf32> -> vector<8x256xf32>
    %c1_109 = arith.constant 1 : index
    %c0_110 = arith.constant 0 : index
    %c0_111 = arith.constant 0 : index
    %203 = vector.load %arg12[%c1_109, %c0_110, %c0_111] : memref<2x1x256xf32, #tpu.memory_space<vmem>>, vector<1x1x256xf32>
    %204 = vector.shape_cast %203 : vector<1x1x256xf32> to vector<1x256xf32>
    %205 = vector.broadcast %204 : vector<1x256xf32> to vector<8x256xf32>
    %206 = arith.addf %202, %205 : vector<8x256xf32>
    %207 = arith.addf %190, %206 : vector<8x256xf32>
    %c1_112 = arith.constant 1 : index
    %c0_113 = arith.constant 0 : index
    %c0_114 = arith.constant 0 : index
    %208 = vector.load %arg13[%c1_112, %c0_113, %c0_114] : memref<2x1x256xf32, #tpu.memory_space<vmem>>, vector<1x1x256xf32>
    %209 = vector.shape_cast %208 : vector<1x1x256xf32> to vector<1x256xf32>
    %c1_115 = arith.constant 1 : index
    %c0_116 = arith.constant 0 : index
    %c0_117 = arith.constant 0 : index
    %210 = vector.load %arg14[%c1_115, %c0_116, %c0_117] : memref<2x1x256xf32, #tpu.memory_space<vmem>>, vector<1x1x256xf32>
    %211 = vector.shape_cast %210 : vector<1x1x256xf32> to vector<1x256xf32>
    %cst_118 = arith.constant dense<0.000000e+00> : vector<8xf32>
    %212 = vector.multi_reduction <add>, %207, %cst_118 [1] : vector<8x256xf32> to vector<8xf32>
    %213 = vector.shape_cast %212 : vector<8xf32> to vector<8x1xf32>
    %cst_119 = arith.constant 2.560000e+02 : f32
    %214 = vector.broadcast %cst_119 : f32 to vector<8x1xf32>
    %215 = arith.divf %213, %214 : vector<8x1xf32>
    %216 = vector.broadcast %215 : vector<8x1xf32> to vector<8x256xf32>
    %217 = arith.subf %207, %216 : vector<8x256xf32>
    %218 = arith.mulf %217, %217 : vector<8x256xf32>
    %cst_120 = arith.constant dense<0.000000e+00> : vector<8xf32>
    %219 = vector.multi_reduction <add>, %218, %cst_120 [1] : vector<8x256xf32> to vector<8xf32>
    %220 = vector.shape_cast %219 : vector<8xf32> to vector<8x1xf32>
    %cst_121 = arith.constant 2.560000e+02 : f32
    %221 = vector.broadcast %cst_121 : f32 to vector<8x1xf32>
    %222 = arith.divf %220, %221 : vector<8x1xf32>
    %cst_122 = arith.constant 9.99999974E-6 : f32
    %223 = vector.broadcast %cst_122 : f32 to vector<8x1xf32>
    %224 = arith.addf %222, %223 : vector<8x1xf32>
    %225 = math.rsqrt %224 : vector<8x1xf32>
    %226 = vector.broadcast %225 : vector<8x1xf32> to vector<8x256xf32>
    %227 = arith.mulf %217, %226 : vector<8x256xf32>
    %228 = vector.broadcast %209 : vector<1x256xf32> to vector<8x256xf32>
    %229 = arith.mulf %227, %228 : vector<8x256xf32>
    %230 = vector.broadcast %211 : vector<1x256xf32> to vector<8x256xf32>
    %231 = arith.addf %229, %230 : vector<8x256xf32>
    %232 = arith.addf %0, %231 : vector<8x256xf32>
    %c0_123 = arith.constant 0 : index
    %c0_124 = arith.constant 0 : index
    %233 = vector.load %arg15[%c0_123, %c0_124] : memref<8x256xf32, #tpu.memory_space<vmem>>, vector<8x256xf32>
    tpu.vector_store %arg15[%c0_123, %c0_124], %232 {strides = array<i32>} : memref<8x256xf32, #tpu.memory_space<vmem>>, vector<8x256xf32>,
    return
  }
  func.func @transform_0(%arg0: i32) -> (i32, i32) {
    %c0_i32 = arith.constant 0 : i32
    %c0_i32_0 = arith.constant 0 : i32
    %c0_i32_1 = arith.constant 0 : i32
    return %c0_i32, %c0_i32_0 : i32, i32
  }
  func.func @transform_1(%arg0: i32) -> (i32, i32) {
    %c0_i32 = arith.constant 0 : i32
    %c0_i32_0 = arith.constant 0 : i32
    %c0_i32_1 = arith.constant 0 : i32
    return %c0_i32, %c0_i32_0 : i32, i32
  }
  func.func @transform_2(%arg0: i32) -> (i32, i32, i32) {
    %c0_i32 = arith.constant 0 : i32
    %c0_i32_0 = arith.constant 0 : i32
    %c0_i32_1 = arith.constant 0 : i32
    %c0_i32_2 = arith.constant 0 : i32
    return %c0_i32, %c0_i32_0, %c0_i32_1 : i32, i32, i32
  }
  func.func @transform_3(%arg0: i32) -> (i32, i32, i32) {
    %c0_i32 = arith.constant 0 : i32
    %c0_i32_0 = arith.constant 0 : i32
    %c0_i32_1 = arith.constant 0 : i32
    %c0_i32_2 = arith.constant 0 : i32
    return %c0_i32, %c0_i32_0, %c0_i32_1 : i32, i32, i32
  }
  func.func @transform_4(%arg0: i32) -> (i32, i32, i32) {
    %c0_i32 = arith.constant 0 : i32
    %c0_i32_0 = arith.constant 0 : i32
    %c0_i32_1 = arith.constant 0 : i32
    %c0_i32_2 = arith.constant 0 : i32
    return %c0_i32, %c0_i32_0, %c0_i32_1 : i32, i32, i32
  }
  func.func @transform_5(%arg0: i32) -> (i32, i32, i32) {
    %c0_i32 = arith.constant 0 : i32
    %c0_i32_0 = arith.constant 0 : i32
    %c0_i32_1 = arith.constant 0 : i32
    %c0_i32_2 = arith.constant 0 : i32
    return %c0_i32, %c0_i32_0, %c0_i32_1 : i32, i32, i32
  }
  func.func @transform_6(%arg0: i32) -> (i32, i32, i32) {
    %c0_i32 = arith.constant 0 : i32
    %c0_i32_0 = arith.constant 0 : i32
    %c0_i32_1 = arith.constant 0 : i32
    %c0_i32_2 = arith.constant 0 : i32
    return %c0_i32, %c0_i32_0, %c0_i32_1 : i32, i32, i32
  }
  func.func @transform_7(%arg0: i32) -> (i32, i32, i32) {
    %c0_i32 = arith.constant 0 : i32
    %c0_i32_0 = arith.constant 0 : i32
    %c0_i32_1 = arith.constant 0 : i32
    %c0_i32_2 = arith.constant 0 : i32
    return %c0_i32, %c0_i32_0, %c0_i32_1 : i32, i32, i32
  }
  func.func @transform_8(%arg0: i32) -> (i32, i32, i32) {
    %c0_i32 = arith.constant 0 : i32
    %c0_i32_0 = arith.constant 0 : i32
    %c0_i32_1 = arith.constant 0 : i32
    %c0_i32_2 = arith.constant 0 : i32
    return %c0_i32, %c0_i32_0, %c0_i32_1 : i32, i32, i32
  }
  func.func @transform_9(%arg0: i32) -> (i32, i32, i32) {
    %c0_i32 = arith.constant 0 : i32
    %c0_i32_0 = arith.constant 0 : i32
    %c0_i32_1 = arith.constant 0 : i32
    %c0_i32_2 = arith.constant 0 : i32
    return %c0_i32, %c0_i32_0, %c0_i32_1 : i32, i32, i32
  }
  func.func @transform_10(%arg0: i32) -> (i32, i32, i32) {
    %c0_i32 = arith.constant 0 : i32
    %c0_i32_0 = arith.constant 0 : i32
    %c0_i32_1 = arith.constant 0 : i32
    %c0_i32_2 = arith.constant 0 : i32
    return %c0_i32, %c0_i32_0, %c0_i32_1 : i32, i32, i32
  }
  func.func @transform_11(%arg0: i32) -> (i32, i32, i32) {
    %c0_i32 = arith.constant 0 : i32
    %c0_i32_0 = arith.constant 0 : i32
    %c0_i32_1 = arith.constant 0 : i32
    %c0_i32_2 = arith.constant 0 : i32
    return %c0_i32, %c0_i32_0, %c0_i32_1 : i32, i32, i32
  }
  func.func @transform_12(%arg0: i32) -> (i32, i32, i32) {
    %c0_i32 = arith.constant 0 : i32
    %c0_i32_0 = arith.constant 0 : i32
    %c0_i32_1 = arith.constant 0 : i32
    %c0_i32_2 = arith.constant 0 : i32
    return %c0_i32, %c0_i32_0, %c0_i32_1 : i32, i32, i32
  }
  func.func @transform_13(%arg0: i32) -> (i32, i32, i32) {
    %c0_i32 = arith.constant 0 : i32
    %c0_i32_0 = arith.constant 0 : i32
    %c0_i32_1 = arith.constant 0 : i32
    %c0_i32_2 = arith.constant 0 : i32
    return %c0_i32, %c0_i32_0, %c0_i32_1 : i32, i32, i32
  }
  func.func @transform_14(%arg0: i32) -> (i32, i32) {
    %c0_i32 = arith.constant 0 : i32
    %c0_i32_0 = arith.constant 0 : i32
    %c0_i32_1 = arith.constant 0 : i32
    return %c0_i32, %c0_i32_0 : i32, i32
  }
}

</mosaic_0001>

<bundles_post_ra>
// kernel: tpu_custom_call.1
= control target key start
LH: loop header
LB: loop body
LE: loop exit
PB: predicated region body
PF: predicated region fallthrough
CT: control target
= control target key end

     0   :  { %19 = vsyncpa [#allocation3], 0  ;;  %s3630_s0 = inlined_call_operand.hbm [shape: f32[8,256], index: 0, kind: input, shape index: {}]   ;;  %s3631_s1 = inlined_call_operand.hbm [shape: f32[8,8], index: 1, kind: input, shape index: {}]   ;;  %s3632_s2 = inlined_call_operand.hbm [shape: f32[2,256,768], index: 2, kind: input, shape index: {}]   ;;  %s3633_s3 = inlined_call_operand.hbm [shape: f32[2,1,768], index: 3, kind: input, shape index: {}]   ;;  %s3634_s4 = inlined_call_operand.hbm [shape: f32[2,256,256], index: 4, kind: input, shape index: {}]   ;;  %s3635_s5 = inlined_call_operand.hbm [shape: f32[2,1,256], index: 5, kind: input, shape index: {}]   ;;  %s3636_s6 = inlined_call_operand.hbm [shape: f32[2,1,256], index: 6, kind: input, shape index: {}]   ;;  %s3637_s7 = inlined_call_operand.hbm [shape: f32[2,1,256], index: 7, kind: input, shape index: {}]   ;;  %s3638_s8 = inlined_call_operand.hbm [shape: f32[2,256,256], index: 8, kind: input, shape index: {}]   ;;  %s3639_s9 = inlined_call_operand.hbm [shape: f32[2,1,256], index: 9, kind: input, shape index: {}]   ;;  %s3640_s10 = inlined_call_operand.hbm [shape: f32[2,256,256], index: 10, kind: input, shape index: {}]   ;;  %s3641_s11 = inlined_call_operand.hbm [shape: f32[2,1,256], index: 11, kind: input, shape index: {}]   ;;  %s3642_s12 = inlined_call_operand.hbm [shape: f32[2,1,256], index: 12, kind: input, shape index: {}]   ;;  %s3643_s13 = inlined_call_operand.hbm [shape: f32[2,1,256], index: 13, kind: input, shape index: {}]   ;;  %s3644_s14 = inlined_call_operand.hbm [shape: f32[8,256], index: 14, kind: output, shape index: {}]  }
   0x1   :  { %20 = vsyncpa [#allocation6], 0 }
   0x2   :  { %21 = vsyncpa [#allocation9], 0 }
   0x3   :  { %22 = vsyncpa [#allocation12], 0 }
   0x4   :  { %23 = vsyncpa [#allocation15], 0 }
   0x5   :  { %24 = vsyncpa [#allocation18], 0 }
   0x6   :  { %25 = vsyncpa [#allocation21], 0 }
   0x7   :  { %26 = vsyncpa [#allocation24], 0 }
   0x8   :  { %27 = vsyncpa [#allocation4], 0  ;;  %s3271_s29 = smov [#allocation5]   ;;  %s3272_s15 = smov [#allocation8]  }
   0x9   :  { %s44_s30 = sshll.u32 %s3271_s29, 4  ;;  %s65_s16 = sshll.u32 %s3272_s15, 4  ;;  %s45_s30 = int_to_ptr.vmem [resolvable:$true] %s44_s30  ;;  %s66_s16 = int_to_ptr.vmem [resolvable:$true] %s65_s16 }
   0xa   :  { %s2961_s17 = scalar_lea.vmem %s45_s30, 128  ;;  %p2966_p1 = scmp.lt.s32.totalorder %s45_s30, %s45_s30 }
   0xb   :  { %p2962_p0 = scmp.ne.s32.totalorder %s45_s30, %s2961_s17  ;;  %p2967_p2 = scmp.lt.s32.totalorder %s2961_s17, %s2961_s17 }
   0xd   :  { %p2968_p3 = por %p2967_p2, %p2966_p1 }
   0xf   :  { %p2969_p4 = pnand %p2968_p3, %p2962_p0 }
  0x11   :  { %2972 = shalt.err (!%p2969_p4)
}
  0x12   :  { %47 = dma.hbm_to_vmem [thread:$0]  %s3631_s1, 128, %s45_s30, [#allocation6]  }
  0x13   :  { %s2981_s20 = scalar_lea.vmem %s66_s16, 192  ;;  %p2986_p6 = scmp.lt.s32.totalorder %s66_s16, %s66_s16 }
  0x14   :  { %p2982_p5 = scmp.ne.s32.totalorder %s66_s16, %s2981_s20  ;;  %p2987_p7 = scmp.lt.s32.totalorder %s2981_s20, %s2981_s20 }
  0x16   :  { %p2988_p8 = por %p2987_p7, %p2986_p6 }
  0x18   :  { %p2989_p9 = pnand %p2988_p8, %p2982_p5 }
  0x1a   :  { %2992 = shalt.err (!%p2989_p9)
}
  0x1b   :  { %s3273_s21 = smov 96   ;;  %s3274_s22 = smov 6  }
  0x1c   :  { %71 = dma.hbm_to_vmem [thread:$0]  %s3633_s3, 192, %s66_s16, [#allocation9], %s3273_s21, %s3273_s21, %s3274_s22  }
  0x1d   :  { %s3275_s25 = smov [#allocation11]  }
  0x1e   :  { %s89_s26 = sshll.u32 %s3275_s25, 4  ;;  %s90_s26 = int_to_ptr.vmem [resolvable:$true] %s89_s26 }
  0x1f   :  { %s3001_s27 = scalar_lea.vmem %s90_s26, 64  ;;  %p3006_p11 = scmp.lt.s32.totalorder %s90_s26, %s90_s26 }
  0x20   :  { %p3002_p10 = scmp.ne.s32.totalorder %s90_s26, %s3001_s27  ;;  %p3007_p12 = scmp.lt.s32.totalorder %s3001_s27, %s3001_s27 }
  0x22   :  { %p3008_p13 = por %p3007_p12, %p3006_p11 }
  0x24   :  { %p3009_p0 = pnand %p3008_p13, %p3002_p10 }
  0x26   :  { %3012 = shalt.err (!%p3009_p0)
}
  0x27   :  { %s3276_s1 = smov 32   ;;  %s3277_s28 = smov 2  }
  0x28   :  { %95 = dma.hbm_to_vmem [thread:$0]  %s3635_s5, 64, %s90_s26, [#allocation12], %s3276_s1, %s3276_s1, %s3277_s28  }
  0x29   :  { %s3278_s3 = smov [#allocation14]   ;;  %s3279_s16 = smov [#allocation17]  }
  0x2a   :  { %s113_s15 = sshll.u32 %s3278_s3, 4  ;;  %s137_s17 = sshll.u32 %s3279_s16, 4  ;;  %s114_s15 = int_to_ptr.vmem [resolvable:$true] %s113_s15  ;;  %s138_s17 = int_to_ptr.vmem [resolvable:$true] %s137_s17 }
  0x2b   :  { %s3021_s18 = scalar_lea.vmem %s114_s15, 64  ;;  %p3026_p2 = scmp.lt.s32.totalorder %s114_s15, %s114_s15 }
  0x2c   :  { %p3022_p1 = scmp.ne.s32.totalorder %s114_s15, %s3021_s18  ;;  %p3027_p3 = scmp.lt.s32.totalorder %s3021_s18, %s3021_s18 }
  0x2e   :  { %p3028_p4 = por %p3027_p3, %p3026_p2 }
  0x30   :  { %p3029_p5 = pnand %p3028_p4, %p3022_p1 }
  0x32   :  { %3032 = shalt.err (!%p3029_p5)
}
  0x33   :  { %119 = dma.hbm_to_vmem [thread:$0]  %s3637_s7, 64, %s114_s15, [#allocation15], %s3276_s1, %s3276_s1, %s3277_s28  }
  0x34   :  { %s3041_s5 = scalar_lea.vmem %s138_s17, 64  ;;  %p3046_p7 = scmp.lt.s32.totalorder %s138_s17, %s138_s17 }
  0x35   :  { %p3042_p6 = scmp.ne.s32.totalorder %s138_s17, %s3041_s5  ;;  %p3047_p8 = scmp.lt.s32.totalorder %s3041_s5, %s3041_s5 }
  0x37   :  { %p3048_p9 = por %p3047_p8, %p3046_p7 }
  0x39   :  { %p3049_p10 = pnand %p3048_p9, %p3042_p6 }
  0x3b   :  { %3052 = shalt.err (!%p3049_p10)
}
  0x3c   :  { %143 = dma.hbm_to_vmem [thread:$0]  %s3639_s9, 64, %s138_s17, [#allocation18], %s3276_s1, %s3276_s1, %s3277_s28  }
  0x3d   :  { %s3280_s23 = smov [#allocation20]   ;;  %s3281_s25 = smov [#allocation2]  }
  0x3e   :  { %s161_s24 = sshll.u32 %s3280_s23, 4  ;;  %s34_s7 = sshll.u32 %s3281_s25, 4  ;;  %s162_s24 = int_to_ptr.vmem [resolvable:$true] %s161_s24  ;;  %s35_s7 = int_to_ptr.vmem [resolvable:$true] %s34_s7 }
  0x3f   :  { %s3061_s26 = scalar_lea.vmem %s162_s24, 64  ;;  %p3066_p12 = scmp.lt.s32.totalorder %s162_s24, %s162_s24 }
  0x40   :  { %p3062_p11 = scmp.ne.s32.totalorder %s162_s24, %s3061_s26  ;;  %p3067_p13 = scmp.lt.s32.totalorder %s3061_s26, %s3061_s26 }
  0x42   :  { %p3068_p0 = por %p3067_p13, %p3066_p12 }
  0x44   :  { %p3069_p1 = pnand %p3068_p0, %p3062_p11 }
  0x46   :  { %3072 = shalt.err (!%p3069_p1)
}
  0x47   :  { %167 = dma.hbm_to_vmem [thread:$0]  %s3641_s11, 64, %s162_s24, [#allocation21], %s3276_s1, %s3276_s1, %s3277_s28  }
  0x48   :  { %s3081_s9 = scalar_lea.vmem %s35_s7, 256  ;;  %p3086_p3 = scmp.lt.s32.totalorder %s35_s7, %s35_s7 }
  0x49   :  { %p3082_p2 = scmp.ne.s32.totalorder %s35_s7, %s3081_s9  ;;  %p3087_p4 = scmp.lt.s32.totalorder %s3081_s9, %s3081_s9 }
  0x4b   :  { %p3088_p5 = por %p3087_p4, %p3086_p3 }
  0x4d   :  { %p3089_p6 = pnand %p3088_p5, %p3082_p2 }
  0x4f   :  { %3092 = shalt.err (!%p3089_p6)
}
  0x50   :  { %37 = dma.hbm_to_vmem [thread:$0]  %s3630_s0, 256, %s35_s7, [#allocation3]  }
  0x51   :  { %s3282_s15 = smov [#allocation7]  }
  0x52   :  { %s53_s16 = sshll.u32 %s3282_s15, 4  ;;  %s54_s16 = int_to_ptr.vmem [resolvable:$true] %s53_s16 }
  0x53   :  { %s3101_s17 = scalar_lea.vmem %s54_s16, 49152  ;;  %p3106_p8 = scmp.lt.s32.totalorder %s54_s16, %s54_s16 }
  0x54   :  { %p3102_p7 = scmp.ne.s32.totalorder %s54_s16, %s3101_s17  ;;  %p3107_p9 = scmp.lt.s32.totalorder %s3101_s17, %s3101_s17 }
  0x56   :  { %p3108_p10 = por %p3107_p9, %p3106_p8 }
  0x58   :  { %p3109_p11 = pnand %p3108_p10, %p3102_p7 }
  0x5a   :  { %3112 = shalt.err (!%p3109_p11)
}
  0x5b   :  { %s3283_s11 = smov 768   ;;  %s3284_s18 = smov 48  }
  0x5c   :  { %59 = dma.hbm_to_vmem [thread:$0]  %s3632_s2, 49152, %s54_s16, [#allocation6], %s3283_s11, %s3283_s11, %s3284_s18  }
  0x5d   :  { %s3285_s5 = smov [#allocation10]  }
  0x5e   :  { %s77_s21 = sshll.u32 %s3285_s5, 4  ;;  %s78_s21 = int_to_ptr.vmem [resolvable:$true] %s77_s21 }
  0x5f   :  { %s3121_s0 = scalar_lea.vmem %s78_s21, 16384  ;;  %p3126_p13 = scmp.lt.s32.totalorder %s78_s21, %s78_s21 }
  0x60   :  { %p3122_p12 = scmp.ne.s32.totalorder %s78_s21, %s3121_s0  ;;  %p3127_p0 = scmp.lt.s32.totalorder %s3121_s0, %s3121_s0 }
  0x62   :  { %p3128_p1 = por %p3127_p0, %p3126_p13 }
  0x64   :  { %p3129_p2 = pnand %p3128_p1, %p3122_p12 }
  0x66   :  { %3132 = shalt.err (!%p3129_p2)
}
  0x67   :  { %s3286_s22 = smov 256   ;;  %s3287_s23 = smov 16  }
  0x68   :  { %83 = dma.hbm_to_vmem [thread:$0]  %s3634_s4, 16384, %s78_s21, [#allocation9], %s3286_s22, %s3286_s22, %s3287_s23  }
  0x69   :  { %s3288_s2 = smov [#allocation13]   ;;  %s3289_s26 = smov [#allocation16]  }
  0x6a   :  { %s101_s7 = sshll.u32 %s3288_s2, 4  ;;  %s125_s27 = sshll.u32 %s3289_s26, 4  ;;  %s102_s7 = int_to_ptr.vmem [resolvable:$true] %s101_s7  ;;  %s126_s27 = int_to_ptr.vmem [resolvable:$true] %s125_s27 }
  0x6b   :  { %s3141_s29 = scalar_lea.vmem %s102_s7, 64  ;;  %p3146_p4 = scmp.lt.s32.totalorder %s102_s7, %s102_s7 }
  0x6c   :  { %p3142_p3 = scmp.ne.s32.totalorder %s102_s7, %s3141_s29  ;;  %p3147_p5 = scmp.lt.s32.totalorder %s3141_s29, %s3141_s29 }
  0x6e   :  { %p3148_p6 = por %p3147_p5, %p3146_p4 }
  0x70   :  { %p3149_p7 = pnand %p3148_p6, %p3142_p3 }
  0x72   :  { %3152 = shalt.err (!%p3149_p7)
}
  0x73   :  { %107 = dma.hbm_to_vmem [thread:$0]  %s3636_s6, 64, %s102_s7, [#allocation12], %s3276_s1, %s3276_s1, %s3277_s28  }
  0x74   :  { %s3161_s4 = scalar_lea.vmem %s126_s27, 16384  ;;  %p3166_p9 = scmp.lt.s32.totalorder %s126_s27, %s126_s27 }
  0x75   :  { %p3162_p8 = scmp.ne.s32.totalorder %s126_s27, %s3161_s4  ;;  %p3167_p10 = scmp.lt.s32.totalorder %s3161_s4, %s3161_s4 }
  0x77   :  { %p3168_p11 = por %p3167_p10, %p3166_p9 }
  0x79   :  { %p3169_p12 = pnand %p3168_p11, %p3162_p8 }
  0x7b   :  { %3172 = shalt.err (!%p3169_p12)
}
  0x7c   :  { %131 = dma.hbm_to_vmem [thread:$0]  %s3638_s8, 16384, %s126_s27, [#allocation15], %s3286_s22, %s3286_s22, %s3287_s23  }
  0x7d   :  { %s3290_s16 = smov [#allocation19]   ;;  %s3291_s11 = smov [#allocation22]  }
  0x7e   :  { %s149_s17 = sshll.u32 %s3290_s16, 4  ;;  %s173_s6 = sshll.u32 %s3291_s11, 4  ;;  %s150_s17 = int_to_ptr.vmem [resolvable:$true] %s149_s17  ;;  %s174_s6 = int_to_ptr.vmem [resolvable:$true] %s173_s6 }
  0x7f   :  { %s3181_s18 = scalar_lea.vmem %s150_s17, 16384  ;;  %p3186_p0 = scmp.lt.s32.totalorder %s150_s17, %s150_s17 }
  0x80   :  { %p3182_p13 = scmp.ne.s32.totalorder %s150_s17, %s3181_s18  ;;  %p3187_p1 = scmp.lt.s32.totalorder %s3181_s18, %s3181_s18 }
  0x82   :  { %p3188_p2 = por %p3187_p1, %p3186_p0 }
  0x84   :  { %p3189_p3 = pnand %p3188_p2, %p3182_p13 }
  0x86   :  { %3192 = shalt.err (!%p3189_p3)
}
  0x87   :  { %155 = dma.hbm_to_vmem [thread:$0]  %s3640_s10, 16384, %s150_s17, [#allocation18], %s3286_s22, %s3286_s22, %s3287_s23  }
  0x88   :  { %s3201_s8 = scalar_lea.vmem %s174_s6, 64  ;;  %p3206_p5 = scmp.lt.s32.totalorder %s174_s6, %s174_s6 }
  0x89   :  { %p3202_p4 = scmp.ne.s32.totalorder %s174_s6, %s3201_s8  ;;  %p3207_p6 = scmp.lt.s32.totalorder %s3201_s8, %s3201_s8 }
  0x8b   :  { %p3208_p7 = por %p3207_p6, %p3206_p5 }
  0x8d   :  { %p3209_p8 = pnand %p3208_p7, %p3202_p4 }
  0x8f   :  { %3212 = shalt.err (!%p3209_p8)
}
  0x90   :  { %179 = dma.hbm_to_vmem [thread:$0]  %s3642_s12, 64, %s174_s6, [#allocation21], %s3276_s1, %s3276_s1, %s3277_s28  }
  0x91   :  { %s3292_s0 = smov [#allocation23]  }
  0x92   :  { %s185_s24 = sshll.u32 %s3292_s0, 4  ;;  %s186_s24 = int_to_ptr.vmem [resolvable:$true] %s185_s24 }
  0x93   :  { %s3221_s25 = scalar_lea.vmem %s186_s24, 64  ;;  %p3226_p10 = scmp.lt.s32.totalorder %s186_s24, %s186_s24 }
  0x94   :  { %p3222_p9 = scmp.ne.s32.totalorder %s186_s24, %s3221_s25  ;;  %p3227_p11 = scmp.lt.s32.totalorder %s3221_s25, %s3221_s25 }
  0x96   :  { %p3228_p12 = por %p3227_p11, %p3226_p10 }
  0x98   :  { %p3229_p13 = pnand %p3228_p12, %p3222_p9 }
  0x9a   :  { %3232 = shalt.err (!%p3229_p13)
}
  0x9b   :  { %191 = dma.hbm_to_vmem [thread:$0]  %s3643_s13, 64, %s186_s24, [#allocation24], %s3276_s1, %s3276_s1, %s3277_s28  }
  0x9c   :  { %3253 = dma.done.wait [#allocation3], 256  }
  0x9d   :  { %3254 = vsyncadd [#allocation3], 4294967040 }
  0x9e   :  { %3255 = dma.done.wait [#allocation6], 49280  }
  0x9f   :  { %3256 = vsyncadd [#allocation6], 4294918016 }
  0xa0   :  { %3257 = dma.done.wait [#allocation9], 16576  }
  0xa1   :  { %3258 = vsyncadd [#allocation9], 4294950720 }
  0xa2   :  { %3259 = dma.done.wait [#allocation12], 128  }
  0xa3   :  { %3260 = vsyncadd [#allocation12], 4294967168 }
  0xa4   :  { %3261 = dma.done.wait [#allocation15], 16448  }
  0xa5   :  { %3262 = vsyncadd [#allocation15], 4294950848 }
  0xa6   :  { %3263 = dma.done.wait [#allocation18], 16448  }
  0xa7   :  { %3264 = vsyncadd [#allocation18], 4294950848 }
  0xa8   :  { %3265 = dma.done.wait [#allocation21], 128  }
  0xa9   :  { %3266 = vsyncadd [#allocation21], 4294967168 }
  0xaa   :  { %3267 = dma.done.wait [#allocation24], 64  }
  0xab   :  { %3268 = vsyncadd [#allocation24], 4294967232  ;;  %v328_v0 = vld [vmem:[#allocation7 + $0x2d8] sm:$0xff]  ;;  %v330_v1 = vld [vmem:[#allocation7 + $0x2e8] sm:$0xff]  ;;  %vm3294_vm0 = vmmov 0   ;;  %vm745_vm1 = vcmask 64512  }
  0xac   :  { %v327_v2 = vld [vmem:[#allocation7 + $0x2d0] sm:$0xff]  ;;  %461 = vmatprep.subr.mxu0 %v328_v0  ;;  %532 = vmatprep.subr.mxu1 %v330_v1  ;;  %v329_v3 = vld [vmem:[#allocation7 + $0x2e0] sm:$0xff]  ;;  %v322_v4 = vld [vmem:[#allocation7 + $0x2a8] sm:$0xff]  ;;  %s3295_s12 = smov [#allocation25]  }
  0xad   :  { %v324_v5 = vld [vmem:[#allocation7 + $0x2b8] sm:$0xff]  ;;  %462 = vmatpush1.msra.mxu0 %v327_v2  ;;  %533 = vmatpush1.msra.mxu1 %v329_v3  ;;  %v321_v6 = vld [vmem:[#allocation7 + $0x2a0] sm:$0xff]  ;;  %v323_v7 = vld [vmem:[#allocation7 + $0x2b0] sm:$0xff]  ;;  %s2825_s13 = sshll.u32 %s3295_s12, 4  ;;  %s2826_s13 = int_to_ptr.vmem [resolvable:$true] %s2825_s13 }
  0xae   :  { %v316_v8 = vld [vmem:[#allocation7 + $0x278] sm:$0xff]  ;;  %463 = vmatprep.subr.mxu0 %v322_v4  ;;  %534 = vmatprep.subr.mxu1 %v324_v5  ;;  %v318_v9 = vld [vmem:[#allocation7 + $0x288] sm:$0xff]  ;;  %v315_v10 = vld [vmem:[#allocation7 + $0x270] sm:$0xff]  ;;  %s3233_s1 = scalar_lea.vmem %s2826_s13, 256  ;;  %p3238_p1 = scmp.lt.s32.totalorder %s2826_s13, %s2826_s13 }
  0xaf   :  { %v317_v11 = vld [vmem:[#allocation7 + $0x280] sm:$0xff]  ;;  %464 = vmatpush1.msra.mxu0 %v321_v6  ;;  %535 = vmatpush1.msra.mxu1 %v323_v7  ;;  %v310_v12 = vld [vmem:[#allocation7 + $0x248] sm:$0xff]  ;;  %v312_v13 = vld [vmem:[#allocation7 + $0x258] sm:$0xff]  ;;  %p3234_p0 = scmp.ne.s32.totalorder %s2826_s13, %s3233_s1  ;;  %p3239_p2 = scmp.lt.s32.totalorder %s3233_s1, %s3233_s1 }
  0xb0   :  { %465 = vmatprep.subr.mxu0 %v316_v8  ;;  %536 = vmatprep.subr.mxu1 %v318_v9  ;;  %v309_v14 = vld [vmem:[#allocation7 + $0x240] sm:$0xff]  ;;  %v311_v15 = vld [vmem:[#allocation7 + $0x250] sm:$0xff]  ;;  %v304_v16 = vld [vmem:[#allocation7 + $0x218] sm:$0xff] }
  0xb1   :  { %466 = vmatpush1.msra.mxu0 %v315_v10  ;;  %537 = vmatpush1.msra.mxu1 %v317_v11  ;;  %v306_v17 = vld [vmem:[#allocation7 + $0x228] sm:$0xff]  ;;  %v303_v18 = vld [vmem:[#allocation7 + $0x210] sm:$0xff]  ;;  %v305_v19 = vld [vmem:[#allocation7 + $0x220] sm:$0xff]  ;;  %p3240_p3 = por %p3239_p2, %p3238_p1 }
  0xb2   :  { %467 = vmatprep.subr.mxu0 %v310_v12  ;;  %538 = vmatprep.subr.mxu1 %v312_v13  ;;  %v298_v20 = vld [vmem:[#allocation7 + $0x1e8] sm:$0xff]  ;;  %v300_v21 = vld [vmem:[#allocation7 + $0x1f8] sm:$0xff]  ;;  %v297_v22 = vld [vmem:[#allocation7 + $0x1e0] sm:$0xff] }
  0xb3   :  { %468 = vmatpush1.msra.mxu0 %v309_v14  ;;  %539 = vmatpush1.msra.mxu1 %v311_v15  ;;  %v299_v23 = vld [vmem:[#allocation7 + $0x1f0] sm:$0xff]  ;;  %v292_v24 = vld [vmem:[#allocation7 + $0x1b8] sm:$0xff]  ;;  %v294_v25 = vld [vmem:[#allocation7 + $0x1c8] sm:$0xff]  ;;  %p3241_p4 = pnand %p3240_p3, %p3234_p0 }
  0xb4   :  { %469 = vmatprep.subr.mxu0 %v304_v16  ;;  %540 = vmatprep.subr.mxu1 %v306_v17  ;;  %v291_v26 = vld [vmem:[#allocation7 + $0x1b0] sm:$0xff]  ;;  %v293_v27 = vld [vmem:[#allocation7 + $0x1c0] sm:$0xff]  ;;  %v286_v28 = vld [vmem:[#allocation7 + $0x188] sm:$0xff] }
  0xb5   :  { %470 = vmatpush1.msra.mxu0 %v303_v18  ;;  %541 = vmatpush1.msra.mxu1 %v305_v19  ;;  %v288_v29 = vld [vmem:[#allocation7 + $0x198] sm:$0xff]  ;;  %v285_v30 = vld [vmem:[#allocation7 + $0x180] sm:$0xff]  ;;  %v287_v31 = vld [vmem:[#allocation7 + $0x190] sm:$0xff] }
  0xb6   :  { %471 = vmatprep.subr.mxu0 %v298_v20  ;;  %542 = vmatprep.subr.mxu1 %v300_v21  ;;  %v280_v32 = vld [vmem:[#allocation7 + $0x158] sm:$0xff]  ;;  %v282_v33 = vld [vmem:[#allocation7 + $0x168] sm:$0xff]  ;;  %v279_v34 = vld [vmem:[#allocation7 + $0x150] sm:$0xff] }
  0xb7   :  { %472 = vmatpush1.msra.mxu0 %v297_v22  ;;  %543 = vmatpush1.msra.mxu1 %v299_v23  ;;  %v281_v35 = vld [vmem:[#allocation7 + $0x160] sm:$0xff]  ;;  %v274_v36 = vld [vmem:[#allocation7 + $0x128] sm:$0xff]  ;;  %v276_v37 = vld [vmem:[#allocation7 + $0x138] sm:$0xff] }
  0xb8   :  { %473 = vmatprep.subr.mxu0 %v292_v24  ;;  %544 = vmatprep.subr.mxu1 %v294_v25  ;;  %v273_v38 = vld [vmem:[#allocation7 + $0x120] sm:$0xff]  ;;  %v275_v39 = vld [vmem:[#allocation7 + $0x130] sm:$0xff]  ;;  %v268_v40 = vld [vmem:[#allocation7 + $0xf8] sm:$0xff] }
  0xb9   :  { %474 = vmatpush1.msra.mxu0 %v291_v26  ;;  %545 = vmatpush1.msra.mxu1 %v293_v27  ;;  %v270_v41 = vld [vmem:[#allocation7 + $0x108] sm:$0xff]  ;;  %v267_v42 = vld [vmem:[#allocation7 + $0xf0] sm:$0xff]  ;;  %v269_v43 = vld [vmem:[#allocation7 + $0x100] sm:$0xff] }
  0xba   :  { %475 = vmatprep.subr.mxu0 %v286_v28  ;;  %546 = vmatprep.subr.mxu1 %v288_v29  ;;  %v262_v44 = vld [vmem:[#allocation7 + $0xc8] sm:$0xff]  ;;  %v264_v45 = vld [vmem:[#allocation7 + $0xd8] sm:$0xff]  ;;  %v261_v46 = vld [vmem:[#allocation7 + $0xc0] sm:$0xff] }
  0xbb   :  { %476 = vmatpush1.msra.mxu0 %v285_v30  ;;  %547 = vmatpush1.msra.mxu1 %v287_v31  ;;  %v263_v47 = vld [vmem:[#allocation7 + $0xd0] sm:$0xff]  ;;  %v256_v48 = vld [vmem:[#allocation7 + $0x98] sm:$0xff]  ;;  %v258_v49 = vld [vmem:[#allocation7 + $0xa8] sm:$0xff] }
  0xbc   :  { %477 = vmatprep.subr.mxu0 %v280_v32  ;;  %548 = vmatprep.subr.mxu1 %v282_v33  ;;  %v255_v50 = vld [vmem:[#allocation7 + $0x90] sm:$0xff]  ;;  %v257_v51 = vld [vmem:[#allocation7 + $0xa0] sm:$0xff]  ;;  %v250_v52 = vld [vmem:[#allocation7 + $0x68] sm:$0xff] }
  0xbd   :  { %478 = vmatpush1.msra.mxu0 %v279_v34  ;;  %549 = vmatpush1.msra.mxu1 %v281_v35  ;;  %v252_v53 = vld [vmem:[#allocation7 + $0x78] sm:$0xff]  ;;  %v249_v54 = vld [vmem:[#allocation7 + $0x60] sm:$0xff]  ;;  %v251_v55 = vld [vmem:[#allocation7 + $0x70] sm:$0xff] }
  0xbe   :  { %479 = vmatprep.subr.mxu0 %v274_v36  ;;  %550 = vmatprep.subr.mxu1 %v276_v37  ;;  %v244_v56 = vld [vmem:[#allocation7 + $0x38] sm:$0xff]  ;;  %v246_v57 = vld [vmem:[#allocation7 + $0x48] sm:$0xff]  ;;  %v243_v58 = vld [vmem:[#allocation7 + $0x30] sm:$0xff] }
  0xbf   :  { %480 = vmatpush1.msra.mxu0 %v273_v38  ;;  %551 = vmatpush1.msra.mxu1 %v275_v39  ;;  %v245_v59 = vld [vmem:[#allocation7 + $0x40] sm:$0xff]  ;;  %v238_v60 = vld [vmem:[#allocation7 + $0x8] sm:$0xff]  ;;  %v240_v61 = vld [vmem:[#allocation7 + $0x18] sm:$0xff] }
  0xc0   :  { %481 = vmatprep.subr.mxu0 %v268_v40  ;;  %552 = vmatprep.subr.mxu1 %v270_v41  ;;  %v237_v62 = vld [vmem:[#allocation7] sm:$0xff]  ;;  %v239_v63 = vld [vmem:[#allocation7 + $0x10] sm:$0xff]  ;;  %v424_v0 = vld [vmem:[#allocation7 + $0x5d8] sm:$0xff] }
  0xc1   :  { %482 = vmatpush1.msra.mxu0 %v267_v42  ;;  %553 = vmatpush1.msra.mxu1 %v269_v43  ;;  %v426_v1 = vld [vmem:[#allocation7 + $0x5e8] sm:$0xff]  ;;  %v423_v2 = vld [vmem:[#allocation7 + $0x5d0] sm:$0xff]  ;;  %v425_v3 = vld [vmem:[#allocation7 + $0x5e0] sm:$0xff] }
  0xc2   :  { %483 = vmatprep.subr.mxu0 %v262_v44  ;;  %554 = vmatprep.subr.mxu1 %v264_v45  ;;  %v418_v4 = vld [vmem:[#allocation7 + $0x5a8] sm:$0xff]  ;;  %v420_v5 = vld [vmem:[#allocation7 + $0x5b8] sm:$0xff]  ;;  %v417_v6 = vld [vmem:[#allocation7 + $0x5a0] sm:$0xff] }
  0xc3   :  { %484 = vmatpush1.msra.mxu0 %v261_v46  ;;  %555 = vmatpush1.msra.mxu1 %v263_v47  ;;  %v419_v7 = vld [vmem:[#allocation7 + $0x5b0] sm:$0xff]  ;;  %v412_v8 = vld [vmem:[#allocation7 + $0x578] sm:$0xff]  ;;  %v414_v9 = vld [vmem:[#allocation7 + $0x588] sm:$0xff] }
  0xc4   :  { %485 = vmatprep.subr.mxu0 %v256_v48  ;;  %556 = vmatprep.subr.mxu1 %v258_v49  ;;  %v411_v10 = vld [vmem:[#allocation7 + $0x570] sm:$0xff]  ;;  %v413_v11 = vld [vmem:[#allocation7 + $0x580] sm:$0xff]  ;;  %v406_v12 = vld [vmem:[#allocation7 + $0x548] sm:$0xff] }
  0xc5   :  { %486 = vmatpush1.msra.mxu0 %v255_v50  ;;  %557 = vmatpush1.msra.mxu1 %v257_v51  ;;  %v408_v13 = vld [vmem:[#allocation7 + $0x558] sm:$0xff]  ;;  %v405_v14 = vld [vmem:[#allocation7 + $0x540] sm:$0xff]  ;;  %v407_v15 = vld [vmem:[#allocation7 + $0x550] sm:$0xff] }
  0xc6   :  { %487 = vmatprep.subr.mxu0 %v250_v52  ;;  %558 = vmatprep.subr.mxu1 %v252_v53  ;;  %v400_v16 = vld [vmem:[#allocation7 + $0x518] sm:$0xff]  ;;  %v402_v17 = vld [vmem:[#allocation7 + $0x528] sm:$0xff]  ;;  %v399_v18 = vld [vmem:[#allocation7 + $0x510] sm:$0xff] }
  0xc7   :  { %488 = vmatpush1.msra.mxu0 %v249_v54  ;;  %559 = vmatpush1.msra.mxu1 %v251_v55  ;;  %v401_v19 = vld [vmem:[#allocation7 + $0x520] sm:$0xff]  ;;  %v394_v20 = vld [vmem:[#allocation7 + $0x4e8] sm:$0xff]  ;;  %v396_v21 = vld [vmem:[#allocation7 + $0x4f8] sm:$0xff] }
  0xc8   :  { %489 = vmatprep.subr.mxu0 %v244_v56  ;;  %560 = vmatprep.subr.mxu1 %v246_v57  ;;  %v393_v22 = vld [vmem:[#allocation7 + $0x4e0] sm:$0xff]  ;;  %v395_v23 = vld [vmem:[#allocation7 + $0x4f0] sm:$0xff]  ;;  %v388_v24 = vld [vmem:[#allocation7 + $0x4b8] sm:$0xff] }
  0xc9   :  { %490 = vmatpush1.msra.mxu0 %v243_v58  ;;  %561 = vmatpush1.msra.mxu1 %v245_v59  ;;  %v390_v25 = vld [vmem:[#allocation7 + $0x4c8] sm:$0xff]  ;;  %v387_v26 = vld [vmem:[#allocation7 + $0x4b0] sm:$0xff]  ;;  %v389_v27 = vld [vmem:[#allocation7 + $0x4c0] sm:$0xff] }
  0xca   :  { %491 = vmatprep.subr.mxu0 %v238_v60  ;;  %562 = vmatprep.subr.mxu1 %v240_v61  ;;  %v382_v28 = vld [vmem:[#allocation7 + $0x488] sm:$0xff]  ;;  %v384_v29 = vld [vmem:[#allocation7 + $0x498] sm:$0xff]  ;;  %v381_v30 = vld [vmem:[#allocation7 + $0x480] sm:$0xff] }
  0xcb   :  { %492 = vmatpush1.msra.mxu0 %v237_v62  ;;  %563 = vmatpush1.msra.mxu1 %v239_v63  ;;  %v383_v31 = vld [vmem:[#allocation7 + $0x490] sm:$0xff]  ;;  %v376_v32 = vld [vmem:[#allocation7 + $0x458] sm:$0xff]  ;;  %v378_v33 = vld [vmem:[#allocation7 + $0x468] sm:$0xff] }
  0xcc   :  { %493 = vmatprep.subr.mxu0 %v424_v0  ;;  %564 = vmatprep.subr.mxu1 %v426_v1  ;;  %v375_v34 = vld [vmem:[#allocation7 + $0x450] sm:$0xff]  ;;  %v377_v35 = vld [vmem:[#allocation7 + $0x460] sm:$0xff]  ;;  %v370_v36 = vld [vmem:[#allocation7 + $0x428] sm:$0xff] }
  0xcd   :  { %494 = vmatpush2.msra.mxu0 %v423_v2  ;;  %565 = vmatpush2.msra.mxu1 %v425_v3  ;;  %v372_v37 = vld [vmem:[#allocation7 + $0x438] sm:$0xff]  ;;  %v369_v38 = vld [vmem:[#allocation7 + $0x420] sm:$0xff]  ;;  %v371_v39 = vld [vmem:[#allocation7 + $0x430] sm:$0xff] }
  0xce   :  { %495 = vmatprep.subr.mxu0 %v418_v4  ;;  %566 = vmatprep.subr.mxu1 %v420_v5  ;;  %v364_v40 = vld [vmem:[#allocation7 + $0x3f8] sm:$0xff]  ;;  %v366_v41 = vld [vmem:[#allocation7 + $0x408] sm:$0xff]  ;;  %v363_v42 = vld [vmem:[#allocation7 + $0x3f0] sm:$0xff] }
  0xcf   :  { %496 = vmatpush2.msra.mxu0 %v417_v6  ;;  %567 = vmatpush2.msra.mxu1 %v419_v7  ;;  %v365_v43 = vld [vmem:[#allocation7 + $0x400] sm:$0xff]  ;;  %v358_v44 = vld [vmem:[#allocation7 + $0x3c8] sm:$0xff]  ;;  %v360_v45 = vld [vmem:[#allocation7 + $0x3d8] sm:$0xff] }
  0xd0   :  { %497 = vmatprep.subr.mxu0 %v412_v8  ;;  %568 = vmatprep.subr.mxu1 %v414_v9  ;;  %v357_v46 = vld [vmem:[#allocation7 + $0x3c0] sm:$0xff]  ;;  %v359_v47 = vld [vmem:[#allocation7 + $0x3d0] sm:$0xff]  ;;  %v352_v48 = vld [vmem:[#allocation7 + $0x398] sm:$0xff] }
  0xd1   :  { %498 = vmatpush2.msra.mxu0 %v411_v10  ;;  %569 = vmatpush2.msra.mxu1 %v413_v11  ;;  %v354_v49 = vld [vmem:[#allocation7 + $0x3a8] sm:$0xff]  ;;  %v351_v50 = vld [vmem:[#allocation7 + $0x390] sm:$0xff]  ;;  %v353_v51 = vld [vmem:[#allocation7 + $0x3a0] sm:$0xff] }
  0xd2   :  { %499 = vmatprep.subr.mxu0 %v406_v12  ;;  %570 = vmatprep.subr.mxu1 %v408_v13  ;;  %v346_v52 = vld [vmem:[#allocation7 + $0x368] sm:$0xff]  ;;  %v348_v53 = vld [vmem:[#allocation7 + $0x378] sm:$0xff]  ;;  %v345_v54 = vld [vmem:[#allocation7 + $0x360] sm:$0xff] }
  0xd3   :  { %500 = vmatpush2.msra.mxu0 %v405_v14  ;;  %571 = vmatpush2.msra.mxu1 %v407_v15  ;;  %v347_v55 = vld [vmem:[#allocation7 + $0x370] sm:$0xff]  ;;  %v340_v56 = vld [vmem:[#allocation7 + $0x338] sm:$0xff]  ;;  %v342_v57 = vld [vmem:[#allocation7 + $0x348] sm:$0xff] }
  0xd4   :  { %501 = vmatprep.subr.mxu0 %v400_v16  ;;  %572 = vmatprep.subr.mxu1 %v402_v17  ;;  %v339_v58 = vld [vmem:[#allocation7 + $0x330] sm:$0xff]  ;;  %v341_v59 = vld [vmem:[#allocation7 + $0x340] sm:$0xff]  ;;  %v334_v60 = vld [vmem:[#allocation7 + $0x308] sm:$0xff] }
  0xd5   :  { %502 = vmatpush2.msra.mxu0 %v399_v18  ;;  %573 = vmatpush2.msra.mxu1 %v401_v19  ;;  %v336_v61 = vld [vmem:[#allocation7 + $0x318] sm:$0xff]  ;;  %v333_v62 = vld [vmem:[#allocation7 + $0x300] sm:$0xff]  ;;  %v3443_v63 = vld [vmem:[#allocation2 + $0x8] sm:$0xff] }
  0xd6   :  { %503 = vmatprep.subr.mxu0 %v394_v20  ;;  %574 = vmatprep.subr.mxu1 %v396_v21  ;;  %v335_v0 = vld [vmem:[#allocation7 + $0x310] sm:$0xff]  ;;  %v3445_v1 = vld [vmem:[#allocation2] sm:$0xff]  ;;  %v332_v2 = vld [vmem:[#allocation7 + $0x2f8] sm:$0xff] }
  0xd7   :  { %504 = vmatpush2.msra.mxu0 %v393_v22  ;;  %575 = vmatpush2.msra.mxu1 %v395_v23  ;;  %v331_v3 = vld [vmem:[#allocation7 + $0x2f0] sm:$0xff]  ;;  %v326_v4 = vld [vmem:[#allocation7 + $0x2c8] sm:$0xff]  ;;  %v325_v5 = vld [vmem:[#allocation7 + $0x2c0] sm:$0xff] }
  0xd8   :  { %505 = vmatprep.subr.mxu0 %v388_v24  ;;  %576 = vmatprep.subr.mxu1 %v390_v25  ;;  %v320_v6 = vld [vmem:[#allocation7 + $0x298] sm:$0xff]  ;;  %v319_v7 = vld [vmem:[#allocation7 + $0x290] sm:$0xff]  ;;  %v314_v8 = vld [vmem:[#allocation7 + $0x268] sm:$0xff] }
  0xd9   :  { %506 = vmatpush2.msra.mxu0 %v387_v26  ;;  %577 = vmatpush2.msra.mxu1 %v389_v27  ;;  %v313_v9 = vld [vmem:[#allocation7 + $0x260] sm:$0xff]  ;;  %v308_v10 = vld [vmem:[#allocation7 + $0x238] sm:$0xff]  ;;  %v307_v11 = vld [vmem:[#allocation7 + $0x230] sm:$0xff] }
  0xda   :  { %507 = vmatprep.subr.mxu0 %v382_v28  ;;  %578 = vmatprep.subr.mxu1 %v384_v29  ;;  %v302_v12 = vld [vmem:[#allocation7 + $0x208] sm:$0xff]  ;;  %v301_v13 = vld [vmem:[#allocation7 + $0x200] sm:$0xff]  ;;  %v296_v14 = vld [vmem:[#allocation7 + $0x1d8] sm:$0xff] }
  0xdb   :  { %508 = vmatpush2.msra.mxu0 %v381_v30  ;;  %579 = vmatpush2.msra.mxu1 %v383_v31  ;;  %v295_v15 = vld [vmem:[#allocation7 + $0x1d0] sm:$0xff]  ;;  %v290_v16 = vld [vmem:[#allocation7 + $0x1a8] sm:$0xff]  ;;  %v289_v17 = vld [vmem:[#allocation7 + $0x1a0] sm:$0xff] }
  0xdc   :  { %509 = vmatprep.subr.mxu0 %v376_v32  ;;  %580 = vmatprep.subr.mxu1 %v378_v33  ;;  %v284_v18 = vld [vmem:[#allocation7 + $0x178] sm:$0xff]  ;;  %v283_v19 = vld [vmem:[#allocation7 + $0x170] sm:$0xff]  ;;  %v278_v20 = vld [vmem:[#allocation7 + $0x148] sm:$0xff] }
  0xdd   :  { %510 = vmatpush2.msra.mxu0 %v375_v34  ;;  %581 = vmatpush2.msra.mxu1 %v377_v35  ;;  %v277_v21 = vld [vmem:[#allocation7 + $0x140] sm:$0xff]  ;;  %v272_v22 = vld [vmem:[#allocation7 + $0x118] sm:$0xff]  ;;  %v271_v23 = vld [vmem:[#allocation7 + $0x110] sm:$0xff] }
  0xde   :  { %511 = vmatprep.subr.mxu0 %v370_v36  ;;  %582 = vmatprep.subr.mxu1 %v372_v37  ;;  %v266_v24 = vld [vmem:[#allocation7 + $0xe8] sm:$0xff]  ;;  %v265_v25 = vld [vmem:[#allocation7 + $0xe0] sm:$0xff]  ;;  %v260_v26 = vld [vmem:[#allocation7 + $0xb8] sm:$0xff] }
  0xdf   :  { %512 = vmatpush2.msra.mxu0 %v369_v38  ;;  %583 = vmatpush2.msra.mxu1 %v371_v39  ;;  %v259_v27 = vld [vmem:[#allocation7 + $0xb0] sm:$0xff]  ;;  %v254_v28 = vld [vmem:[#allocation7 + $0x88] sm:$0xff]  ;;  %v253_v29 = vld [vmem:[#allocation7 + $0x80] sm:$0xff] }
  0xe0   :  { %513 = vmatprep.subr.mxu0 %v364_v40  ;;  %584 = vmatprep.subr.mxu1 %v366_v41  ;;  %v248_v30 = vld [vmem:[#allocation7 + $0x58] sm:$0xff]  ;;  %v247_v31 = vld [vmem:[#allocation7 + $0x50] sm:$0xff]  ;;  %v242_v32 = vld [vmem:[#allocation7 + $0x28] sm:$0xff] }
  0xe1   :  { %514 = vmatpush2.msra.mxu0 %v363_v42  ;;  %585 = vmatpush2.msra.mxu1 %v365_v43  ;;  %v241_v33 = vld [vmem:[#allocation7 + $0x20] sm:$0xff]  ;;  %v428_v34 = vld [vmem:[#allocation7 + $0x5f8] sm:$0xff]  ;;  %v427_v35 = vld [vmem:[#allocation7 + $0x5f0] sm:$0xff] }
  0xe2   :  { %515 = vmatprep.subr.mxu0 %v358_v44  ;;  %586 = vmatprep.subr.mxu1 %v360_v45  ;;  %v422_v36 = vld [vmem:[#allocation7 + $0x5c8] sm:$0xff]  ;;  %v421_v37 = vld [vmem:[#allocation7 + $0x5c0] sm:$0xff]  ;;  %v416_v38 = vld [vmem:[#allocation7 + $0x598] sm:$0xff] }
  0xe3   :  { %516 = vmatpush2.msra.mxu0 %v357_v46  ;;  %587 = vmatpush2.msra.mxu1 %v359_v47  ;;  %v415_v39 = vld [vmem:[#allocation7 + $0x590] sm:$0xff]  ;;  %v410_v40 = vld [vmem:[#allocation7 + $0x568] sm:$0xff]  ;;  %v409_v41 = vld [vmem:[#allocation7 + $0x560] sm:$0xff] }
  0xe4   :  { %517 = vmatprep.subr.mxu0 %v352_v48  ;;  %588 = vmatprep.subr.mxu1 %v354_v49  ;;  %v404_v42 = vld [vmem:[#allocation7 + $0x538] sm:$0xff]  ;;  %v403_v43 = vld [vmem:[#allocation7 + $0x530] sm:$0xff]  ;;  %v398_v44 = vld [vmem:[#allocation7 + $0x508] sm:$0xff] }
  0xe5   :  { %518 = vmatpush2.msra.mxu0 %v351_v50  ;;  %589 = vmatpush2.msra.mxu1 %v353_v51  ;;  %v397_v45 = vld [vmem:[#allocation7 + $0x500] sm:$0xff]  ;;  %v392_v46 = vld [vmem:[#allocation7 + $0x4d8] sm:$0xff]  ;;  %v391_v47 = vld [vmem:[#allocation7 + $0x4d0] sm:$0xff] }
  0xe6   :  { %519 = vmatprep.subr.mxu0 %v346_v52  ;;  %590 = vmatprep.subr.mxu1 %v348_v53  ;;  %v386_v48 = vld [vmem:[#allocation7 + $0x4a8] sm:$0xff]  ;;  %v385_v49 = vld [vmem:[#allocation7 + $0x4a0] sm:$0xff]  ;;  %v380_v50 = vld [vmem:[#allocation7 + $0x478] sm:$0xff] }
  0xe7   :  { %520 = vmatpush2.msra.mxu0 %v345_v54  ;;  %591 = vmatpush2.msra.mxu1 %v347_v55  ;;  %v379_v51 = vld [vmem:[#allocation7 + $0x470] sm:$0xff]  ;;  %v374_v52 = vld [vmem:[#allocation7 + $0x448] sm:$0xff]  ;;  %v373_v53 = vld [vmem:[#allocation7 + $0x440] sm:$0xff] }
  0xe8   :  { %521 = vmatprep.subr.mxu0 %v340_v56  ;;  %592 = vmatprep.subr.mxu1 %v342_v57  ;;  %v368_v54 = vld [vmem:[#allocation7 + $0x418] sm:$0xff]  ;;  %v367_v55 = vld [vmem:[#allocation7 + $0x410] sm:$0xff]  ;;  %v362_v56 = vld [vmem:[#allocation7 + $0x3e8] sm:$0xff] }
  0xe9   :  { %522 = vmatpush2.msra.mxu0 %v339_v58  ;;  %593 = vmatpush2.msra.mxu1 %v341_v59  ;;  %v361_v57 = vld [vmem:[#allocation7 + $0x3e0] sm:$0xff]  ;;  %v356_v58 = vld [vmem:[#allocation7 + $0x3b8] sm:$0xff]  ;;  %v355_v59 = vld [vmem:[#allocation7 + $0x3b0] sm:$0xff] }
  0xea   :  { %523 = vmatprep.subr.mxu0 %v334_v60  ;;  %594 = vmatprep.subr.mxu1 %v336_v61  ;;  %v350_v60 = vld [vmem:[#allocation7 + $0x388] sm:$0xff]  ;;  %v349_v61 = vld [vmem:[#allocation7 + $0x380] sm:$0xff] }
  0xeb   :  { %524 = vmatpush2.msra.mxu0 %v333_v62  ;;  %525 = vmatprep.mubr.f32.mxu0 %v3443_v63  ;;  %v344_v62 = vld [vmem:[#allocation7 + $0x358] sm:$0xff] }
  0xec   :  { %595 = vmatpush2.msra.mxu1 %v335_v0  ;;  %596 = vmatprep.mubr.f32.mxu1 %v3443_v63  ;;  %v343_v0 = vld [vmem:[#allocation7 + $0x350] sm:$0xff] }
  0xed   :  { %526 = vmatmul.mubr.f32.vlgmr.msra.gmra.mxu0 %v3445_v1  ;;  %597 = vmatmul.mubr.f32.vlgmr.msra.gmra.mxu1 %v3445_v1 }
  0xee   :  { %603 = vmatprep.subr.mxu0 %v332_v2  ;;  %667 = vmatprep.mubr.f32.mxu0 %v3443_v63  ;;  %v338_v2 = vld [vmem:[#allocation7 + $0x328] sm:$0xff] }
  0xef   :  { %604 = vmatpush1.msra.mxu0 %v331_v3  ;;  %v337_v3 = vld [vmem:[#allocation7 + $0x320] sm:$0xff] }
  0xf0   :  { %605 = vmatprep.subr.mxu0 %v326_v4  ;;  %v3293_v4 = vmov 0.0  }
  0xf1   :  { %606 = vmatpush1.msra.mxu0 %v325_v5  ;;  %v431_v5 = vlaneseq }
  0xf2   :  { %607 = vmatprep.subr.mxu0 %v320_v6 }
  0xf3   :  { %608 = vmatpush1.msra.mxu0 %v319_v7  ;;  %v3456_v6 = vshrl.u32 %v431_v5, 7  ;;  %v1008_v5 = vld [vmem:[#allocation10 + $0xb8] sm:$0xff] }
  0xf4   :  { %609 = vmatprep.subr.mxu0 %v314_v8 }
  0xf5   :  { %610 = vmatpush1.msra.mxu0 %v313_v9  ;;  %v3459_v7 = vsub.s32 0, %v3456_v6  ;;  %v441_v8 = vsub.s32 2, %v3456_v6  ;;  %v429_v9 = vld [vmem:[#allocation8] sm:$0x3f] }
  0xf6   :  { %611 = vmatprep.subr.mxu0 %v308_v10 }
  0xf7   :  { %612 = vmatpush1.msra.mxu0 %v307_v11  ;;  %v434_v10 = vrot.slane %v429_v9, %v3459_v7  ;;  %v442_v11 = vrot.slane %v429_v9, %v441_v8 }
  0xf8   :  { %613 = vmatprep.subr.mxu0 %v302_v12 }
  0xf9   :  { %614 = vmatpush1.msra.mxu0 %v301_v13 }
  0xfa   :  { %615 = vmatprep.subr.mxu0 %v296_v14 }
  0xfb   :  { %616 = vmatpush1.msra.mxu0 %v295_v15 }
  0xfc   :  { %617 = vmatprep.subr.mxu0 %v290_v16 }
  0xfd   :  { %618 = vmatpush1.msra.mxu0 %v289_v17  ;;  %v449_v17 = vsub.s32 4, %v3456_v6 }
  0xfe   :  { %619 = vmatprep.subr.mxu0 %v284_v18 }
  0xff   :  { %620 = vmatpush1.msra.mxu0 %v283_v19  ;;  %v450_v18 = vrot.slane %v429_v9, %v449_v17 }
 0x100   :  { %621 = vmatprep.subr.mxu0 %v278_v20 }
 0x101   :  { %622 = vmatpush1.msra.mxu0 %v277_v21 }
 0x102   :  { %623 = vmatprep.subr.mxu0 %v272_v22 }
 0x103   :  { %624 = vmatpush1.msra.mxu0 %v271_v23  ;;  %v236_v23 = vld [vmem:[#allocation5] sm:$0xff] }
 0x104   :  { %625 = vmatprep.subr.mxu0 %v266_v24 }
 0x105   :  { %626 = vmatpush1.msra.mxu0 %v265_v25 }
 0x106   :  { %627 = vmatprep.subr.mxu0 %v260_v26 }
 0x107   :  { %628 = vmatpush1.msra.mxu0 %v259_v27 }
 0x108   :  { %629 = vmatprep.subr.mxu0 %v254_v28 }
 0x109   :  { %630 = vmatpush1.msra.mxu0 %v253_v29 }
 0x10a   :  { %631 = vmatprep.subr.mxu0 %v248_v30 }
 0x10b   :  { %632 = vmatpush1.msra.mxu0 %v247_v31 }
 0x10c   :  { %633 = vmatprep.subr.mxu0 %v242_v32 }
 0x10d   :  { %634 = vmatpush1.msra.mxu0 %v241_v33 }
 0x10e   :  { %635 = vmatprep.subr.mxu0 %v428_v34  ;;  %v3475_v34 = vsub.s32 1, %v3456_v6 }
 0x10f   :  { %636 = vmatpush2.msra.mxu0 %v427_v35  ;;  %v445_v35 = vsub.s32 3, %v3456_v6 }
 0x110   :  { %637 = vmatprep.subr.mxu0 %v422_v36  ;;  %v438_v36 = vrot.slane %v429_v9, %v3475_v34 }
 0x111   :  { %638 = vmatpush2.msra.mxu0 %v421_v37  ;;  %v446_v37 = vrot.slane %v429_v9, %v445_v35 }
 0x112   :  { %639 = vmatprep.subr.mxu0 %v416_v38  ;;  %v453_v38 = vsub.s32 5, %v3456_v6 }
 0x113   :  { %640 = vmatpush2.msra.mxu0 %v415_v39 }
 0x114   :  { %641 = vmatprep.subr.mxu0 %v410_v40 }
 0x115   :  { %642 = vmatpush2.msra.mxu0 %v409_v41 }
 0x116   :  { %643 = vmatprep.subr.mxu0 %v404_v42 }
 0x117   :  { %644 = vmatpush2.msra.mxu0 %v403_v43 }
 0x118   :  { %645 = vmatprep.subr.mxu0 %v398_v44  ;;  %v454_v44 = vrot.slane %v429_v9, %v453_v38  ;;  %v1007_v9 = vld [vmem:[#allocation10 + $0xb0] sm:$0xff] }
 0x119   :  { %646 = vmatpush2.msra.mxu0 %v397_v45 }
 0x11a   :  { %647 = vmatprep.subr.mxu0 %v392_v46 }
 0x11b   :  { %648 = vmatpush2.msra.mxu0 %v391_v47 }
 0x11c   :  { %649 = vmatprep.subr.mxu0 %v386_v48 }
 0x11d   :  { %650 = vmatpush2.msra.mxu0 %v385_v49 }
 0x11e   :  { %651 = vmatprep.subr.mxu0 %v380_v50 }
 0x11f   :  { %652 = vmatpush2.msra.mxu0 %v379_v51 }
 0x120   :  { %653 = vmatprep.subr.mxu0 %v374_v52 }
 0x121   :  { %654 = vmatpush2.msra.mxu0 %v373_v53 }
 0x122   :  { %655 = vmatprep.subr.mxu0 %v368_v54 }
 0x123   :  { %656 = vmatpush2.msra.mxu0 %v367_v55 }
 0x124   :  { %657 = vmatprep.subr.mxu0 %v362_v56 }
 0x125   :  { %658 = vmatpush2.msra.mxu0 %v361_v57 }
 0x126   :  { %659 = vmatprep.subr.mxu0 %v356_v58  ;;  %v1016_v58 = vld [vmem:[#allocation10 + $0xf8] sm:$0xff] }
 0x127   :  { %660 = vmatpush2.msra.mxu0 %v355_v59  ;;  %v1015_v59 = vld [vmem:[#allocation10 + $0xf0] sm:$0xff]  ;;  %1061 = vmatprep.subr.mxu1 %v1016_v58  ;;  %v1028_v58 = vld [vmem:[#allocation10 + $0x158] sm:$0xff] }
 0x128   :  { %661 = vmatprep.subr.mxu0 %v350_v60  ;;  %v1014_v60 = vld [vmem:[#allocation10 + $0xe8] sm:$0xff]  ;;  %1062 = vmatpush1.msra.mxu1 %v1015_v59  ;;  %v1027_v59 = vld [vmem:[#allocation10 + $0x150] sm:$0xff] }
 0x129   :  { %662 = vmatpush2.msra.mxu0 %v349_v61  ;;  %v1013_v61 = vld [vmem:[#allocation10 + $0xe0] sm:$0xff]  ;;  %1063 = vmatprep.subr.mxu1 %v1014_v60  ;;  %v1026_v60 = vld [vmem:[#allocation10 + $0x148] sm:$0xff] }
 0x12a   :  { %663 = vmatprep.subr.mxu0 %v344_v62  ;;  %v1012_v62 = vld [vmem:[#allocation10 + $0xd8] sm:$0xff]  ;;  %1064 = vmatpush1.msra.mxu1 %v1013_v61  ;;  %v1025_v61 = vld [vmem:[#allocation10 + $0x140] sm:$0xff] }
 0x12b   :  { %664 = vmatpush2.msra.mxu0 %v343_v0  ;;  %v1011_v0 = vld [vmem:[#allocation10 + $0xd0] sm:$0xff]  ;;  %1065 = vmatprep.subr.mxu1 %v1012_v62  ;;  %v1024_v62 = vld [vmem:[#allocation10 + $0x138] sm:$0xff] }
 0x12c   :  { %665 = vmatprep.subr.mxu0 %v338_v2  ;;  %v1010_v2 = vld [vmem:[#allocation10 + $0xc8] sm:$0xff]  ;;  %1066 = vmatpush1.msra.mxu1 %v1011_v0  ;;  %v1023_v0 = vld [vmem:[#allocation10 + $0x130] sm:$0xff] }
 0x12d   :  { %666 = vmatpush2.msra.mxu0 %v337_v3  ;;  %v1009_v3 = vld [vmem:[#allocation10 + $0xc0] sm:$0xff]  ;;  %1067 = vmatprep.subr.mxu1 %v1010_v2  ;;  %v1022_v2 = vld [vmem:[#allocation10 + $0x128] sm:$0xff] }
 0x12e   :  { %668 = vmatmul.mubr.f32.vlgmr.msra.gmra.mxu0 %v3445_v1  ;;  %2861 = vmatprep.subr.mxu0 %v3293_v4 }
 0x12f   :  { %2863 = vmatprep.mubr.msk.f32.mxu0 %vm3294_vm0, %v3293_v4  ;;  %1068 = vmatpush1.msra.mxu1 %v1009_v3  ;;  %v1021_v3 = vld [vmem:[#allocation10 + $0x120] sm:$0xff] }
 0x130   :  { %1069 = vmatprep.subr.mxu1 %v1008_v5  ;;  %v1020_v5 = vld [vmem:[#allocation10 + $0x118] sm:$0xff] }
 0x131   :  { %1070 = vmatpush1.msra.mxu1 %v1007_v9  ;;  %v1019_v9 = vld [vmem:[#allocation10 + $0x110] sm:$0xff] }
 0x1ad   :  { %v527_v12 = vpop.f32.mrf.mxu0  ;;  %v598_v13 = vpop.f32.mrf.mxu1 }
 0x1ae   :  { %v528_v14 = vadd.f32 %v527_v12, %v434_v10  ;;  %v599_v15 = vadd.f32 %v598_v13, %v442_v11  ;;  %v1006_v10 = vld [vmem:[#allocation10 + $0xa8] sm:$0xff]  ;;  %v1005_v11 = vld [vmem:[#allocation10 + $0xa0] sm:$0xff]  ;;  %v1004_v12 = vld [vmem:[#allocation10 + $0x98] sm:$0xff] }
 0x1af   :  { %v529_v19 = vpop.f32.mrf.mxu0  ;;  %v600_v39 = vpop.f32.mrf.mxu1  ;;  %1071 = vmatprep.subr.mxu1 %v1006_v10  ;;  %v1003_v13 = vld [vmem:[#allocation10 + $0x90] sm:$0xff] }
 0x1b0   :  { %v674_v16 = vmul.f32 0.088388346, %v528_v14  ;;  %2862 = vmatpush3.xpose.msra.mxu0 %v599_v15  ;;  %v530_v41 = vadd.f32 %v529_v19, %v438_v36  ;;  %v601_v43 = vadd.f32 %v600_v39, %v446_v37  ;;  %1072 = vmatpush1.msra.mxu1 %v1005_v11  ;;  %v1002_v14 = vld [vmem:[#allocation10 + $0x88] sm:$0xff]  ;;  %v1001_v15 = vld [vmem:[#allocation10 + $0x80] sm:$0xff]  ;;  %v1047_v36 = vld [vmem:[#allocation10 + $0x1f0] sm:$0xff] }
 0x1b1   :  { %2866 = vmatprep.subr.mxu0 %v3293_v4  ;;  %1073 = vmatprep.subr.mxu1 %v1004_v12  ;;  %v998_v19 = vld [vmem:[#allocation10 + $0x68] sm:$0xff]  ;;  %v1045_v39 = vld [vmem:[#allocation10 + $0x1e0] sm:$0xff] }
 0x1b2   :  { %v830_v45 = vmul.f32 0.088388346, %v530_v41  ;;  %1074 = vmatpush1.msra.mxu1 %v1003_v13  ;;  %v1046_v37 = vld [vmem:[#allocation10 + $0x1e8] sm:$0xff]  ;;  %v1043_v41 = vld [vmem:[#allocation10 + $0x1d0] sm:$0xff] }
 0x1b3   :  { %2864 = vmatmul.mubr.f32.vlgmr.msra.gmra.mxu0 %v674_v16  ;;  %v1000_v16 = vld [vmem:[#allocation10 + $0x78] sm:$0xff]  ;;  %1075 = vmatprep.subr.mxu1 %v1002_v14  ;;  %v1018_v13 = vld [vmem:[#allocation10 + $0x108] sm:$0xff]  ;;  %v1017_v14 = vld [vmem:[#allocation10 + $0x100] sm:$0xff] }
 0x1b4   :  { %2868 = vmatprep.mubr.msk.f32.mxu0 %vm3294_vm0, %v3293_v4  ;;  %1076 = vmatpush1.msra.mxu1 %v1001_v15 }
 0x1b5   :  { %1077 = vmatprep.subr.mxu1 %v1000_v16 }
 0x1ee   :  { %v669_v20 = vpop.f32.mrf.mxu0 }
 0x1ef   :  { %v670_v21 = vadd.f32 %v669_v20, %v450_v18  ;;  %v999_v18 = vld [vmem:[#allocation10 + $0x70] sm:$0xff]  ;;  %v997_v20 = vld [vmem:[#allocation10 + $0x60] sm:$0xff] }
 0x1f0   :  { %v671_v22 = vpop.f32.mrf.mxu0  ;;  %1078 = vmatpush1.msra.mxu1 %v999_v18  ;;  %v1049_v18 = vld [vmem:[#allocation11] sm:$0x3] }
 0x1f1   :  { %2867 = vmatpush3.msra.mxu0 %v670_v21  ;;  %v672_v46 = vadd.f32 %v671_v22, %v454_v44  ;;  %v996_v21 = vld [vmem:[#allocation10 + $0x58] sm:$0xff]  ;;  %1079 = vmatprep.subr.mxu1 %v998_v19  ;;  %v995_v22 = vld [vmem:[#allocation10 + $0x50] sm:$0xff]  ;;  %v1054_v19 = vrot.slane %v1049_v18, %v3459_v7 }
 0x1f2   :  { %2871 = vmatprep.subr.mxu0 %v3293_v4  ;;  %1080 = vmatpush1.msra.mxu1 %v997_v20  ;;  %v1040_v44 = vld [vmem:[#allocation10 + $0x1b8] sm:$0xff]  ;;  %v1058_v20 = vrot.slane %v1049_v18, %v3475_v34  ;;  %v1235_v18 = vld [vmem:[#allocation16 + $0x1c0] sm:$0xff] }
 0x1f3   :  { %1081 = vmatprep.subr.mxu1 %v996_v21 }
 0x1f4   :  { %1082 = vmatpush1.msra.mxu1 %v995_v22 }
 0x273   :  { %v741_v24 = vpop.f32.mrf.mxu0 }
 0x274   :  { %v742_v25 = vadd.f32 %v741_v24, %v236_v23  ;;  %v993_v24 = vld [vmem:[#allocation10 + $0x40] sm:$0xff] }
 0x275   :  { %v2865_v26 = vpop.f32.mrf.mxu0 }
 0x276   :  { %v746_v27 = vsel %vm745_vm1, %v742_v25, -inf  ;;  %v991_v26 = vld [vmem:[#allocation10 + $0x30] sm:$0xff] }
 0x277   :  { %747 = vmax.xlane.f32.xlu0 %v746_v27  ;;  %v990_v27 = vld [vmem:[#allocation10 + $0x28] sm:$0xff] }
 0x300   :  { %v748_v28 = vpop.xlane.xlu0 %747 }
 0x301   :  { %v749_v29 = vsub.f32 %v742_v25, %v748_v28  ;;  %v992_v25 = vld [vmem:[#allocation10 + $0x38] sm:$0xff]  ;;  %v989_v28 = vld [vmem:[#allocation10 + $0x20] sm:$0xff] }
 0x303   :  { %v750_v30 = vmul.f32 1.442695, %v749_v29  ;;  %v988_v29 = vld [vmem:[#allocation10 + $0x18] sm:$0xff] }
 0x305   :  { %2926 = vpow2.f32 %v750_v30  ;;  %v987_v30 = vld [vmem:[#allocation10 + $0x10] sm:$0xff] }
 0x312   :  { %v2927_v31 = vpop.eup %2926 }
 0x313   :  { %v752_v32 = vsel %vm745_vm1, %v2927_v31, 0.0 }
 0x314   :  { %753 = vadd.xlane.f32.xlu0 %v752_v32  ;;  %v985_v32 = vld [vmem:[#allocation10] sm:$0xff] }
 0x39d   :  { %v754_v33 = vpop.xlane.xlu0 %753 }
 0x39e   :  { %2928 = vrcp.f32 %v754_v33  ;;  %v1048_v33 = vld [vmem:[#allocation10 + $0x1f8] sm:$0xff] }
 0x3ab   :  { %v2929_v40 = vpop.eup %2928 }
 0x3ac   :  { %v756_v42 = vmul.f32 %v2929_v40, %v2927_v31  ;;  %v986_v31 = vld [vmem:[#allocation10 + $0x8] sm:$0xff]  ;;  %v1044_v40 = vld [vmem:[#allocation10 + $0x1d8] sm:$0xff] }
 0x3ae   :  { %2869 = vmatmul.mubr.msk.f32.vlgmr.msra.gmra.mxu0 %vm745_vm1, %v756_v42  ;;  %v1042_v42 = vld [vmem:[#allocation10 + $0x1c8] sm:$0xff] }
 0x3af   :  { %2872 = vmatpush3.xpose.msra.mxu0 %v601_v43  ;;  %2873 = vmatprep.mubr.msk.f32.mxu0 %vm3294_vm0, %v3293_v4  ;;  %v1041_v43 = vld [vmem:[#allocation10 + $0x1c0] sm:$0xff] }
 0x3b0   :  { %2876 = vmatprep.subr.mxu0 %v3293_v4 }
 0x3b2   :  { %2874 = vmatmul.mubr.f32.vlgmr.msra.gmra.mxu0 %v830_v45  ;;  %v1039_v45 = vld [vmem:[#allocation10 + $0x1b0] sm:$0xff] }
 0x3b3   :  { %2877 = vmatpush3.msra.mxu0 %v672_v46  ;;  %2878 = vmatprep.mubr.msk.f32.mxu0 %vm3294_vm0, %v3293_v4  ;;  %v1038_v46 = vld [vmem:[#allocation10 + $0x1a8] sm:$0xff] }
 0x46e   :  { %v3490_v47 = vpop.f32.mrf.mxu0 }
 0x470   :  { %v2870_v48 = vpop.f32.mrf.mxu0 }
 0x471   :  { %v1037_v48 = vld [vmem:[#allocation10 + $0x1a0] sm:$0xff] }
 0x472   :  { %v897_v49 = vpop.f32.mrf.mxu0 }
 0x473   :  { %v898_v50 = vadd.f32 %v897_v49, %v236_v23  ;;  %v994_v23 = vld [vmem:[#allocation10 + $0x48] sm:$0xff]  ;;  %v1036_v49 = vld [vmem:[#allocation10 + $0x198] sm:$0xff] }
 0x474   :  { %v2875_v51 = vpop.f32.mrf.mxu0  ;;  %1083 = vmatprep.subr.mxu1 %v994_v23 }
 0x475   :  { %v901_v52 = vsel %vm745_vm1, %v898_v50, -inf  ;;  %1084 = vmatpush1.msra.mxu1 %v993_v24  ;;  %v1034_v51 = vld [vmem:[#allocation10 + $0x188] sm:$0xff] }
 0x476   :  { %902 = vmax.xlane.f32.xlu1 %v901_v52  ;;  %1085 = vmatprep.subr.mxu1 %v992_v25  ;;  %v1033_v52 = vld [vmem:[#allocation10 + $0x180] sm:$0xff] }
 0x477   :  { %1086 = vmatpush1.msra.mxu1 %v991_v26 }
 0x478   :  { %1087 = vmatprep.subr.mxu1 %v990_v27  ;;  %v1209_v27 = vld [vmem:[#allocation16 + $0xf0] sm:$0xff] }
 0x479   :  { %1088 = vmatpush1.msra.mxu1 %v989_v28  ;;  %v1208_v28 = vld [vmem:[#allocation16 + $0xe8] sm:$0xff] }
 0x47a   :  { %1089 = vmatprep.subr.mxu1 %v988_v29  ;;  %v1207_v29 = vld [vmem:[#allocation16 + $0xe0] sm:$0xff] }
 0x47b   :  { %1090 = vmatpush1.msra.mxu1 %v987_v30  ;;  %v1206_v30 = vld [vmem:[#allocation16 + $0xd8] sm:$0xff] }
 0x47c   :  { %1091 = vmatprep.subr.mxu1 %v986_v31  ;;  %v1205_v31 = vld [vmem:[#allocation16 + $0xd0] sm:$0xff] }
 0x47d   :  { %1092 = vmatpush1.msra.mxu1 %v985_v32  ;;  %v1204_v32 = vld [vmem:[#allocation16 + $0xc8] sm:$0xff] }
 0x47e   :  { %1093 = vmatprep.subr.mxu1 %v1048_v33  ;;  %v1201_v33 = vld [vmem:[#allocation16 + $0xb0] sm:$0xff] }
 0x47f   :  { %1094 = vmatpush2.msra.mxu1 %v1047_v36  ;;  %v1200_v36 = vld [vmem:[#allocation16 + $0xa8] sm:$0xff] }
 0x480   :  { %1095 = vmatprep.subr.mxu1 %v1046_v37  ;;  %v1199_v37 = vld [vmem:[#allocation16 + $0xa0] sm:$0xff] }
 0x481   :  { %1096 = vmatpush2.msra.mxu1 %v1045_v39  ;;  %v1198_v39 = vld [vmem:[#allocation16 + $0x98] sm:$0xff] }
 0x482   :  { %1097 = vmatprep.subr.mxu1 %v1044_v40  ;;  %v1197_v40 = vld [vmem:[#allocation16 + $0x90] sm:$0xff] }
 0x483   :  { %1098 = vmatpush2.msra.mxu1 %v1043_v41  ;;  %v1196_v41 = vld [vmem:[#allocation16 + $0x88] sm:$0xff] }
 0x484   :  { %1099 = vmatprep.subr.mxu1 %v1042_v42  ;;  %v1195_v42 = vld [vmem:[#allocation16 + $0x80] sm:$0xff] }
 0x485   :  { %1100 = vmatpush2.msra.mxu1 %v1041_v43  ;;  %v1194_v43 = vld [vmem:[#allocation16 + $0x78] sm:$0xff] }
 0x486   :  { %1101 = vmatprep.subr.mxu1 %v1040_v44  ;;  %v1193_v44 = vld [vmem:[#allocation16 + $0x70] sm:$0xff] }
 0x487   :  { %1102 = vmatpush2.msra.mxu1 %v1039_v45  ;;  %v1192_v45 = vld [vmem:[#allocation16 + $0x68] sm:$0xff] }
 0x488   :  { %1103 = vmatprep.subr.mxu1 %v1038_v46  ;;  %v1191_v46 = vld [vmem:[#allocation16 + $0x60] sm:$0xff] }
 0x489   :  { %1104 = vmatpush2.msra.mxu1 %v1037_v48  ;;  %v1190_v48 = vld [vmem:[#allocation16 + $0x58] sm:$0xff] }
 0x48a   :  { %1105 = vmatprep.subr.mxu1 %v1036_v49  ;;  %v1189_v49 = vld [vmem:[#allocation16 + $0x50] sm:$0xff] }
 0x4ff   :  { %v903_v53 = vpop.xlane.xlu1 %902 }
 0x500   :  { %v904_v54 = vsub.f32 %v898_v50, %v903_v53  ;;  %v1035_v50 = vld [vmem:[#allocation10 + $0x190] sm:$0xff]  ;;  %v1032_v53 = vld [vmem:[#allocation10 + $0x178] sm:$0xff] }
 0x501   :  { %1106 = vmatpush2.msra.mxu1 %v1035_v50  ;;  %v1188_v50 = vld [vmem:[#allocation16 + $0x48] sm:$0xff] }
 0x502   :  { %v905_v55 = vmul.f32 1.442695, %v904_v54  ;;  %1107 = vmatprep.subr.mxu1 %v1034_v51  ;;  %v1031_v54 = vld [vmem:[#allocation10 + $0x170] sm:$0xff] }
 0x503   :  { %1108 = vmatpush2.msra.mxu1 %v1033_v52  ;;  %v1187_v51 = vld [vmem:[#allocation16 + $0x40] sm:$0xff]  ;;  %v1186_v52 = vld [vmem:[#allocation16 + $0x38] sm:$0xff] }
 0x504   :  { %2930 = vpow2.f32 %v905_v55  ;;  %v1030_v55 = vld [vmem:[#allocation10 + $0x168] sm:$0xff]  ;;  %1109 = vmatprep.subr.mxu1 %v1032_v53  ;;  %v1185_v53 = vld [vmem:[#allocation16 + $0x30] sm:$0xff] }
 0x505   :  { %1110 = vmatpush2.msra.mxu1 %v1031_v54  ;;  %v1184_v54 = vld [vmem:[#allocation16 + $0x28] sm:$0xff] }
 0x506   :  { %1111 = vmatprep.subr.mxu1 %v1030_v55  ;;  %v1183_v55 = vld [vmem:[#allocation16 + $0x20] sm:$0xff] }
 0x511   :  { %v3493_v56 = vpop.eup %2930 }
 0x512   :  { %v907_v57 = vsel %vm745_vm1, %v3493_v56, 0.0 }
 0x513   :  { %908 = vadd.xlane.f32.xlu1 %v907_v57  ;;  %v1029_v57 = vld [vmem:[#allocation10 + $0x160] sm:$0xff] }
 0x514   :  { %1112 = vmatpush2.msra.mxu1 %v1029_v57  ;;  %v1182_v57 = vld [vmem:[#allocation16 + $0x18] sm:$0xff] }
 0x515   :  { %1113 = vmatprep.subr.mxu1 %v1028_v58  ;;  %v1181_v58 = vld [vmem:[#allocation16 + $0x10] sm:$0xff] }
 0x516   :  { %1114 = vmatpush2.msra.mxu1 %v1027_v59  ;;  %v1180_v59 = vld [vmem:[#allocation16 + $0x8] sm:$0xff] }
 0x517   :  { %1115 = vmatprep.subr.mxu1 %v1026_v60  ;;  %v1179_v60 = vld [vmem:[#allocation16] sm:$0xff] }
 0x518   :  { %1116 = vmatpush2.msra.mxu1 %v1025_v61  ;;  %v1242_v61 = vld [vmem:[#allocation16 + $0x1f8] sm:$0xff] }
 0x519   :  { %1117 = vmatprep.subr.mxu1 %v1024_v62  ;;  %v1241_v62 = vld [vmem:[#allocation16 + $0x1f0] sm:$0xff] }
 0x51a   :  { %1118 = vmatpush2.msra.mxu1 %v1023_v0  ;;  %v1240_v0 = vld [vmem:[#allocation16 + $0x1e8] sm:$0xff] }
 0x51b   :  { %1119 = vmatprep.subr.mxu1 %v1022_v2  ;;  %v1239_v2 = vld [vmem:[#allocation16 + $0x1e0] sm:$0xff] }
 0x51c   :  { %1120 = vmatpush2.msra.mxu1 %v1021_v3  ;;  %v1238_v3 = vld [vmem:[#allocation16 + $0x1d8] sm:$0xff] }
 0x51d   :  { %1121 = vmatprep.subr.mxu1 %v1020_v5  ;;  %v1237_v5 = vld [vmem:[#allocation16 + $0x1d0] sm:$0xff] }
 0x51e   :  { %1122 = vmatpush2.msra.mxu1 %v1019_v9  ;;  %v1236_v9 = vld [vmem:[#allocation16 + $0x1c8] sm:$0xff] }
 0x51f   :  { %1123 = vmatprep.subr.mxu1 %v1018_v13 }
 0x520   :  { %1124 = vmatpush2.msra.mxu1 %v1017_v14 }
 0x59c   :  { %v909_v10 = vpop.xlane.xlu1 %908 }
 0x59d   :  { %2932 = vrcp.f32 %v909_v10 }
 0x5aa   :  { %v2933_v11 = vpop.eup %2932 }
 0x5ab   :  { %v911_v12 = vmul.f32 %v2933_v11, %v3493_v56 }
 0x5ad   :  { %2879 = vmatmul.mubr.msk.f32.vlgmr.msra.gmra.mxu0 %vm745_vm1, %v911_v12 }
 0x66d   :  { %v981_v15 = vpop.f32.mrf.mxu0 }
 0x66e   :  { %1125 = vmatprep.mubr.f32.mxu1 %v981_v15 }
 0x66f   :  { %v2880_v16 = vpop.f32.mrf.mxu0  ;;  %1126 = vmatmul.mubr.f32.vlgmr.msra.gmra.mxu1 %v3490_v47  ;;  %v1210_v47 = vld [vmem:[#allocation16 + $0xf8] sm:$0xff] }
 0x670   :  { %1255 = vmatprep.subr.mxu0 %v1210_v47  ;;  %v1225_v47 = vld [vmem:[#allocation16 + $0x170] sm:$0xff] }
 0x671   :  { %1256 = vmatpush1.msra.mxu0 %v1209_v27  ;;  %v1224_v27 = vld [vmem:[#allocation16 + $0x168] sm:$0xff] }
 0x672   :  { %1257 = vmatprep.subr.mxu0 %v1208_v28  ;;  %v1223_v28 = vld [vmem:[#allocation16 + $0x160] sm:$0xff] }
 0x673   :  { %1258 = vmatpush1.msra.mxu0 %v1207_v29  ;;  %v1222_v29 = vld [vmem:[#allocation16 + $0x158] sm:$0xff] }
 0x674   :  { %1259 = vmatprep.subr.mxu0 %v1206_v30  ;;  %v1221_v30 = vld [vmem:[#allocation16 + $0x150] sm:$0xff] }
 0x675   :  { %1260 = vmatpush1.msra.mxu0 %v1205_v31  ;;  %v1220_v31 = vld [vmem:[#allocation16 + $0x148] sm:$0xff] }
 0x676   :  { %1261 = vmatprep.subr.mxu0 %v1204_v32  ;;  %v1219_v32 = vld [vmem:[#allocation16 + $0x140] sm:$0xff] }
 0x72f   :  { %v1127_v21 = vpop.f32.mrf.mxu1 }
 0x730   :  { %v1128_v22 = vadd.f32 %v1127_v21, %v1054_v19  ;;  %v1234_v19 = vld [vmem:[#allocation16 + $0x1b8] sm:$0xff]  ;;  %v1232_v21 = vld [vmem:[#allocation16 + $0x1a8] sm:$0xff] }
 0x731   :  { %v1129_v23 = vpop.f32.mrf.mxu1 }
 0x732   :  { %v1130_v56 = vadd.f32 %v1129_v23, %v1058_v20  ;;  %v3503_v24 = vadd.f32 %v1128_v22, %v3445_v1  ;;  %v1203_v1 = vld [vmem:[#allocation16 + $0xc0] sm:$0xff]  ;;  %v1233_v20 = vld [vmem:[#allocation16 + $0x1b0] sm:$0xff]  ;;  %v1230_v23 = vld [vmem:[#allocation16 + $0x198] sm:$0xff] }
 0x733   :  { %1262 = vmatpush1.msra.mxu0 %v1203_v1  ;;  %v1231_v22 = vld [vmem:[#allocation16 + $0x1a0] sm:$0xff]  ;;  %v1218_v1 = vld [vmem:[#allocation16 + $0x138] sm:$0xff] }
 0x734   :  { %v3506_v25 = vadd.f32 %v1130_v56, %v3443_v63  ;;  %v1202_v63 = vld [vmem:[#allocation16 + $0xb8] sm:$0xff]  ;;  %v1229_v56 = vld [vmem:[#allocation16 + $0x190] sm:$0xff] }
 0x735   :  { %1263 = vmatprep.subr.mxu0 %v1202_v63  ;;  %v1217_v63 = vld [vmem:[#allocation16 + $0x130] sm:$0xff] }
 0x736   :  { %v1136_v26 = vadd.f32 %v3506_v25, %v3503_v24  ;;  %1264 = vmatpush1.msra.mxu0 %v1201_v33  ;;  %v1216_v33 = vld [vmem:[#allocation16 + $0x128] sm:$0xff] }
 0x737   :  { %1265 = vmatprep.subr.mxu0 %v1200_v36  ;;  %v1215_v36 = vld [vmem:[#allocation16 + $0x120] sm:$0xff] }
 0x738   :  { %1137 = vadd.xlane.f32.xlu0 %v1136_v26  ;;  %1266 = vmatpush1.msra.mxu0 %v1199_v37  ;;  %v1226_v26 = vld [vmem:[#allocation16 + $0x178] sm:$0xff] }
 0x739   :  { %1267 = vmatprep.subr.mxu0 %v1198_v39  ;;  %v1214_v37 = vld [vmem:[#allocation16 + $0x118] sm:$0xff]  ;;  %v1213_v39 = vld [vmem:[#allocation16 + $0x110] sm:$0xff] }
 0x73a   :  { %1268 = vmatpush1.msra.mxu0 %v1197_v40  ;;  %v1212_v40 = vld [vmem:[#allocation16 + $0x108] sm:$0xff] }
 0x73b   :  { %1269 = vmatprep.subr.mxu0 %v1196_v41  ;;  %v1211_v41 = vld [vmem:[#allocation16 + $0x100] sm:$0xff] }
 0x73c   :  { %1270 = vmatpush1.msra.mxu0 %v1195_v42  ;;  %v1359_v42 = vld [vmem:[#allocation19 + $0xf8] sm:$0xff] }
 0x73d   :  { %1271 = vmatprep.subr.mxu0 %v1194_v43  ;;  %v1358_v43 = vld [vmem:[#allocation19 + $0xf0] sm:$0xff]  ;;  %1404 = vmatprep.subr.mxu1 %v1359_v42  ;;  %v1369_v42 = vld [vmem:[#allocation19 + $0x148] sm:$0xff] }
 0x73e   :  { %1272 = vmatpush1.msra.mxu0 %v1193_v44  ;;  %v1357_v44 = vld [vmem:[#allocation19 + $0xe8] sm:$0xff]  ;;  %1405 = vmatpush1.msra.mxu1 %v1358_v43  ;;  %v1368_v43 = vld [vmem:[#allocation19 + $0x140] sm:$0xff] }
 0x73f   :  { %1273 = vmatprep.subr.mxu0 %v1192_v45  ;;  %v1356_v45 = vld [vmem:[#allocation19 + $0xe0] sm:$0xff]  ;;  %1406 = vmatprep.subr.mxu1 %v1357_v44 }
 0x740   :  { %1274 = vmatpush1.msra.mxu0 %v1191_v46  ;;  %v1355_v46 = vld [vmem:[#allocation19 + $0xd8] sm:$0xff]  ;;  %1407 = vmatpush1.msra.mxu1 %v1356_v45 }
 0x741   :  { %1275 = vmatprep.subr.mxu0 %v1190_v48  ;;  %v1354_v48 = vld [vmem:[#allocation19 + $0xd0] sm:$0xff]  ;;  %1408 = vmatprep.subr.mxu1 %v1355_v46 }
 0x742   :  { %1276 = vmatpush1.msra.mxu0 %v1189_v49  ;;  %v1353_v49 = vld [vmem:[#allocation19 + $0xc8] sm:$0xff]  ;;  %1409 = vmatpush1.msra.mxu1 %v1354_v48  ;;  %v1134_v48 = vld [vmem:[#allocation13] sm:$0x3] }
 0x743   :  { %1277 = vmatprep.subr.mxu0 %v1188_v50  ;;  %v1352_v50 = vld [vmem:[#allocation19 + $0xc0] sm:$0xff]  ;;  %1410 = vmatprep.subr.mxu1 %v1353_v49  ;;  %v1135_v49 = vld [vmem:[#allocation14] sm:$0x3] }
 0x744   :  { %1278 = vmatpush1.msra.mxu0 %v1187_v51  ;;  %v1351_v51 = vld [vmem:[#allocation19 + $0xb8] sm:$0xff]  ;;  %1411 = vmatpush1.msra.mxu1 %v1352_v50  ;;  %v1157_v50 = vrot.slane %v1134_v48, %v3459_v7 }
 0x745   :  { %1279 = vmatprep.subr.mxu0 %v1186_v52  ;;  %v1350_v52 = vld [vmem:[#allocation19 + $0xb0] sm:$0xff]  ;;  %1412 = vmatprep.subr.mxu1 %v1351_v51  ;;  %v1161_v51 = vrot.slane %v1134_v48, %v3475_v34  ;;  %v1589_v48 = vld [vmem:[#allocation7 + $0x818] sm:$0xff] }
 0x746   :  { %1280 = vmatpush1.msra.mxu0 %v1185_v53  ;;  %v1349_v53 = vld [vmem:[#allocation19 + $0xa8] sm:$0xff]  ;;  %1413 = vmatpush1.msra.mxu1 %v1350_v52 }
 0x747   :  { %1281 = vmatprep.subr.mxu0 %v1184_v54  ;;  %v1348_v54 = vld [vmem:[#allocation19 + $0xa0] sm:$0xff]  ;;  %1414 = vmatprep.subr.mxu1 %v1349_v53 }
 0x748   :  { %1282 = vmatpush1.msra.mxu0 %v1183_v55  ;;  %v1347_v55 = vld [vmem:[#allocation19 + $0x98] sm:$0xff]  ;;  %1415 = vmatpush1.msra.mxu1 %v1348_v54  ;;  %v1170_v54 = vrot.slane %v1135_v49, %v3459_v7 }
 0x749   :  { %1283 = vmatprep.subr.mxu0 %v1182_v57  ;;  %v1346_v57 = vld [vmem:[#allocation19 + $0x90] sm:$0xff]  ;;  %1416 = vmatprep.subr.mxu1 %v1347_v55  ;;  %v1174_v55 = vrot.slane %v1135_v49, %v3475_v34 }
 0x74a   :  { %1284 = vmatpush1.msra.mxu0 %v1181_v58  ;;  %v1345_v58 = vld [vmem:[#allocation19 + $0x88] sm:$0xff]  ;;  %1417 = vmatpush1.msra.mxu1 %v1346_v57 }
 0x74b   :  { %1285 = vmatprep.subr.mxu0 %v1180_v59  ;;  %v1344_v59 = vld [vmem:[#allocation19 + $0x80] sm:$0xff]  ;;  %1418 = vmatprep.subr.mxu1 %v1345_v58  ;;  %v1591_v49 = vld [vmem:[#allocation7 + $0x828] sm:$0xff] }
 0x74c   :  { %1286 = vmatpush1.msra.mxu0 %v1179_v60  ;;  %v1343_v60 = vld [vmem:[#allocation19 + $0x78] sm:$0xff]  ;;  %1419 = vmatpush1.msra.mxu1 %v1344_v59 }
 0x74d   :  { %1287 = vmatprep.subr.mxu0 %v1242_v61  ;;  %v1342_v61 = vld [vmem:[#allocation19 + $0x70] sm:$0xff]  ;;  %1420 = vmatprep.subr.mxu1 %v1343_v60 }
 0x74e   :  { %1288 = vmatpush2.msra.mxu0 %v1241_v62  ;;  %v1341_v62 = vld [vmem:[#allocation19 + $0x68] sm:$0xff]  ;;  %1421 = vmatpush1.msra.mxu1 %v1342_v61 }
 0x74f   :  { %1289 = vmatprep.subr.mxu0 %v1240_v0  ;;  %v1340_v0 = vld [vmem:[#allocation19 + $0x60] sm:$0xff]  ;;  %1422 = vmatprep.subr.mxu1 %v1341_v62  ;;  %v1367_v62 = vld [vmem:[#allocation19 + $0x138] sm:$0xff] }
 0x750   :  { %1290 = vmatpush2.msra.mxu0 %v1239_v2  ;;  %v1339_v2 = vld [vmem:[#allocation19 + $0x58] sm:$0xff]  ;;  %1423 = vmatpush1.msra.mxu1 %v1340_v0  ;;  %v1366_v0 = vld [vmem:[#allocation19 + $0x130] sm:$0xff] }
 0x751   :  { %1291 = vmatprep.subr.mxu0 %v1238_v3  ;;  %v1338_v3 = vld [vmem:[#allocation19 + $0x50] sm:$0xff]  ;;  %1424 = vmatprep.subr.mxu1 %v1339_v2  ;;  %v1365_v2 = vld [vmem:[#allocation19 + $0x128] sm:$0xff] }
 0x752   :  { %1292 = vmatpush2.msra.mxu0 %v1237_v5  ;;  %v1337_v5 = vld [vmem:[#allocation19 + $0x48] sm:$0xff]  ;;  %1425 = vmatpush1.msra.mxu1 %v1338_v3  ;;  %v1364_v3 = vld [vmem:[#allocation19 + $0x120] sm:$0xff] }
 0x753   :  { %1293 = vmatprep.subr.mxu0 %v1236_v9  ;;  %v1336_v9 = vld [vmem:[#allocation19 + $0x40] sm:$0xff]  ;;  %1426 = vmatprep.subr.mxu1 %v1337_v5  ;;  %v1362_v5 = vld [vmem:[#allocation19 + $0x110] sm:$0xff] }
 0x754   :  { %1294 = vmatpush2.msra.mxu0 %v1235_v18  ;;  %1427 = vmatpush1.msra.mxu1 %v1336_v9  ;;  %v1330_v18 = vld [vmem:[#allocation19 + $0x10] sm:$0xff]  ;;  %v1361_v9 = vld [vmem:[#allocation19 + $0x108] sm:$0xff] }
 0x755   :  { %1295 = vmatprep.subr.mxu0 %v1234_v19  ;;  %v1329_v19 = vld [vmem:[#allocation19 + $0x8] sm:$0xff] }
 0x756   :  { %1296 = vmatpush2.msra.mxu0 %v1233_v20  ;;  %v1328_v20 = vld [vmem:[#allocation19] sm:$0xff] }
 0x757   :  { %1297 = vmatprep.subr.mxu0 %v1232_v21  ;;  %v1391_v21 = vld [vmem:[#allocation19 + $0x1f8] sm:$0xff] }
 0x758   :  { %1298 = vmatpush2.msra.mxu0 %v1231_v22  ;;  %v1390_v22 = vld [vmem:[#allocation19 + $0x1f0] sm:$0xff] }
 0x759   :  { %1299 = vmatprep.subr.mxu0 %v1230_v23  ;;  %v1389_v23 = vld [vmem:[#allocation19 + $0x1e8] sm:$0xff] }
 0x75a   :  { %1300 = vmatpush2.msra.mxu0 %v1229_v56  ;;  %v1388_v56 = vld [vmem:[#allocation19 + $0x1e0] sm:$0xff] }
 0x7c1   :  { %v1138_v10 = vpop.xlane.xlu0 %1137 }
 0x7c2   :  { %v1140_v11 = vmul.f32 0.00390625, %v1138_v10  ;;  %v1335_v10 = vld [vmem:[#allocation19 + $0x38] sm:$0xff] }
 0x7c3   :  { %1428 = vmatprep.subr.mxu1 %v1335_v10  ;;  %v1360_v10 = vld [vmem:[#allocation19 + $0x100] sm:$0xff] }
 0x7c4   :  { %v3511_v12 = vsub.f32 %v3503_v24, %v1140_v11  ;;  %v3514_v13 = vsub.f32 %v3506_v25, %v1140_v11  ;;  %v1228_v24 = vld [vmem:[#allocation16 + $0x188] sm:$0xff]  ;;  %v1227_v25 = vld [vmem:[#allocation16 + $0x180] sm:$0xff]  ;;  %v1334_v11 = vld [vmem:[#allocation19 + $0x30] sm:$0xff] }
 0x7c5   :  { %1301 = vmatprep.subr.mxu0 %v1228_v24  ;;  %1429 = vmatpush1.msra.mxu1 %v1334_v11  ;;  %v1387_v24 = vld [vmem:[#allocation19 + $0x1d8] sm:$0xff] }
 0x7c6   :  { %v1143_v14 = vmul.f32 %v3511_v12, %v3511_v12  ;;  %v1144_v15 = vmul.f32 %v3514_v13, %v3514_v13  ;;  %1302 = vmatpush2.msra.mxu0 %v1227_v25  ;;  %v1386_v25 = vld [vmem:[#allocation19 + $0x1d0] sm:$0xff] }
 0x7c7   :  { %1303 = vmatprep.subr.mxu0 %v1226_v26  ;;  %v1385_v26 = vld [vmem:[#allocation19 + $0x1c8] sm:$0xff] }
 0x7c8   :  { %v1145_v16 = vadd.f32 %v1144_v15, %v1143_v14  ;;  %1304 = vmatpush2.msra.mxu0 %v1225_v47  ;;  %v1333_v14 = vld [vmem:[#allocation19 + $0x28] sm:$0xff]  ;;  %v1332_v15 = vld [vmem:[#allocation19 + $0x20] sm:$0xff] }
 0x7c9   :  { %1305 = vmatprep.subr.mxu0 %v1224_v27  ;;  %1430 = vmatprep.subr.mxu1 %v1333_v14  ;;  %v1384_v47 = vld [vmem:[#allocation19 + $0x1c0] sm:$0xff]  ;;  %v1383_v27 = vld [vmem:[#allocation19 + $0x1b8] sm:$0xff] }
 0x7ca   :  { %1146 = vadd.xlane.f32.xlu1 %v1145_v16  ;;  %1306 = vmatpush2.msra.mxu0 %v1223_v28  ;;  %v1331_v16 = vld [vmem:[#allocation19 + $0x18] sm:$0xff]  ;;  %v1382_v28 = vld [vmem:[#allocation19 + $0x1b0] sm:$0xff] }
 0x7cb   :  { %1307 = vmatprep.subr.mxu0 %v1222_v29  ;;  %1431 = vmatpush1.msra.mxu1 %v1332_v15  ;;  %v1381_v29 = vld [vmem:[#allocation19 + $0x1a8] sm:$0xff] }
 0x7cc   :  { %1308 = vmatpush2.msra.mxu0 %v1221_v30  ;;  %1432 = vmatprep.subr.mxu1 %v1331_v16  ;;  %v1380_v30 = vld [vmem:[#allocation19 + $0x1a0] sm:$0xff] }
 0x7cd   :  { %1309 = vmatprep.subr.mxu0 %v1220_v31  ;;  %1433 = vmatpush1.msra.mxu1 %v1330_v18  ;;  %v1379_v31 = vld [vmem:[#allocation19 + $0x198] sm:$0xff] }
 0x7ce   :  { %1310 = vmatpush2.msra.mxu0 %v1219_v32  ;;  %1434 = vmatprep.subr.mxu1 %v1329_v19  ;;  %v1378_v32 = vld [vmem:[#allocation19 + $0x190] sm:$0xff] }
 0x7cf   :  { %1311 = vmatprep.subr.mxu0 %v1218_v1  ;;  %1435 = vmatpush1.msra.mxu1 %v1328_v20  ;;  %v1377_v1 = vld [vmem:[#allocation19 + $0x188] sm:$0xff] }
 0x7d0   :  { %1312 = vmatpush2.msra.mxu0 %v1217_v63  ;;  %1436 = vmatprep.subr.mxu1 %v1391_v21  ;;  %v1376_v63 = vld [vmem:[#allocation19 + $0x180] sm:$0xff] }
 0x7d1   :  { %1313 = vmatprep.subr.mxu0 %v1216_v33  ;;  %1437 = vmatpush2.msra.mxu1 %v1390_v22  ;;  %v1375_v33 = vld [vmem:[#allocation19 + $0x178] sm:$0xff]  ;;  %v1392_v22 = vld [vmem:[#allocation20] sm:$0x3] }
 0x7d2   :  { %1314 = vmatpush2.msra.mxu0 %v1215_v36  ;;  %1438 = vmatprep.subr.mxu1 %v1389_v23  ;;  %v1374_v36 = vld [vmem:[#allocation19 + $0x170] sm:$0xff]  ;;  %v1397_v23 = vrot.slane %v1392_v22, %v3459_v7 }
 0x7d3   :  { %1315 = vmatprep.subr.mxu0 %v1214_v37  ;;  %1439 = vmatpush2.msra.mxu1 %v1388_v56  ;;  %v1373_v37 = vld [vmem:[#allocation19 + $0x168] sm:$0xff]  ;;  %v1401_v56 = vrot.slane %v1392_v22, %v3475_v34 }
 0x7d4   :  { %1316 = vmatpush2.msra.mxu0 %v1213_v39  ;;  %1440 = vmatprep.subr.mxu1 %v1387_v24  ;;  %v1372_v39 = vld [vmem:[#allocation19 + $0x160] sm:$0xff] }
 0x7d5   :  { %1317 = vmatprep.subr.mxu0 %v1212_v40  ;;  %1441 = vmatpush2.msra.mxu1 %v1386_v25  ;;  %v1371_v40 = vld [vmem:[#allocation19 + $0x158] sm:$0xff]  ;;  %v1546_v22 = vld [vmem:[#allocation7 + $0x6c0] sm:$0xff] }
 0x7d6   :  { %1318 = vmatpush2.msra.mxu0 %v1211_v41  ;;  %1442 = vmatprep.subr.mxu1 %v1385_v26  ;;  %v1370_v41 = vld [vmem:[#allocation19 + $0x150] sm:$0xff] }
 0x7d7   :  { %1443 = vmatpush2.msra.mxu1 %v1384_v47 }
 0x7d8   :  { %1444 = vmatprep.subr.mxu1 %v1383_v27 }
 0x7d9   :  { %1445 = vmatpush2.msra.mxu1 %v1382_v28 }
 0x7da   :  { %1446 = vmatprep.subr.mxu1 %v1381_v29 }
 0x7db   :  { %1447 = vmatpush2.msra.mxu1 %v1380_v30  ;;  %v1613_v30 = vld [vmem:[#allocation7 + $0x8d8] sm:$0xff] }
 0x7dc   :  { %1448 = vmatprep.subr.mxu1 %v1379_v31  ;;  %v1612_v31 = vld [vmem:[#allocation7 + $0x8d0] sm:$0xff]  ;;  %1747 = vmatprep.subr.mxu0 %v1613_v30  ;;  %v1534_v30 = vld [vmem:[#allocation7 + $0x660] sm:$0xff] }
 0x7dd   :  { %1449 = vmatpush2.msra.mxu1 %v1378_v32  ;;  %v1615_v32 = vld [vmem:[#allocation7 + $0x8e8] sm:$0xff] }
 0x7de   :  { %1450 = vmatprep.subr.mxu1 %v1377_v1  ;;  %v1607_v1 = vld [vmem:[#allocation7 + $0x8a8] sm:$0xff] }
 0x7df   :  { %1451 = vmatpush2.msra.mxu1 %v1376_v63  ;;  %v1614_v63 = vld [vmem:[#allocation7 + $0x8e0] sm:$0xff] }
 0x7e0   :  { %1452 = vmatprep.subr.mxu1 %v1375_v33  ;;  %v1606_v33 = vld [vmem:[#allocation7 + $0x8a0] sm:$0xff] }
 0x7e1   :  { %1453 = vmatpush2.msra.mxu1 %v1374_v36  ;;  %v1609_v36 = vld [vmem:[#allocation7 + $0x8b8] sm:$0xff] }
 0x7e2   :  { %1454 = vmatprep.subr.mxu1 %v1373_v37  ;;  %v1601_v37 = vld [vmem:[#allocation7 + $0x878] sm:$0xff] }
 0x7e3   :  { %1455 = vmatpush2.msra.mxu1 %v1372_v39  ;;  %v1608_v39 = vld [vmem:[#allocation7 + $0x8b0] sm:$0xff] }
 0x7e4   :  { %1456 = vmatprep.subr.mxu1 %v1371_v40  ;;  %v1600_v40 = vld [vmem:[#allocation7 + $0x870] sm:$0xff] }
 0x7e5   :  { %1457 = vmatpush2.msra.mxu1 %v1370_v41  ;;  %v1603_v41 = vld [vmem:[#allocation7 + $0x888] sm:$0xff] }
 0x7e6   :  { %1458 = vmatprep.subr.mxu1 %v1369_v42  ;;  %v1595_v42 = vld [vmem:[#allocation7 + $0x848] sm:$0xff] }
 0x7e7   :  { %1459 = vmatpush2.msra.mxu1 %v1368_v43  ;;  %v1602_v43 = vld [vmem:[#allocation7 + $0x880] sm:$0xff] }
 0x7e8   :  { %1460 = vmatprep.subr.mxu1 %v1367_v62  ;;  %v1573_v62 = vld [vmem:[#allocation7 + $0x798] sm:$0xff] }
 0x7e9   :  { %1461 = vmatpush2.msra.mxu1 %v1366_v0  ;;  %v1570_v0 = vld [vmem:[#allocation7 + $0x780] sm:$0xff] }
 0x7ea   :  { %1462 = vmatprep.subr.mxu1 %v1365_v2  ;;  %v1572_v2 = vld [vmem:[#allocation7 + $0x790] sm:$0xff] }
 0x7eb   :  { %1463 = vmatpush2.msra.mxu1 %v1364_v3  ;;  %v1565_v3 = vld [vmem:[#allocation7 + $0x758] sm:$0xff] }
 0x853   :  { %v1147_v44 = vpop.xlane.xlu1 %1146 }
 0x854   :  { %v1148_v45 = vmul.f32 0.00390625, %v1147_v44  ;;  %v1597_v44 = vld [vmem:[#allocation7 + $0x858] sm:$0xff] }
 0x856   :  { %v1149_v46 = vadd.f32 1e-05, %v1148_v45  ;;  %v1594_v45 = vld [vmem:[#allocation7 + $0x840] sm:$0xff] }
 0x858   :  { %2934 = vrsqrt.f32 %v1149_v46  ;;  %v1596_v46 = vld [vmem:[#allocation7 + $0x850] sm:$0xff] }
 0x865   :  { %v2935_v52 = vpop.eup %2934 }
 0x866   :  { %v1152_v53 = vmul.f32 %v2935_v52, %v3514_v13  ;;  %v1151_v57 = vmul.f32 %v2935_v52, %v3511_v12  ;;  %v1363_v13 = vld [vmem:[#allocation19 + $0x118] sm:$0xff]  ;;  %v1583_v52 = vld [vmem:[#allocation7 + $0x7e8] sm:$0xff] }
 0x867   :  { %1464 = vmatprep.subr.mxu1 %v1363_v13  ;;  %v1243_v12 = vld [vmem:[#allocation17] sm:$0x3]  ;;  %v1567_v13 = vld [vmem:[#allocation7 + $0x768] sm:$0xff] }
 0x868   :  { %v1165_v58 = vmul.f32 %v1161_v51, %v1152_v53  ;;  %v1164_v59 = vmul.f32 %v1157_v50, %v1151_v57  ;;  %1465 = vmatpush2.msra.mxu1 %v1362_v5  ;;  %v1248_v11 = vrot.slane %v1243_v12, %v3459_v7  ;;  %v1252_v14 = vrot.slane %v1243_v12, %v3475_v34  ;;  %v1588_v50 = vld [vmem:[#allocation7 + $0x810] sm:$0xff]  ;;  %v1590_v51 = vld [vmem:[#allocation7 + $0x820] sm:$0xff]  ;;  %v1585_v53 = vld [vmem:[#allocation7 + $0x7f8] sm:$0xff] }
 0x869   :  { %1466 = vmatprep.subr.mxu1 %v1361_v9  ;;  %v1577_v57 = vld [vmem:[#allocation7 + $0x7b8] sm:$0xff]  ;;  %v1564_v5 = vld [vmem:[#allocation7 + $0x750] sm:$0xff]  ;;  %v1566_v9 = vld [vmem:[#allocation7 + $0x760] sm:$0xff] }
 0x86a   :  { %v1178_v60 = vadd.f32 %v1174_v55, %v1165_v58  ;;  %v1177_v61 = vadd.f32 %v1170_v54, %v1164_v59  ;;  %1467 = vmatpush2.msra.mxu1 %v1360_v10  ;;  %v1582_v54 = vld [vmem:[#allocation7 + $0x7e0] sm:$0xff]  ;;  %v1584_v55 = vld [vmem:[#allocation7 + $0x7f0] sm:$0xff]  ;;  %v1579_v58 = vld [vmem:[#allocation7 + $0x7c8] sm:$0xff] }
 0x86b   :  { %1818 = vmatprep.subr.mxu1 %v1615_v32  ;;  %v1576_v59 = vld [vmem:[#allocation7 + $0x7b0] sm:$0xff]  ;;  %v1559_v10 = vld [vmem:[#allocation7 + $0x728] sm:$0xff]  ;;  %v1561_v12 = vld [vmem:[#allocation7 + $0x738] sm:$0xff] }
 0x86c   :  { %1319 = vmatprep.mubr.f32.mxu0 %v1178_v60  ;;  %v1529_v32 = vld [vmem:[#allocation7 + $0x638] sm:$0xff] }
 0x86d   :  { %1320 = vmatmul.mubr.f32.vlgmr.msra.gmra.mxu0 %v1177_v61 }
 0x86e   :  { %1748 = vmatpush1.msra.mxu0 %v1612_v31  ;;  %v1536_v31 = vld [vmem:[#allocation7 + $0x670] sm:$0xff] }
 0x86f   :  { %1749 = vmatprep.subr.mxu0 %v1607_v1  ;;  %v1531_v1 = vld [vmem:[#allocation7 + $0x648] sm:$0xff] }
 0x870   :  { %1750 = vmatpush1.msra.mxu0 %v1606_v33  ;;  %v1530_v33 = vld [vmem:[#allocation7 + $0x640] sm:$0xff] }
 0x871   :  { %1751 = vmatprep.subr.mxu0 %v1601_v37  ;;  %v1525_v37 = vld [vmem:[#allocation7 + $0x618] sm:$0xff] }
 0x872   :  { %1752 = vmatpush1.msra.mxu0 %v1600_v40  ;;  %v1524_v40 = vld [vmem:[#allocation7 + $0x610] sm:$0xff] }
 0x873   :  { %1753 = vmatprep.subr.mxu0 %v1595_v42  ;;  %v1711_v42 = vld [vmem:[#allocation7 + $0xbe8] sm:$0xff] }
 0x874   :  { %1754 = vmatpush1.msra.mxu0 %v1594_v45  ;;  %v1703_v45 = vld [vmem:[#allocation7 + $0xba8] sm:$0xff] }
 0x875   :  { %1755 = vmatprep.subr.mxu0 %v1589_v48  ;;  %v1702_v48 = vld [vmem:[#allocation7 + $0xba0] sm:$0xff] }
 0x876   :  { %1756 = vmatpush1.msra.mxu0 %v1588_v50  ;;  %v1697_v50 = vld [vmem:[#allocation7 + $0xb78] sm:$0xff] }
 0x877   :  { %1757 = vmatprep.subr.mxu0 %v1583_v52  ;;  %v1696_v52 = vld [vmem:[#allocation7 + $0xb70] sm:$0xff] }
 0x878   :  { %1758 = vmatpush1.msra.mxu0 %v1582_v54  ;;  %v1691_v54 = vld [vmem:[#allocation7 + $0xb48] sm:$0xff] }
 0x879   :  { %1759 = vmatprep.subr.mxu0 %v1577_v57  ;;  %v1690_v57 = vld [vmem:[#allocation7 + $0xb40] sm:$0xff] }
 0x87a   :  { %1760 = vmatpush1.msra.mxu0 %v1576_v59 }
 0x92d   :  { %v1321_v15 = vpop.f32.mrf.mxu0 }
 0x92e   :  { %v1322_v16 = vadd.f32 %v1321_v15, %v1248_v11  ;;  %v1558_v11 = vld [vmem:[#allocation7 + $0x720] sm:$0xff]  ;;  %v1553_v15 = vld [vmem:[#allocation7 + $0x6f8] sm:$0xff] }
 0x92f   :  { %v1323_v18 = vpop.f32.mrf.mxu0 }
 0x930   :  { %v1324_v19 = vadd.f32 %v1323_v18, %v1252_v14  ;;  %v1326_v21 = vmax.f32 %v1322_v16, 0.0  ;;  %v1560_v14 = vld [vmem:[#allocation7 + $0x730] sm:$0xff]  ;;  %v1555_v16 = vld [vmem:[#allocation7 + $0x708] sm:$0xff] }
 0x931   :  { %v1552_v18 = vld [vmem:[#allocation7 + $0x6f0] sm:$0xff] }
 0x932   :  { %v1327_v20 = vmax.f32 %v1324_v19, 0.0  ;;  %v1554_v19 = vld [vmem:[#allocation7 + $0x700] sm:$0xff] }
 0x934   :  { %1468 = vmatprep.mubr.f32.mxu1 %v1327_v20  ;;  %v1547_v20 = vld [vmem:[#allocation7 + $0x6c8] sm:$0xff] }
 0x935   :  { %1469 = vmatmul.mubr.f32.vlgmr.msra.gmra.mxu1 %v1326_v21  ;;  %v1549_v21 = vld [vmem:[#allocation7 + $0x6d8] sm:$0xff] }
 0x936   :  { %1819 = vmatpush1.msra.mxu1 %v1614_v63  ;;  %v1528_v63 = vld [vmem:[#allocation7 + $0x630] sm:$0xff] }
 0x937   :  { %1820 = vmatprep.subr.mxu1 %v1609_v36  ;;  %v1523_v36 = vld [vmem:[#allocation7 + $0x608] sm:$0xff] }
 0x938   :  { %1821 = vmatpush1.msra.mxu1 %v1608_v39  ;;  %v1522_v39 = vld [vmem:[#allocation7 + $0x600] sm:$0xff] }
 0x939   :  { %1822 = vmatprep.subr.mxu1 %v1603_v41  ;;  %v1709_v41 = vld [vmem:[#allocation7 + $0xbd8] sm:$0xff] }
 0x93a   :  { %1823 = vmatpush1.msra.mxu1 %v1602_v43  ;;  %v1708_v43 = vld [vmem:[#allocation7 + $0xbd0] sm:$0xff] }
 0x93b   :  { %1824 = vmatprep.subr.mxu1 %v1597_v44  ;;  %v1710_v44 = vld [vmem:[#allocation7 + $0xbe0] sm:$0xff] }
 0x93c   :  { %1825 = vmatpush1.msra.mxu1 %v1596_v46  ;;  %v1705_v46 = vld [vmem:[#allocation7 + $0xbb8] sm:$0xff] }
 0x93d   :  { %1826 = vmatprep.subr.mxu1 %v1591_v49  ;;  %v1704_v49 = vld [vmem:[#allocation7 + $0xbb0] sm:$0xff] }
 0x93e   :  { %1827 = vmatpush1.msra.mxu1 %v1590_v51  ;;  %v1699_v51 = vld [vmem:[#allocation7 + $0xb88] sm:$0xff] }
 0x93f   :  { %1828 = vmatprep.subr.mxu1 %v1585_v53  ;;  %v1698_v53 = vld [vmem:[#allocation7 + $0xb80] sm:$0xff] }
 0x940   :  { %1829 = vmatpush1.msra.mxu1 %v1584_v55  ;;  %v1693_v55 = vld [vmem:[#allocation7 + $0xb58] sm:$0xff] }
 0x941   :  { %1830 = vmatprep.subr.mxu1 %v1579_v58 }
 0x9f5   :  { %v1470_v24 = vpop.f32.mrf.mxu1 }
 0x9f6   :  { %v1471_v25 = vadd.f32 %v1470_v24, %v1397_v23  ;;  %v1548_v23 = vld [vmem:[#allocation7 + $0x6d0] sm:$0xff]  ;;  %v1543_v24 = vld [vmem:[#allocation7 + $0x6a8] sm:$0xff] }
 0x9f7   :  { %v1472_v26 = vpop.f32.mrf.mxu1 }
 0x9f8   :  { %v1473_v47 = vadd.f32 %v1472_v26, %v1401_v56  ;;  %v3530_v27 = vadd.f32 %v1471_v25, %v1177_v61  ;;  %v1571_v61 = vld [vmem:[#allocation7 + $0x788] sm:$0xff]  ;;  %v1541_v56 = vld [vmem:[#allocation7 + $0x698] sm:$0xff]  ;;  %v1540_v25 = vld [vmem:[#allocation7 + $0x690] sm:$0xff] }
 0x9f9   :  { %1761 = vmatprep.subr.mxu0 %v1571_v61  ;;  %v1542_v26 = vld [vmem:[#allocation7 + $0x6a0] sm:$0xff] }
 0x9fa   :  { %v3532_v28 = vadd.f32 %v1473_v47, %v1178_v60  ;;  %v1578_v60 = vld [vmem:[#allocation7 + $0x7c0] sm:$0xff]  ;;  %1762 = vmatpush1.msra.mxu0 %v1570_v0  ;;  %v1535_v47 = vld [vmem:[#allocation7 + $0x668] sm:$0xff] }
 0x9fb   :  { %1831 = vmatpush1.msra.mxu1 %v1578_v60  ;;  %1763 = vmatprep.subr.mxu0 %v1565_v3  ;;  %v1685_v3 = vld [vmem:[#allocation7 + $0xb18] sm:$0xff] }
 0x9fc   :  { %v1479_v29 = vadd.f32 %v3532_v28, %v3530_v27  ;;  %1832 = vmatprep.subr.mxu1 %v1573_v62  ;;  %1764 = vmatpush1.msra.mxu0 %v1564_v5  ;;  %v1684_v5 = vld [vmem:[#allocation7 + $0xb10] sm:$0xff] }
 0x9fd   :  { %1833 = vmatpush1.msra.mxu1 %v1572_v2  ;;  %1765 = vmatprep.subr.mxu0 %v1559_v10  ;;  %v1686_v10 = vld [vmem:[#allocation7 + $0xb20] sm:$0xff] }
 0x9fe   :  { %1480 = vadd.xlane.f32.xlu0 %v1479_v29  ;;  %1834 = vmatprep.subr.mxu1 %v1567_v13  ;;  %v1537_v29 = vld [vmem:[#allocation7 + $0x678] sm:$0xff]  ;;  %v1692_v13 = vld [vmem:[#allocation7 + $0xb50] sm:$0xff] }
 0x9ff   :  { %1835 = vmatpush1.msra.mxu1 %v1566_v9  ;;  %1766 = vmatpush1.msra.mxu0 %v1558_v11  ;;  %v1687_v9 = vld [vmem:[#allocation7 + $0xb28] sm:$0xff]  ;;  %v1673_v11 = vld [vmem:[#allocation7 + $0xab8] sm:$0xff] }
 0xa00   :  { %1836 = vmatprep.subr.mxu1 %v1561_v12  ;;  %1767 = vmatprep.subr.mxu0 %v1553_v15  ;;  %v1681_v12 = vld [vmem:[#allocation7 + $0xaf8] sm:$0xff]  ;;  %v1672_v15 = vld [vmem:[#allocation7 + $0xab0] sm:$0xff] }
 0xa01   :  { %1837 = vmatpush1.msra.mxu1 %v1560_v14  ;;  %1768 = vmatpush1.msra.mxu0 %v1552_v18  ;;  %v1680_v14 = vld [vmem:[#allocation7 + $0xaf0] sm:$0xff]  ;;  %v1667_v18 = vld [vmem:[#allocation7 + $0xa88] sm:$0xff] }
 0xa02   :  { %1838 = vmatprep.subr.mxu1 %v1555_v16  ;;  %1769 = vmatprep.subr.mxu0 %v1547_v20  ;;  %v1675_v16 = vld [vmem:[#allocation7 + $0xac8] sm:$0xff]  ;;  %v1666_v20 = vld [vmem:[#allocation7 + $0xa80] sm:$0xff] }
 0xa03   :  { %1839 = vmatpush1.msra.mxu1 %v1554_v19  ;;  %1770 = vmatpush1.msra.mxu0 %v1546_v22  ;;  %v1674_v19 = vld [vmem:[#allocation7 + $0xac0] sm:$0xff]  ;;  %v1661_v22 = vld [vmem:[#allocation7 + $0xa58] sm:$0xff] }
 0xa04   :  { %1840 = vmatprep.subr.mxu1 %v1549_v21  ;;  %1771 = vmatprep.subr.mxu0 %v1541_v56  ;;  %v1669_v21 = vld [vmem:[#allocation7 + $0xa98] sm:$0xff]  ;;  %v1660_v56 = vld [vmem:[#allocation7 + $0xa50] sm:$0xff] }
 0xa05   :  { %1841 = vmatpush1.msra.mxu1 %v1548_v23  ;;  %1772 = vmatpush1.msra.mxu0 %v1540_v25  ;;  %v1668_v23 = vld [vmem:[#allocation7 + $0xa90] sm:$0xff]  ;;  %v1655_v25 = vld [vmem:[#allocation7 + $0xa28] sm:$0xff] }
 0xa06   :  { %1842 = vmatprep.subr.mxu1 %v1543_v24  ;;  %1773 = vmatprep.subr.mxu0 %v1535_v47  ;;  %v1663_v24 = vld [vmem:[#allocation7 + $0xa68] sm:$0xff]  ;;  %v1654_v47 = vld [vmem:[#allocation7 + $0xa20] sm:$0xff] }
 0xa07   :  { %1843 = vmatpush1.msra.mxu1 %v1542_v26  ;;  %1774 = vmatpush1.msra.mxu0 %v1534_v30  ;;  %v1662_v26 = vld [vmem:[#allocation7 + $0xa60] sm:$0xff]  ;;  %v1649_v30 = vld [vmem:[#allocation7 + $0x9f8] sm:$0xff] }
 0xa08   :  { %1844 = vmatprep.subr.mxu1 %v1537_v29  ;;  %1775 = vmatprep.subr.mxu0 %v1529_v32  ;;  %v1657_v29 = vld [vmem:[#allocation7 + $0xa38] sm:$0xff]  ;;  %v1648_v32 = vld [vmem:[#allocation7 + $0x9f0] sm:$0xff] }
 0xa09   :  { %1845 = vmatpush1.msra.mxu1 %v1536_v31  ;;  %1776 = vmatpush1.msra.mxu0 %v1528_v63  ;;  %v1656_v31 = vld [vmem:[#allocation7 + $0xa30] sm:$0xff]  ;;  %v1643_v63 = vld [vmem:[#allocation7 + $0x9c8] sm:$0xff] }
 0xa0a   :  { %1846 = vmatprep.subr.mxu1 %v1531_v1  ;;  %1777 = vmatprep.subr.mxu0 %v1523_v36  ;;  %v1651_v1 = vld [vmem:[#allocation7 + $0xa08] sm:$0xff]  ;;  %v1642_v36 = vld [vmem:[#allocation7 + $0x9c0] sm:$0xff] }
 0xa0b   :  { %1847 = vmatpush1.msra.mxu1 %v1530_v33  ;;  %1778 = vmatpush1.msra.mxu0 %v1522_v39  ;;  %v1650_v33 = vld [vmem:[#allocation7 + $0xa00] sm:$0xff]  ;;  %v1637_v39 = vld [vmem:[#allocation7 + $0x998] sm:$0xff] }
 0xa0c   :  { %1848 = vmatprep.subr.mxu1 %v1525_v37  ;;  %1779 = vmatprep.subr.mxu0 %v1709_v41  ;;  %v1645_v37 = vld [vmem:[#allocation7 + $0x9d8] sm:$0xff]  ;;  %v1636_v41 = vld [vmem:[#allocation7 + $0x990] sm:$0xff] }
 0xa0d   :  { %1849 = vmatpush1.msra.mxu1 %v1524_v40  ;;  %1780 = vmatpush2.msra.mxu0 %v1708_v43  ;;  %v1644_v40 = vld [vmem:[#allocation7 + $0x9d0] sm:$0xff]  ;;  %v1631_v43 = vld [vmem:[#allocation7 + $0x968] sm:$0xff] }
 0xa0e   :  { %1850 = vmatprep.subr.mxu1 %v1711_v42  ;;  %1781 = vmatprep.subr.mxu0 %v1703_v45  ;;  %v1639_v42 = vld [vmem:[#allocation7 + $0x9a8] sm:$0xff]  ;;  %v1630_v45 = vld [vmem:[#allocation7 + $0x960] sm:$0xff] }
 0xa0f   :  { %1851 = vmatpush2.msra.mxu1 %v1710_v44  ;;  %1782 = vmatpush2.msra.mxu0 %v1702_v48  ;;  %v1638_v44 = vld [vmem:[#allocation7 + $0x9a0] sm:$0xff]  ;;  %v1625_v48 = vld [vmem:[#allocation7 + $0x938] sm:$0xff] }
 0xa10   :  { %1852 = vmatprep.subr.mxu1 %v1705_v46  ;;  %1783 = vmatprep.subr.mxu0 %v1697_v50  ;;  %v1633_v46 = vld [vmem:[#allocation7 + $0x978] sm:$0xff]  ;;  %v1624_v50 = vld [vmem:[#allocation7 + $0x930] sm:$0xff] }
 0xa11   :  { %1853 = vmatpush2.msra.mxu1 %v1704_v49  ;;  %1784 = vmatpush2.msra.mxu0 %v1696_v52  ;;  %v1632_v49 = vld [vmem:[#allocation7 + $0x970] sm:$0xff]  ;;  %v1619_v52 = vld [vmem:[#allocation7 + $0x908] sm:$0xff] }
 0xa12   :  { %1854 = vmatprep.subr.mxu1 %v1699_v51  ;;  %1785 = vmatprep.subr.mxu0 %v1691_v54  ;;  %v1627_v51 = vld [vmem:[#allocation7 + $0x948] sm:$0xff]  ;;  %v1618_v54 = vld [vmem:[#allocation7 + $0x900] sm:$0xff] }
 0xa13   :  { %1855 = vmatpush2.msra.mxu1 %v1698_v53  ;;  %1786 = vmatpush2.msra.mxu0 %v1690_v57  ;;  %v1626_v53 = vld [vmem:[#allocation7 + $0x940] sm:$0xff]  ;;  %v1620_v57 = vld [vmem:[#allocation7 + $0x910] sm:$0xff] }
 0xa14   :  { %1856 = vmatprep.subr.mxu1 %v1693_v55  ;;  %1787 = vmatprep.subr.mxu0 %v1685_v3  ;;  %v1621_v55 = vld [vmem:[#allocation7 + $0x918] sm:$0xff]  ;;  %v1478_v3 = vld [vmem:[#allocation23] sm:$0x3] }
 0xa15   :  { %1857 = vmatpush2.msra.mxu1 %v1692_v13  ;;  %1788 = vmatpush2.msra.mxu0 %v1684_v5 }
 0xa16   :  { %1858 = vmatprep.subr.mxu1 %v1687_v9 }
 0xa17   :  { %1859 = vmatpush2.msra.mxu1 %v1686_v10  ;;  %v1516_v10 = vrot.slane %v1478_v3, %v3475_v34 }
 0xa18   :  { %1860 = vmatprep.subr.mxu1 %v1681_v12  ;;  %v1512_v12 = vrot.slane %v1478_v3, %v3459_v7  ;;  %v1676_v3 = vld [vmem:[#allocation7 + $0xad0] sm:$0xff] }
 0xa19   :  { %1861 = vmatpush2.msra.mxu1 %v1680_v14 }
 0xa1a   :  { %1862 = vmatprep.subr.mxu1 %v1675_v16 }
 0xa1b   :  { %1863 = vmatpush2.msra.mxu1 %v1674_v19  ;;  %v1611_v19 = vld [vmem:[#allocation7 + $0x8c8] sm:$0xff] }
 0xa1c   :  { %1864 = vmatprep.subr.mxu1 %v1669_v21  ;;  %v1599_v21 = vld [vmem:[#allocation7 + $0x868] sm:$0xff] }
 0xa1d   :  { %1865 = vmatpush2.msra.mxu1 %v1668_v23  ;;  %v1593_v23 = vld [vmem:[#allocation7 + $0x838] sm:$0xff] }
 0xa1e   :  { %1866 = vmatprep.subr.mxu1 %v1663_v24  ;;  %v1587_v24 = vld [vmem:[#allocation7 + $0x808] sm:$0xff] }
 0xa1f   :  { %1867 = vmatpush2.msra.mxu1 %v1662_v26  ;;  %v1581_v26 = vld [vmem:[#allocation7 + $0x7d8] sm:$0xff] }
 0xa20   :  { %1868 = vmatprep.subr.mxu1 %v1657_v29  ;;  %v1575_v29 = vld [vmem:[#allocation7 + $0x7a8] sm:$0xff] }
 0xa21   :  { %1869 = vmatpush2.msra.mxu1 %v1656_v31  ;;  %v1569_v31 = vld [vmem:[#allocation7 + $0x778] sm:$0xff] }
 0xa22   :  { %1870 = vmatprep.subr.mxu1 %v1651_v1  ;;  %v1563_v1 = vld [vmem:[#allocation7 + $0x748] sm:$0xff] }
 0xa23   :  { %1871 = vmatpush2.msra.mxu1 %v1650_v33  ;;  %v1557_v33 = vld [vmem:[#allocation7 + $0x718] sm:$0xff] }
 0xa24   :  { %1872 = vmatprep.subr.mxu1 %v1645_v37  ;;  %v1551_v37 = vld [vmem:[#allocation7 + $0x6e8] sm:$0xff] }
 0xa25   :  { %1873 = vmatpush2.msra.mxu1 %v1644_v40  ;;  %v1545_v40 = vld [vmem:[#allocation7 + $0x6b8] sm:$0xff] }
 0xa26   :  { %1874 = vmatprep.subr.mxu1 %v1639_v42  ;;  %v1539_v42 = vld [vmem:[#allocation7 + $0x688] sm:$0xff] }
 0xa27   :  { %1875 = vmatpush2.msra.mxu1 %v1638_v44  ;;  %v1533_v44 = vld [vmem:[#allocation7 + $0x658] sm:$0xff] }
 0xa28   :  { %1876 = vmatprep.subr.mxu1 %v1633_v46  ;;  %v1527_v46 = vld [vmem:[#allocation7 + $0x628] sm:$0xff] }
 0xa29   :  { %1877 = vmatpush2.msra.mxu1 %v1632_v49  ;;  %v1713_v49 = vld [vmem:[#allocation7 + $0xbf8] sm:$0xff] }
 0xa2a   :  { %1878 = vmatprep.subr.mxu1 %v1627_v51  ;;  %v1707_v51 = vld [vmem:[#allocation7 + $0xbc8] sm:$0xff] }
 0xa2b   :  { %1879 = vmatpush2.msra.mxu1 %v1626_v53  ;;  %v1701_v53 = vld [vmem:[#allocation7 + $0xb98] sm:$0xff] }
 0xa2c   :  { %1880 = vmatprep.subr.mxu1 %v1621_v55  ;;  %v1695_v55 = vld [vmem:[#allocation7 + $0xb68] sm:$0xff] }
 0xa2d   :  { %1881 = vmatpush2.msra.mxu1 %v1620_v57  ;;  %v1694_v57 = vld [vmem:[#allocation7 + $0xb60] sm:$0xff] }
 0xa2e   :  { %2881 = vmatprep.subr.mxu1 %v3293_v4 }
 0xa87   :  { %v1481_v58 = vpop.xlane.xlu0 %1480 }
 0xa88   :  { %v1482_v59 = vmul.f32 0.00390625, %v1481_v58  ;;  %v1617_v58 = vld [vmem:[#allocation7 + $0x8f8] sm:$0xff] }
 0xa8a   :  { %v3537_v60 = vsub.f32 %v3530_v27, %v1482_v59  ;;  %v3540_v61 = vsub.f32 %v3532_v28, %v1482_v59  ;;  %v1679_v27 = vld [vmem:[#allocation7 + $0xae8] sm:$0xff]  ;;  %v1678_v28 = vld [vmem:[#allocation7 + $0xae0] sm:$0xff] }
 0xa8b   :  { %1789 = vmatprep.subr.mxu0 %v1679_v27 }
 0xa8c   :  { %v1485_v62 = vmul.f32 %v3537_v60, %v3537_v60  ;;  %v1486_v0 = vmul.f32 %v3540_v61, %v3540_v61  ;;  %1790 = vmatpush2.msra.mxu0 %v1678_v28 }
 0xa8d   :  { %1791 = vmatprep.subr.mxu0 %v1673_v11 }
 0xa8e   :  { %v1487_v2 = vadd.f32 %v1486_v0, %v1485_v62  ;;  %1792 = vmatpush2.msra.mxu0 %v1672_v15 }
 0xa8f   :  { %1793 = vmatprep.subr.mxu0 %v1667_v18  ;;  %v1616_v18 = vld [vmem:[#allocation7 + $0x8f0] sm:$0xff] }
 0xa90   :  { %1488 = vadd.xlane.f32.xlu1 %v1487_v2  ;;  %1794 = vmatpush2.msra.mxu0 %v1666_v20  ;;  %v1477_v2 = vld [vmem:[#allocation22] sm:$0x3]  ;;  %v1604_v20 = vld [vmem:[#allocation7 + $0x890] sm:$0xff] }
 0xa91   :  { %1795 = vmatprep.subr.mxu0 %v1661_v22  ;;  %v1503_v13 = vrot.slane %v1477_v2, %v3475_v34  ;;  %v1499_v5 = vrot.slane %v1477_v2, %v3459_v7  ;;  %v1598_v22 = vld [vmem:[#allocation7 + $0x860] sm:$0xff]  ;;  %v1677_v2 = vld [vmem:[#allocation7 + $0xad8] sm:$0xff] }
 0xa92   :  { %1796 = vmatpush2.msra.mxu0 %v1660_v56  ;;  %v1592_v56 = vld [vmem:[#allocation7 + $0x830] sm:$0xff] }
 0xa93   :  { %1797 = vmatprep.subr.mxu0 %v1655_v25  ;;  %v1586_v25 = vld [vmem:[#allocation7 + $0x800] sm:$0xff] }
 0xa94   :  { %1798 = vmatpush2.msra.mxu0 %v1654_v47  ;;  %v1580_v47 = vld [vmem:[#allocation7 + $0x7d0] sm:$0xff] }
 0xa95   :  { %1799 = vmatprep.subr.mxu0 %v1649_v30  ;;  %v1574_v30 = vld [vmem:[#allocation7 + $0x7a0] sm:$0xff] }
 0xa96   :  { %1800 = vmatpush2.msra.mxu0 %v1648_v32  ;;  %v1568_v32 = vld [vmem:[#allocation7 + $0x770] sm:$0xff] }
 0xa97   :  { %1801 = vmatprep.subr.mxu0 %v1643_v63  ;;  %v1562_v63 = vld [vmem:[#allocation7 + $0x740] sm:$0xff] }
 0xa98   :  { %1802 = vmatpush2.msra.mxu0 %v1642_v36  ;;  %v1556_v36 = vld [vmem:[#allocation7 + $0x710] sm:$0xff] }
 0xa99   :  { %1803 = vmatprep.subr.mxu0 %v1637_v39  ;;  %v1550_v39 = vld [vmem:[#allocation7 + $0x6e0] sm:$0xff] }
 0xa9a   :  { %1804 = vmatpush2.msra.mxu0 %v1636_v41  ;;  %v1544_v41 = vld [vmem:[#allocation7 + $0x6b0] sm:$0xff] }
 0xa9b   :  { %1805 = vmatprep.subr.mxu0 %v1631_v43  ;;  %v1538_v43 = vld [vmem:[#allocation7 + $0x680] sm:$0xff] }
 0xa9c   :  { %1806 = vmatpush2.msra.mxu0 %v1630_v45  ;;  %v1532_v45 = vld [vmem:[#allocation7 + $0x650] sm:$0xff] }
 0xa9d   :  { %1807 = vmatprep.subr.mxu0 %v1625_v48  ;;  %v1526_v48 = vld [vmem:[#allocation7 + $0x620] sm:$0xff] }
 0xa9e   :  { %1808 = vmatpush2.msra.mxu0 %v1624_v50  ;;  %v1712_v50 = vld [vmem:[#allocation7 + $0xbf0] sm:$0xff] }
 0xa9f   :  { %1809 = vmatprep.subr.mxu0 %v1619_v52  ;;  %v1706_v52 = vld [vmem:[#allocation7 + $0xbc0] sm:$0xff] }
 0xaa0   :  { %1810 = vmatpush2.msra.mxu0 %v1618_v54  ;;  %v1700_v54 = vld [vmem:[#allocation7 + $0xb90] sm:$0xff] }
 0xaa1   :  { %1889 = vmatprep.subr.mxu0 %v1617_v58  ;;  %v1689_v58 = vld [vmem:[#allocation7 + $0xb38] sm:$0xff] }
 0xb19   :  { %v1489_v59 = vpop.xlane.xlu1 %1488 }
 0xb1a   :  { %v1490_v62 = vmul.f32 0.00390625, %v1489_v59  ;;  %v1688_v59 = vld [vmem:[#allocation7 + $0xb30] sm:$0xff] }
 0xb1c   :  { %v1491_v0 = vadd.f32 1e-05, %v1490_v62  ;;  %v1683_v62 = vld [vmem:[#allocation7 + $0xb08] sm:$0xff] }
 0xb1e   :  { %2936 = vrsqrt.f32 %v1491_v0  ;;  %v1682_v0 = vld [vmem:[#allocation7 + $0xb00] sm:$0xff] }
 0xb2b   :  { %v2937_v9 = vpop.eup %2936 }
 0xb2c   :  { %v1494_v27 = vmul.f32 %v2937_v9, %v3540_v61  ;;  %v1493_v28 = vmul.f32 %v2937_v9, %v3537_v60  ;;  %v1610_v61 = vld [vmem:[#allocation7 + $0x8c0] sm:$0xff]  ;;  %v1605_v60 = vld [vmem:[#allocation7 + $0x898] sm:$0xff] }
 0xb2d   :  { %v1665_v9 = vld [vmem:[#allocation7 + $0xa78] sm:$0xff] }
 0xb2e   :  { %v1507_v11 = vmul.f32 %v1503_v13, %v1494_v27  ;;  %v1506_v14 = vmul.f32 %v1499_v5, %v1493_v28  ;;  %v1671_v13 = vld [vmem:[#allocation7 + $0xaa8] sm:$0xff]  ;;  %v1670_v5 = vld [vmem:[#allocation7 + $0xaa0] sm:$0xff]  ;;  %v1664_v27 = vld [vmem:[#allocation7 + $0xa70] sm:$0xff] }
 0xb2f   :  { %v1658_v28 = vld [vmem:[#allocation7 + $0xa40] sm:$0xff] }
 0xb30   :  { %v3553_v15 = vadd.f32 %v1516_v10, %v1507_v11  ;;  %v3555_v16 = vadd.f32 %v1512_v12, %v1506_v14  ;;  %v1659_v10 = vld [vmem:[#allocation7 + $0xa48] sm:$0xff]  ;;  %v1653_v12 = vld [vmem:[#allocation7 + $0xa18] sm:$0xff]  ;;  %v1652_v11 = vld [vmem:[#allocation7 + $0xa10] sm:$0xff] }
 0xb31   :  { %v1647_v14 = vld [vmem:[#allocation7 + $0x9e8] sm:$0xff] }
 0xb32   :  { %1811 = vmatprep.mubr.f32.mxu0 %v3553_v15  ;;  %1882 = vmatprep.mubr.f32.mxu1 %v3553_v15 }
 0xb33   :  { %1812 = vmatmul.mubr.f32.vlgmr.msra.gmra.mxu0 %v3555_v16  ;;  %1883 = vmatmul.mubr.f32.vlgmr.msra.gmra.mxu1 %v3555_v16 }
 0xb34   :  { %1890 = vmatpush1.msra.mxu0 %v1616_v18  ;;  %1953 = vmatprep.mubr.f32.mxu0 %v3553_v15  ;;  %v1646_v18 = vld [vmem:[#allocation7 + $0x9e0] sm:$0xff] }
 0xb35   :  { %1891 = vmatprep.subr.mxu0 %v1611_v19  ;;  %2883 = vmatprep.mubr.msk.f32.mxu1 %vm3294_vm0, %v3293_v4  ;;  %v1641_v19 = vld [vmem:[#allocation7 + $0x9b8] sm:$0xff] }
 0xb36   :  { %1892 = vmatpush1.msra.mxu0 %v1610_v61  ;;  %v1640_v61 = vld [vmem:[#allocation7 + $0x9b0] sm:$0xff] }
 0xb37   :  { %1893 = vmatprep.subr.mxu0 %v1605_v60  ;;  %v1635_v60 = vld [vmem:[#allocation7 + $0x988] sm:$0xff] }
 0xb38   :  { %1894 = vmatpush1.msra.mxu0 %v1604_v20  ;;  %v1634_v20 = vld [vmem:[#allocation7 + $0x980] sm:$0xff] }
 0xb39   :  { %1895 = vmatprep.subr.mxu0 %v1599_v21  ;;  %v1629_v21 = vld [vmem:[#allocation7 + $0x958] sm:$0xff] }
 0xb3a   :  { %1896 = vmatpush1.msra.mxu0 %v1598_v22  ;;  %v1628_v22 = vld [vmem:[#allocation7 + $0x950] sm:$0xff] }
 0xb3b   :  { %1897 = vmatprep.subr.mxu0 %v1593_v23  ;;  %v1623_v23 = vld [vmem:[#allocation7 + $0x928] sm:$0xff] }
 0xb3c   :  { %1898 = vmatpush1.msra.mxu0 %v1592_v56  ;;  %v1622_v56 = vld [vmem:[#allocation7 + $0x920] sm:$0xff] }
 0xb3d   :  { %1899 = vmatprep.subr.mxu0 %v1587_v24  ;;  %v1715_v24 = vld [vmem:[#allocation8 + $0x6] sm:$0x3f] }
 0xb3e   :  { %1900 = vmatpush1.msra.mxu0 %v1586_v25  ;;  %v1720_v25 = vrot.slane %v1715_v24, %v3459_v7 }
 0xb3f   :  { %1901 = vmatprep.subr.mxu0 %v1581_v26  ;;  %v1728_v26 = vrot.slane %v1715_v24, %v441_v8 }
 0xb40   :  { %1902 = vmatpush1.msra.mxu0 %v1580_v47 }
 0xb41   :  { %1903 = vmatprep.subr.mxu0 %v1575_v29 }
 0xb42   :  { %1904 = vmatpush1.msra.mxu0 %v1574_v30 }
 0xb43   :  { %1905 = vmatprep.subr.mxu0 %v1569_v31 }
 0xb44   :  { %1906 = vmatpush1.msra.mxu0 %v1568_v32 }
 0xb45   :  { %1907 = vmatprep.subr.mxu0 %v1563_v1  ;;  %v1736_v1 = vrot.slane %v1715_v24, %v449_v17 }
 0xb46   :  { %1908 = vmatpush1.msra.mxu0 %v1562_v63 }
 0xb47   :  { %1909 = vmatprep.subr.mxu0 %v1557_v33 }
 0xb48   :  { %1910 = vmatpush1.msra.mxu0 %v1556_v36 }
 0xb49   :  { %1911 = vmatprep.subr.mxu0 %v1551_v37 }
 0xb4a   :  { %1912 = vmatpush1.msra.mxu0 %v1550_v39  ;;  %v2950_v39 = vld [vmem:[#allocation5] sm:$0xff] }
 0xb4b   :  { %1913 = vmatprep.subr.mxu0 %v1545_v40 }
 0xb4c   :  { %1914 = vmatpush1.msra.mxu0 %v1544_v41 }
 0xb4d   :  { %1915 = vmatprep.subr.mxu0 %v1539_v42 }
 0xb4e   :  { %1916 = vmatpush1.msra.mxu0 %v1538_v43 }
 0xb4f   :  { %1917 = vmatprep.subr.mxu0 %v1533_v44 }
 0xb50   :  { %1918 = vmatpush1.msra.mxu0 %v1532_v45 }
 0xb51   :  { %1919 = vmatprep.subr.mxu0 %v1527_v46 }
 0xb52   :  { %1920 = vmatpush1.msra.mxu0 %v1526_v48 }
 0xb53   :  { %1921 = vmatprep.subr.mxu0 %v1713_v49  ;;  %v1724_v49 = vrot.slane %v1715_v24, %v3475_v34 }
 0xb54   :  { %1922 = vmatpush2.msra.mxu0 %v1712_v50  ;;  %v1732_v50 = vrot.slane %v1715_v24, %v445_v35 }
 0xb55   :  { %1923 = vmatprep.subr.mxu0 %v1707_v51 }
 0xb56   :  { %1924 = vmatpush2.msra.mxu0 %v1706_v52 }
 0xb57   :  { %1925 = vmatprep.subr.mxu0 %v1701_v53 }
 0xb58   :  { %1926 = vmatpush2.msra.mxu0 %v1700_v54 }
 0xb59   :  { %1927 = vmatprep.subr.mxu0 %v1695_v55  ;;  %v1740_v55 = vrot.slane %v1715_v24, %v453_v38  ;;  %v2290_v24 = vld [vmem:[#allocation10 + $0x298] sm:$0xff] }
 0xb5a   :  { %1928 = vmatpush2.msra.mxu0 %v1694_v57 }
 0xb5b   :  { %1929 = vmatprep.subr.mxu0 %v1689_v58 }
 0xb5c   :  { %1930 = vmatpush2.msra.mxu0 %v1688_v59 }
 0xb5d   :  { %1931 = vmatprep.subr.mxu0 %v1683_v62 }
 0xb5e   :  { %1932 = vmatpush2.msra.mxu0 %v1682_v0 }
 0xb5f   :  { %1933 = vmatprep.subr.mxu0 %v1677_v2 }
 0xb60   :  { %1934 = vmatpush2.msra.mxu0 %v1676_v3 }
 0xb61   :  { %1935 = vmatprep.subr.mxu0 %v1671_v13 }
 0xb62   :  { %1936 = vmatpush2.msra.mxu0 %v1670_v5 }
 0xb63   :  { %1937 = vmatprep.subr.mxu0 %v1665_v9 }
 0xb64   :  { %1938 = vmatpush2.msra.mxu0 %v1664_v27 }
 0xb65   :  { %1939 = vmatprep.subr.mxu0 %v1659_v10  ;;  %v2302_v10 = vld [vmem:[#allocation10 + $0x2f8] sm:$0xff] }
 0xb66   :  { %1940 = vmatpush2.msra.mxu0 %v1658_v28 }
 0xb67   :  { %1941 = vmatprep.subr.mxu0 %v1653_v12 }
 0xb68   :  { %1942 = vmatpush2.msra.mxu0 %v1652_v11  ;;  %v2301_v11 = vld [vmem:[#allocation10 + $0x2f0] sm:$0xff] }
 0xb69   :  { %1943 = vmatprep.subr.mxu0 %v1647_v14  ;;  %v2300_v14 = vld [vmem:[#allocation10 + $0x2e8] sm:$0xff] }
 0xb6a   :  { %1944 = vmatpush2.msra.mxu0 %v1646_v18  ;;  %v2299_v18 = vld [vmem:[#allocation10 + $0x2e0] sm:$0xff] }
 0xb6b   :  { %1945 = vmatprep.subr.mxu0 %v1641_v19  ;;  %v2298_v19 = vld [vmem:[#allocation10 + $0x2d8] sm:$0xff] }
 0xb6c   :  { %1946 = vmatpush2.msra.mxu0 %v1640_v61  ;;  %v2297_v61 = vld [vmem:[#allocation10 + $0x2d0] sm:$0xff] }
 0xb6d   :  { %1947 = vmatprep.subr.mxu0 %v1635_v60  ;;  %v2296_v60 = vld [vmem:[#allocation10 + $0x2c8] sm:$0xff] }
 0xb6e   :  { %1948 = vmatpush2.msra.mxu0 %v1634_v20  ;;  %v2295_v20 = vld [vmem:[#allocation10 + $0x2c0] sm:$0xff] }
 0xb6f   :  { %1949 = vmatprep.subr.mxu0 %v1629_v21  ;;  %v2294_v21 = vld [vmem:[#allocation10 + $0x2b8] sm:$0xff] }
 0xb70   :  { %1950 = vmatpush2.msra.mxu0 %v1628_v22  ;;  %v2293_v22 = vld [vmem:[#allocation10 + $0x2b0] sm:$0xff] }
 0xb71   :  { %1951 = vmatprep.subr.mxu0 %v1623_v23  ;;  %v2292_v23 = vld [vmem:[#allocation10 + $0x2a8] sm:$0xff] }
 0xb72   :  { %1952 = vmatpush2.msra.mxu0 %v1622_v56  ;;  %v2291_v56 = vld [vmem:[#allocation10 + $0x2a0] sm:$0xff] }
 0xb73   :  { %1954 = vmatmul.mubr.f32.vlgmr.msra.gmra.mxu0 %v3555_v16 }
 0xbf3   :  { %v1813_v47 = vpop.f32.mrf.mxu0  ;;  %v1884_v29 = vpop.f32.mrf.mxu1 }
 0xbf4   :  { %v1814_v30 = vadd.f32 %v1813_v47, %v1720_v25  ;;  %v1885_v31 = vadd.f32 %v1884_v29, %v1728_v26  ;;  %v2289_v25 = vld [vmem:[#allocation10 + $0x290] sm:$0xff]  ;;  %v2288_v26 = vld [vmem:[#allocation10 + $0x288] sm:$0xff]  ;;  %v2287_v47 = vld [vmem:[#allocation10 + $0x280] sm:$0xff] }
 0xbf5   :  { %v1815_v63 = vpop.f32.mrf.mxu0  ;;  %v1886_v8 = vpop.f32.mrf.mxu1  ;;  %v2286_v29 = vld [vmem:[#allocation10 + $0x278] sm:$0xff] }
 0xbf6   :  { %v1960_v32 = vmul.f32 0.088388346, %v1814_v30  ;;  %2882 = vmatpush3.xpose.msra.mxu1 %v1885_v31  ;;  %v1816_v52 = vadd.f32 %v1815_v63, %v1724_v49  ;;  %v1887_v54 = vadd.f32 %v1886_v8, %v1732_v50  ;;  %v2285_v30 = vld [vmem:[#allocation10 + $0x270] sm:$0xff]  ;;  %v2284_v31 = vld [vmem:[#allocation10 + $0x268] sm:$0xff]  ;;  %v2278_v8 = vld [vmem:[#allocation10 + $0x238] sm:$0xff] }
 0xbf7   :  { %2886 = vmatprep.subr.mxu1 %v3293_v4  ;;  %v2281_v63 = vld [vmem:[#allocation10 + $0x250] sm:$0xff]  ;;  %v2330_v49 = vld [vmem:[#allocation10 + $0x3d8] sm:$0xff] }
 0xbf8   :  { %v2115_v58 = vmul.f32 0.088388346, %v1816_v52  ;;  %v2329_v50 = vld [vmem:[#allocation10 + $0x3d0] sm:$0xff]  ;;  %v2327_v52 = vld [vmem:[#allocation10 + $0x3c0] sm:$0xff] }
 0xbf9   :  { %2884 = vmatmul.mubr.f32.vlgmr.msra.gmra.mxu1 %v1960_v32  ;;  %v2283_v32 = vld [vmem:[#allocation10 + $0x260] sm:$0xff] }
 0xbfa   :  { %2888 = vmatprep.mubr.msk.f32.mxu1 %vm3294_vm0, %v3293_v4 }
 0xc33   :  { %v1955_v33 = vpop.f32.mrf.mxu0 }
 0xc34   :  { %v1956_v36 = vadd.f32 %v1955_v33, %v1736_v1  ;;  %v2282_v1 = vld [vmem:[#allocation10 + $0x258] sm:$0xff]  ;;  %v2280_v33 = vld [vmem:[#allocation10 + $0x248] sm:$0xff] }
 0xc35   :  { %v1957_v57 = vpop.f32.mrf.mxu0 }
 0xc36   :  { %2887 = vmatpush3.msra.mxu1 %v1956_v36  ;;  %v1958_v59 = vadd.f32 %v1957_v57, %v1740_v55  ;;  %v2279_v36 = vld [vmem:[#allocation10 + $0x240] sm:$0xff]  ;;  %v2324_v55 = vld [vmem:[#allocation10 + $0x3a8] sm:$0xff] }
 0xc37   :  { %2891 = vmatprep.subr.mxu1 %v3293_v4  ;;  %v2323_v57 = vld [vmem:[#allocation10 + $0x3a0] sm:$0xff] }
 0xcb9   :  { %v2027_v37 = vpop.f32.mrf.mxu1 }
 0xcba   :  { %v2028_v40 = vadd.f32 %v2950_v39, %v2027_v37  ;;  %v2277_v37 = vld [vmem:[#allocation10 + $0x230] sm:$0xff] }
 0xcbb   :  { %v2885_v41 = vpop.f32.mrf.mxu1 }
 0xcbc   :  { %v2031_v42 = vsel %vm745_vm1, %v2028_v40, -inf  ;;  %v2274_v41 = vld [vmem:[#allocation10 + $0x218] sm:$0xff] }
 0xcbd   :  { %2032 = vmax.xlane.f32.xlu0 %v2031_v42  ;;  %v2273_v42 = vld [vmem:[#allocation10 + $0x210] sm:$0xff] }
 0xd46   :  { %v2033_v43 = vpop.xlane.xlu0 %2032 }
 0xd47   :  { %v2034_v44 = vsub.f32 %v2028_v40, %v2033_v43  ;;  %v2275_v40 = vld [vmem:[#allocation10 + $0x220] sm:$0xff]  ;;  %v2272_v43 = vld [vmem:[#allocation10 + $0x208] sm:$0xff] }
 0xd49   :  { %v2035_v45 = vmul.f32 1.442695, %v2034_v44  ;;  %v2271_v44 = vld [vmem:[#allocation10 + $0x200] sm:$0xff] }
 0xd4b   :  { %2938 = vpow2.f32 %v2035_v45  ;;  %v2334_v45 = vld [vmem:[#allocation10 + $0x3f8] sm:$0xff] }
 0xd58   :  { %v2939_v46 = vpop.eup %2938 }
 0xd59   :  { %v2037_v17 = vsel %vm745_vm1, %v2939_v46, 0.0 }
 0xd5a   :  { %2038 = vadd.xlane.f32.xlu1 %v2037_v17  ;;  %v2332_v17 = vld [vmem:[#allocation10 + $0x3e8] sm:$0xff] }
 0xde3   :  { %v2039_v48 = vpop.xlane.xlu1 %2038 }
 0xde4   :  { %2940 = vrcp.f32 %v2039_v48  ;;  %v2331_v48 = vld [vmem:[#allocation10 + $0x3e0] sm:$0xff] }
 0xdf1   :  { %v2941_v51 = vpop.eup %2940 }
 0xdf2   :  { %v2041_v53 = vmul.f32 %v2941_v51, %v2939_v46  ;;  %v2333_v46 = vld [vmem:[#allocation10 + $0x3f0] sm:$0xff]  ;;  %v2328_v51 = vld [vmem:[#allocation10 + $0x3c8] sm:$0xff] }
 0xdf4   :  { %2889 = vmatmul.mubr.msk.f32.vlgmr.msra.gmra.mxu1 %vm745_vm1, %v2041_v53  ;;  %v2326_v53 = vld [vmem:[#allocation10 + $0x3b8] sm:$0xff] }
 0xdf5   :  { %2892 = vmatpush3.xpose.msra.mxu1 %v1887_v54  ;;  %2893 = vmatprep.mubr.msk.f32.mxu1 %vm3294_vm0, %v3293_v4  ;;  %v2325_v54 = vld [vmem:[#allocation10 + $0x3b0] sm:$0xff] }
 0xdf6   :  { %2896 = vmatprep.subr.mxu1 %v3293_v4 }
 0xdf8   :  { %2894 = vmatmul.mubr.f32.vlgmr.msra.gmra.mxu1 %v2115_v58  ;;  %v2322_v58 = vld [vmem:[#allocation10 + $0x398] sm:$0xff] }
 0xdf9   :  { %2897 = vmatpush3.msra.mxu1 %v1958_v59  ;;  %2898 = vmatprep.mubr.msk.f32.mxu1 %vm3294_vm0, %v3293_v4  ;;  %v2321_v59 = vld [vmem:[#allocation10 + $0x390] sm:$0xff] }
 0xdfa   :  { %2348 = vmatprep.subr.mxu1 %v2302_v10  ;;  %v2310_v10 = vld [vmem:[#allocation10 + $0x338] sm:$0xff] }
 0xeb4   :  { %v3587_v35 = vpop.f32.mrf.mxu1 }
 0xeb6   :  { %v2890_v6 = vpop.f32.mrf.mxu1 }
 0xeb7   :  { %v2320_v6 = vld [vmem:[#allocation10 + $0x388] sm:$0xff] }
 0xeb8   :  { %v2182_v38 = vpop.f32.mrf.mxu1 }
 0xeb9   :  { %v2183_v62 = vadd.f32 %v2950_v39, %v2182_v38  ;;  %v2276_v39 = vld [vmem:[#allocation10 + $0x228] sm:$0xff]  ;;  %v2319_v38 = vld [vmem:[#allocation10 + $0x380] sm:$0xff] }
 0xeba   :  { %v2895_v0 = vpop.f32.mrf.mxu1 }
 0xebb   :  { %v2186_v2 = vsel %vm745_vm1, %v2183_v62, -inf  ;;  %v2317_v0 = vld [vmem:[#allocation10 + $0x370] sm:$0xff] }
 0xebc   :  { %2187 = vmax.xlane.f32.xlu0 %v2186_v2  ;;  %v2316_v2 = vld [vmem:[#allocation10 + $0x368] sm:$0xff] }
 0xf45   :  { %v2188_v3 = vpop.xlane.xlu0 %2187 }
 0xf46   :  { %v2189_v13 = vsub.f32 %v2183_v62, %v2188_v3  ;;  %v2318_v62 = vld [vmem:[#allocation10 + $0x378] sm:$0xff]  ;;  %v2315_v3 = vld [vmem:[#allocation10 + $0x360] sm:$0xff] }
 0xf48   :  { %v2190_v5 = vmul.f32 1.442695, %v2189_v13  ;;  %v2314_v13 = vld [vmem:[#allocation10 + $0x358] sm:$0xff] }
 0xf4a   :  { %2942 = vpow2.f32 %v2190_v5  ;;  %v2313_v5 = vld [vmem:[#allocation10 + $0x350] sm:$0xff] }
 0xf57   :  { %v2943_v9 = vpop.eup %2942 }
 0xf58   :  { %v2192_v27 = vsel %vm745_vm1, %v2943_v9, 0.0 }
 0xf59   :  { %2193 = vadd.xlane.f32.xlu1 %v2192_v27  ;;  %v2311_v27 = vld [vmem:[#allocation10 + $0x340] sm:$0xff] }
 0xfe2   :  { %v2194_v4 = vpop.xlane.xlu1 %2193 }
 0xfe3   :  { %2944 = vrcp.f32 %v2194_v4  ;;  %v2309_v4 = vld [vmem:[#allocation10 + $0x330] sm:$0xff] }
 0xff0   :  { %v2945_v28 = vpop.eup %2944 }
 0xff1   :  { %v2196_v12 = vmul.f32 %v2945_v28, %v2943_v9  ;;  %v2312_v9 = vld [vmem:[#allocation10 + $0x348] sm:$0xff] }
 0xff2   :  { %v2308_v28 = vld [vmem:[#allocation10 + $0x328] sm:$0xff] }
 0xff3   :  { %2899 = vmatmul.mubr.msk.f32.vlgmr.msra.gmra.mxu1 %vm745_vm1, %v2196_v12  ;;  %v2307_v12 = vld [vmem:[#allocation10 + $0x320] sm:$0xff] }
 0xff4   :  { %2349 = vmatpush1.msra.mxu1 %v2301_v11  ;;  %v2306_v11 = vld [vmem:[#allocation10 + $0x318] sm:$0xff] }
 0xff5   :  { %2350 = vmatprep.subr.mxu1 %v2300_v14  ;;  %v2305_v14 = vld [vmem:[#allocation10 + $0x310] sm:$0xff] }
 0xff6   :  { %2351 = vmatpush1.msra.mxu1 %v2299_v18  ;;  %v2304_v18 = vld [vmem:[#allocation10 + $0x308] sm:$0xff] }
 0xff7   :  { %2352 = vmatprep.subr.mxu1 %v2298_v19  ;;  %v2303_v19 = vld [vmem:[#allocation10 + $0x300] sm:$0xff] }
 0xff8   :  { %2353 = vmatpush1.msra.mxu1 %v2297_v61 }
 0xff9   :  { %2354 = vmatprep.subr.mxu1 %v2296_v60 }
 0xffa   :  { %2355 = vmatpush1.msra.mxu1 %v2295_v20  ;;  %v2336_v20 = vld [vmem:[#allocation11 + $0x2] sm:$0x3] }
 0xffb   :  { %2356 = vmatprep.subr.mxu1 %v2294_v21  ;;  %v2341_v21 = vrot.slane %v2336_v20, %v3459_v7 }
 0xffc   :  { %2357 = vmatpush1.msra.mxu1 %v2293_v22  ;;  %v2345_v22 = vrot.slane %v2336_v20, %v3475_v34  ;;  %v2518_v20 = vld [vmem:[#allocation16 + $0x390] sm:$0xff] }
 0xffd   :  { %2358 = vmatprep.subr.mxu1 %v2292_v23 }
 0xffe   :  { %2359 = vmatpush1.msra.mxu1 %v2291_v56 }
 0xfff   :  { %2360 = vmatprep.subr.mxu1 %v2290_v24 }
0x1000   :  { %2361 = vmatpush1.msra.mxu1 %v2289_v25 }
0x1001   :  { %2362 = vmatprep.subr.mxu1 %v2288_v26 }
0x1002   :  { %2363 = vmatpush1.msra.mxu1 %v2287_v47 }
0x1003   :  { %2364 = vmatprep.subr.mxu1 %v2286_v29 }
0x1004   :  { %2365 = vmatpush1.msra.mxu1 %v2285_v30  ;;  %v2498_v30 = vld [vmem:[#allocation16 + $0x2f0] sm:$0xff] }
0x1005   :  { %2366 = vmatprep.subr.mxu1 %v2284_v31  ;;  %v2497_v31 = vld [vmem:[#allocation16 + $0x2e8] sm:$0xff] }
0x1006   :  { %2367 = vmatpush1.msra.mxu1 %v2283_v32  ;;  %v2496_v32 = vld [vmem:[#allocation16 + $0x2e0] sm:$0xff] }
0x1007   :  { %2368 = vmatprep.subr.mxu1 %v2282_v1  ;;  %v2495_v1 = vld [vmem:[#allocation16 + $0x2d8] sm:$0xff] }
0x1008   :  { %2369 = vmatpush1.msra.mxu1 %v2281_v63  ;;  %v2494_v63 = vld [vmem:[#allocation16 + $0x2d0] sm:$0xff] }
0x1009   :  { %2370 = vmatprep.subr.mxu1 %v2280_v33  ;;  %v2493_v33 = vld [vmem:[#allocation16 + $0x2c8] sm:$0xff] }
0x100a   :  { %2371 = vmatpush1.msra.mxu1 %v2279_v36  ;;  %v2490_v36 = vld [vmem:[#allocation16 + $0x2b0] sm:$0xff] }
0x100b   :  { %2372 = vmatprep.subr.mxu1 %v2278_v8  ;;  %v2489_v8 = vld [vmem:[#allocation16 + $0x2a8] sm:$0xff] }
0x100c   :  { %2373 = vmatpush1.msra.mxu1 %v2277_v37  ;;  %v2488_v37 = vld [vmem:[#allocation16 + $0x2a0] sm:$0xff] }
0x100d   :  { %2374 = vmatprep.subr.mxu1 %v2276_v39  ;;  %v2487_v39 = vld [vmem:[#allocation16 + $0x298] sm:$0xff] }
0x100e   :  { %2375 = vmatpush1.msra.mxu1 %v2275_v40  ;;  %v2486_v40 = vld [vmem:[#allocation16 + $0x290] sm:$0xff] }
0x100f   :  { %2376 = vmatprep.subr.mxu1 %v2274_v41  ;;  %v2485_v41 = vld [vmem:[#allocation16 + $0x288] sm:$0xff] }
0x1010   :  { %2377 = vmatpush1.msra.mxu1 %v2273_v42  ;;  %v2484_v42 = vld [vmem:[#allocation16 + $0x280] sm:$0xff] }
0x1011   :  { %2378 = vmatprep.subr.mxu1 %v2272_v43  ;;  %v2483_v43 = vld [vmem:[#allocation16 + $0x278] sm:$0xff] }
0x1012   :  { %2379 = vmatpush1.msra.mxu1 %v2271_v44  ;;  %v2482_v44 = vld [vmem:[#allocation16 + $0x270] sm:$0xff] }
0x1013   :  { %2380 = vmatprep.subr.mxu1 %v2334_v45  ;;  %v2481_v45 = vld [vmem:[#allocation16 + $0x268] sm:$0xff] }
0x1014   :  { %2381 = vmatpush2.msra.mxu1 %v2333_v46  ;;  %v2480_v46 = vld [vmem:[#allocation16 + $0x260] sm:$0xff] }
0x1015   :  { %2382 = vmatprep.subr.mxu1 %v2332_v17  ;;  %v2479_v17 = vld [vmem:[#allocation16 + $0x258] sm:$0xff] }
0x1016   :  { %2383 = vmatpush2.msra.mxu1 %v2331_v48  ;;  %v2478_v48 = vld [vmem:[#allocation16 + $0x250] sm:$0xff] }
0x1017   :  { %2384 = vmatprep.subr.mxu1 %v2330_v49  ;;  %v2477_v49 = vld [vmem:[#allocation16 + $0x248] sm:$0xff] }
0x1018   :  { %2385 = vmatpush2.msra.mxu1 %v2329_v50  ;;  %v2476_v50 = vld [vmem:[#allocation16 + $0x240] sm:$0xff] }
0x1019   :  { %2386 = vmatprep.subr.mxu1 %v2328_v51  ;;  %v2475_v51 = vld [vmem:[#allocation16 + $0x238] sm:$0xff] }
0x101a   :  { %2387 = vmatpush2.msra.mxu1 %v2327_v52  ;;  %v2474_v52 = vld [vmem:[#allocation16 + $0x230] sm:$0xff] }
0x101b   :  { %2388 = vmatprep.subr.mxu1 %v2326_v53  ;;  %v2473_v53 = vld [vmem:[#allocation16 + $0x228] sm:$0xff] }
0x101c   :  { %2389 = vmatpush2.msra.mxu1 %v2325_v54  ;;  %v2472_v54 = vld [vmem:[#allocation16 + $0x220] sm:$0xff] }
0x101d   :  { %2390 = vmatprep.subr.mxu1 %v2324_v55  ;;  %v2471_v55 = vld [vmem:[#allocation16 + $0x218] sm:$0xff] }
0x101e   :  { %2391 = vmatpush2.msra.mxu1 %v2323_v57  ;;  %v2470_v57 = vld [vmem:[#allocation16 + $0x210] sm:$0xff] }
0x101f   :  { %2392 = vmatprep.subr.mxu1 %v2322_v58  ;;  %v2469_v58 = vld [vmem:[#allocation16 + $0x208] sm:$0xff] }
0x1020   :  { %2393 = vmatpush2.msra.mxu1 %v2321_v59  ;;  %v2468_v59 = vld [vmem:[#allocation16 + $0x200] sm:$0xff] }
0x1021   :  { %2394 = vmatprep.subr.mxu1 %v2320_v6  ;;  %v2531_v6 = vld [vmem:[#allocation16 + $0x3f8] sm:$0xff] }
0x1022   :  { %2395 = vmatpush2.msra.mxu1 %v2319_v38  ;;  %v2530_v38 = vld [vmem:[#allocation16 + $0x3f0] sm:$0xff] }
0x1023   :  { %2396 = vmatprep.subr.mxu1 %v2318_v62  ;;  %v2529_v62 = vld [vmem:[#allocation16 + $0x3e8] sm:$0xff] }
0x1024   :  { %2397 = vmatpush2.msra.mxu1 %v2317_v0  ;;  %v2528_v0 = vld [vmem:[#allocation16 + $0x3e0] sm:$0xff] }
0x1025   :  { %2398 = vmatprep.subr.mxu1 %v2316_v2  ;;  %v2527_v2 = vld [vmem:[#allocation16 + $0x3d8] sm:$0xff] }
0x1026   :  { %2399 = vmatpush2.msra.mxu1 %v2315_v3  ;;  %v2526_v3 = vld [vmem:[#allocation16 + $0x3d0] sm:$0xff] }
0x1027   :  { %2400 = vmatprep.subr.mxu1 %v2314_v13  ;;  %v2525_v13 = vld [vmem:[#allocation16 + $0x3c8] sm:$0xff] }
0x1028   :  { %2401 = vmatpush2.msra.mxu1 %v2313_v5 }
0x1029   :  { %2402 = vmatprep.subr.mxu1 %v2312_v9 }
0x102a   :  { %2403 = vmatpush2.msra.mxu1 %v2311_v27 }
0x102b   :  { %2404 = vmatprep.subr.mxu1 %v2310_v10 }
0x102c   :  { %2405 = vmatpush2.msra.mxu1 %v2309_v4 }
0x102d   :  { %2406 = vmatprep.subr.mxu1 %v2308_v28 }
0x102e   :  { %2407 = vmatpush2.msra.mxu1 %v2307_v12 }
0x102f   :  { %2408 = vmatprep.subr.mxu1 %v2306_v11  ;;  %v2524_v11 = vld [vmem:[#allocation16 + $0x3c0] sm:$0xff] }
0x1030   :  { %2409 = vmatpush2.msra.mxu1 %v2305_v14  ;;  %v2523_v14 = vld [vmem:[#allocation16 + $0x3b8] sm:$0xff] }
0x1031   :  { %2410 = vmatprep.subr.mxu1 %v2304_v18  ;;  %v2522_v18 = vld [vmem:[#allocation16 + $0x3b0] sm:$0xff] }
0x1032   :  { %2411 = vmatpush2.msra.mxu1 %v2303_v19  ;;  %v2521_v19 = vld [vmem:[#allocation16 + $0x3a8] sm:$0xff] }
0x10b3   :  { %v2266_v61 = vpop.f32.mrf.mxu1 }
0x10b4   :  { %2412 = vmatprep.mubr.f32.mxu1 %v2266_v61  ;;  %v2520_v61 = vld [vmem:[#allocation16 + $0x3a0] sm:$0xff] }
0x10b5   :  { %v2900_v60 = vpop.f32.mrf.mxu1  ;;  %2413 = vmatmul.mubr.f32.vlgmr.msra.gmra.mxu1 %v3587_v35  ;;  %v2499_v35 = vld [vmem:[#allocation16 + $0x2f8] sm:$0xff] }
0x10b6   :  { %2545 = vmatprep.subr.mxu0 %v2499_v35  ;;  %v2519_v60 = vld [vmem:[#allocation16 + $0x398] sm:$0xff]  ;;  %v2508_v35 = vld [vmem:[#allocation16 + $0x340] sm:$0xff] }
0x10b7   :  { %2546 = vmatpush1.msra.mxu0 %v2498_v30  ;;  %v2507_v30 = vld [vmem:[#allocation16 + $0x338] sm:$0xff] }
0x10b8   :  { %2547 = vmatprep.subr.mxu0 %v2497_v31  ;;  %v2506_v31 = vld [vmem:[#allocation16 + $0x330] sm:$0xff] }
0x10b9   :  { %2548 = vmatpush1.msra.mxu0 %v2496_v32  ;;  %v2505_v32 = vld [vmem:[#allocation16 + $0x328] sm:$0xff] }
0x10ba   :  { %2549 = vmatprep.subr.mxu0 %v2495_v1  ;;  %v2504_v1 = vld [vmem:[#allocation16 + $0x320] sm:$0xff] }
0x10bb   :  { %2550 = vmatpush1.msra.mxu0 %v2494_v63  ;;  %v2503_v63 = vld [vmem:[#allocation16 + $0x318] sm:$0xff] }
0x10bc   :  { %2551 = vmatprep.subr.mxu0 %v2493_v33  ;;  %v2502_v33 = vld [vmem:[#allocation16 + $0x310] sm:$0xff] }
0x1175   :  { %v2414_v23 = vpop.f32.mrf.mxu1 }
0x1176   :  { %v2415_v56 = vadd.f32 %v2414_v23, %v2341_v21  ;;  %v2517_v21 = vld [vmem:[#allocation16 + $0x388] sm:$0xff]  ;;  %v2515_v23 = vld [vmem:[#allocation16 + $0x378] sm:$0xff] }
0x1177   :  { %v2416_v24 = vpop.f32.mrf.mxu1 }
0x1178   :  { %v2417_v25 = vadd.f32 %v2416_v24, %v2345_v22  ;;  %v3596_v26 = vadd.f32 %v2415_v56, %v3555_v16  ;;  %v2492_v16 = vld [vmem:[#allocation16 + $0x2c0] sm:$0xff]  ;;  %v2514_v56 = vld [vmem:[#allocation16 + $0x370] sm:$0xff]  ;;  %v2513_v24 = vld [vmem:[#allocation16 + $0x368] sm:$0xff] }
0x1179   :  { %2552 = vmatpush1.msra.mxu0 %v2492_v16  ;;  %v2516_v22 = vld [vmem:[#allocation16 + $0x380] sm:$0xff]  ;;  %v2501_v16 = vld [vmem:[#allocation16 + $0x308] sm:$0xff] }
0x117a   :  { %v3599_v47 = vadd.f32 %v2417_v25, %v3553_v15  ;;  %v2491_v15 = vld [vmem:[#allocation16 + $0x2b8] sm:$0xff]  ;;  %v2512_v25 = vld [vmem:[#allocation16 + $0x360] sm:$0xff] }
0x117b   :  { %2553 = vmatprep.subr.mxu0 %v2491_v15  ;;  %v2500_v15 = vld [vmem:[#allocation16 + $0x300] sm:$0xff] }
0x117c   :  { %v2425_v29 = vadd.f32 %v3599_v47, %v3596_v26  ;;  %2554 = vmatpush1.msra.mxu0 %v2490_v36  ;;  %v2650_v36 = vld [vmem:[#allocation19 + $0x2f8] sm:$0xff] }
0x117d   :  { %2555 = vmatprep.subr.mxu0 %v2489_v8  ;;  %v2649_v8 = vld [vmem:[#allocation19 + $0x2f0] sm:$0xff]  ;;  %2696 = vmatprep.subr.mxu1 %v2650_v36  ;;  %v2424_v36 = vld [vmem:[#allocation14 + $0x2] sm:$0x3] }
0x117e   :  { %2426 = vadd.xlane.f32.xlu0 %v2425_v29  ;;  %2556 = vmatpush1.msra.mxu0 %v2488_v37  ;;  %v2509_v29 = vld [vmem:[#allocation16 + $0x348] sm:$0xff] }
0x117f   :  { %2557 = vmatprep.subr.mxu0 %v2487_v39  ;;  %v2648_v37 = vld [vmem:[#allocation19 + $0x2e8] sm:$0xff]  ;;  %v2647_v39 = vld [vmem:[#allocation19 + $0x2e0] sm:$0xff]  ;;  %2697 = vmatpush1.msra.mxu1 %v2649_v8 }
0x1180   :  { %2558 = vmatpush1.msra.mxu0 %v2486_v40  ;;  %v2646_v40 = vld [vmem:[#allocation19 + $0x2d8] sm:$0xff]  ;;  %2698 = vmatprep.subr.mxu1 %v2648_v37 }
0x1181   :  { %2559 = vmatprep.subr.mxu0 %v2485_v41  ;;  %v2645_v41 = vld [vmem:[#allocation19 + $0x2d0] sm:$0xff]  ;;  %2699 = vmatpush1.msra.mxu1 %v2647_v39 }
0x1182   :  { %2560 = vmatpush1.msra.mxu0 %v2484_v42  ;;  %v2644_v42 = vld [vmem:[#allocation19 + $0x2c8] sm:$0xff]  ;;  %2700 = vmatprep.subr.mxu1 %v2646_v40 }
0x1183   :  { %2561 = vmatprep.subr.mxu0 %v2483_v43  ;;  %v2643_v43 = vld [vmem:[#allocation19 + $0x2c0] sm:$0xff]  ;;  %2701 = vmatpush1.msra.mxu1 %v2645_v41  ;;  %v2458_v41 = vrot.slane %v2424_v36, %v3459_v7 }
0x1184   :  { %2562 = vmatpush1.msra.mxu0 %v2482_v44  ;;  %v2642_v44 = vld [vmem:[#allocation19 + $0x2b8] sm:$0xff]  ;;  %2702 = vmatprep.subr.mxu1 %v2644_v42  ;;  %v2462_v42 = vrot.slane %v2424_v36, %v3475_v34  ;;  %v2951_v36 = vld [vmem:[#allocation2] sm:$0xff] }
0x1185   :  { %2563 = vmatprep.subr.mxu0 %v2481_v45  ;;  %v2641_v45 = vld [vmem:[#allocation19 + $0x2b0] sm:$0xff]  ;;  %2703 = vmatpush1.msra.mxu1 %v2643_v43 }
0x1186   :  { %2564 = vmatpush1.msra.mxu0 %v2480_v46  ;;  %v2640_v46 = vld [vmem:[#allocation19 + $0x2a8] sm:$0xff]  ;;  %2704 = vmatprep.subr.mxu1 %v2642_v44 }
0x1187   :  { %2565 = vmatprep.subr.mxu0 %v2479_v17  ;;  %v2639_v17 = vld [vmem:[#allocation19 + $0x2a0] sm:$0xff]  ;;  %2705 = vmatpush1.msra.mxu1 %v2641_v45 }
0x1188   :  { %2566 = vmatpush1.msra.mxu0 %v2478_v48  ;;  %v2638_v48 = vld [vmem:[#allocation19 + $0x298] sm:$0xff]  ;;  %2706 = vmatprep.subr.mxu1 %v2640_v46 }
0x1189   :  { %2567 = vmatprep.subr.mxu0 %v2477_v49  ;;  %v2637_v49 = vld [vmem:[#allocation19 + $0x290] sm:$0xff]  ;;  %2707 = vmatpush1.msra.mxu1 %v2639_v17 }
0x118a   :  { %2568 = vmatpush1.msra.mxu0 %v2476_v50  ;;  %v2636_v50 = vld [vmem:[#allocation19 + $0x288] sm:$0xff]  ;;  %2708 = vmatprep.subr.mxu1 %v2638_v48  ;;  %v2658_v48 = vld [vmem:[#allocation19 + $0x338] sm:$0xff] }
0x118b   :  { %2569 = vmatprep.subr.mxu0 %v2475_v51  ;;  %v2635_v51 = vld [vmem:[#allocation19 + $0x280] sm:$0xff]  ;;  %2709 = vmatpush1.msra.mxu1 %v2637_v49  ;;  %v2657_v49 = vld [vmem:[#allocation19 + $0x330] sm:$0xff] }
0x118c   :  { %2570 = vmatpush1.msra.mxu0 %v2474_v52  ;;  %v2634_v52 = vld [vmem:[#allocation19 + $0x278] sm:$0xff]  ;;  %2710 = vmatprep.subr.mxu1 %v2636_v50  ;;  %v2656_v50 = vld [vmem:[#allocation19 + $0x328] sm:$0xff] }
0x118d   :  { %2571 = vmatprep.subr.mxu0 %v2473_v53  ;;  %v2633_v53 = vld [vmem:[#allocation19 + $0x270] sm:$0xff]  ;;  %2711 = vmatpush1.msra.mxu1 %v2635_v51  ;;  %v2655_v51 = vld [vmem:[#allocation19 + $0x320] sm:$0xff] }
0x118e   :  { %2572 = vmatpush1.msra.mxu0 %v2472_v54  ;;  %v2632_v54 = vld [vmem:[#allocation19 + $0x268] sm:$0xff]  ;;  %2712 = vmatprep.subr.mxu1 %v2634_v52  ;;  %v2653_v52 = vld [vmem:[#allocation19 + $0x310] sm:$0xff] }
0x118f   :  { %2573 = vmatprep.subr.mxu0 %v2471_v55  ;;  %v2631_v55 = vld [vmem:[#allocation19 + $0x260] sm:$0xff]  ;;  %2713 = vmatpush1.msra.mxu1 %v2633_v53  ;;  %v2652_v53 = vld [vmem:[#allocation19 + $0x308] sm:$0xff] }
0x1190   :  { %2574 = vmatpush1.msra.mxu0 %v2470_v57  ;;  %v2630_v57 = vld [vmem:[#allocation19 + $0x258] sm:$0xff]  ;;  %2714 = vmatprep.subr.mxu1 %v2632_v54  ;;  %v2651_v54 = vld [vmem:[#allocation19 + $0x300] sm:$0xff] }
0x1191   :  { %2575 = vmatprep.subr.mxu0 %v2469_v58  ;;  %v2629_v58 = vld [vmem:[#allocation19 + $0x250] sm:$0xff]  ;;  %2715 = vmatpush1.msra.mxu1 %v2631_v55 }
0x1192   :  { %2576 = vmatpush1.msra.mxu0 %v2468_v59  ;;  %v2628_v59 = vld [vmem:[#allocation19 + $0x248] sm:$0xff]  ;;  %2716 = vmatprep.subr.mxu1 %v2630_v57 }
0x1193   :  { %2577 = vmatprep.subr.mxu0 %v2531_v6  ;;  %v2627_v6 = vld [vmem:[#allocation19 + $0x240] sm:$0xff]  ;;  %2717 = vmatpush1.msra.mxu1 %v2629_v58 }
0x1194   :  { %2578 = vmatpush2.msra.mxu0 %v2530_v38  ;;  %v2626_v38 = vld [vmem:[#allocation19 + $0x238] sm:$0xff]  ;;  %2718 = vmatprep.subr.mxu1 %v2628_v59 }
0x1195   :  { %2579 = vmatprep.subr.mxu0 %v2529_v62  ;;  %v2625_v62 = vld [vmem:[#allocation19 + $0x230] sm:$0xff]  ;;  %2719 = vmatpush1.msra.mxu1 %v2627_v6 }
0x1196   :  { %2580 = vmatpush2.msra.mxu0 %v2528_v0  ;;  %v2624_v0 = vld [vmem:[#allocation19 + $0x228] sm:$0xff]  ;;  %2720 = vmatprep.subr.mxu1 %v2626_v38 }
0x1197   :  { %2581 = vmatprep.subr.mxu0 %v2527_v2  ;;  %v2623_v2 = vld [vmem:[#allocation19 + $0x220] sm:$0xff]  ;;  %2721 = vmatpush1.msra.mxu1 %v2625_v62 }
0x1198   :  { %2582 = vmatpush2.msra.mxu0 %v2526_v3  ;;  %v2622_v3 = vld [vmem:[#allocation19 + $0x218] sm:$0xff]  ;;  %2722 = vmatprep.subr.mxu1 %v2624_v0 }
0x1199   :  { %2583 = vmatprep.subr.mxu0 %v2525_v13  ;;  %v2621_v13 = vld [vmem:[#allocation19 + $0x210] sm:$0xff]  ;;  %2723 = vmatpush1.msra.mxu1 %v2623_v2  ;;  %v2684_v2 = vld [vmem:[#allocation20 + $0x2] sm:$0x3] }
0x119a   :  { %2584 = vmatpush2.msra.mxu0 %v2524_v11  ;;  %2724 = vmatprep.subr.mxu1 %v2622_v3  ;;  %v2679_v11 = vld [vmem:[#allocation19 + $0x3e0] sm:$0xff]  ;;  %v2689_v3 = vrot.slane %v2684_v2, %v3459_v7 }
0x119b   :  { %2585 = vmatprep.subr.mxu0 %v2523_v14  ;;  %2725 = vmatpush1.msra.mxu1 %v2621_v13  ;;  %v2678_v14 = vld [vmem:[#allocation19 + $0x3d8] sm:$0xff]  ;;  %v2693_v13 = vrot.slane %v2684_v2, %v3475_v34 }
0x119c   :  { %2586 = vmatpush2.msra.mxu0 %v2522_v18  ;;  %v2677_v18 = vld [vmem:[#allocation19 + $0x3d0] sm:$0xff] }
0x119d   :  { %2587 = vmatprep.subr.mxu0 %v2521_v19  ;;  %v2676_v19 = vld [vmem:[#allocation19 + $0x3c8] sm:$0xff] }
0x119e   :  { %2588 = vmatpush2.msra.mxu0 %v2520_v61  ;;  %v2675_v61 = vld [vmem:[#allocation19 + $0x3c0] sm:$0xff] }
0x119f   :  { %2589 = vmatprep.subr.mxu0 %v2519_v60  ;;  %v2674_v60 = vld [vmem:[#allocation19 + $0x3b8] sm:$0xff] }
0x11a0   :  { %2590 = vmatpush2.msra.mxu0 %v2518_v20  ;;  %v2673_v20 = vld [vmem:[#allocation19 + $0x3b0] sm:$0xff] }
0x11a1   :  { %2591 = vmatprep.subr.mxu0 %v2517_v21  ;;  %v2672_v21 = vld [vmem:[#allocation19 + $0x3a8] sm:$0xff] }
0x11a2   :  { %2592 = vmatpush2.msra.mxu0 %v2516_v22  ;;  %v2671_v22 = vld [vmem:[#allocation19 + $0x3a0] sm:$0xff] }
0x11a3   :  { %2593 = vmatprep.subr.mxu0 %v2515_v23  ;;  %v2670_v23 = vld [vmem:[#allocation19 + $0x398] sm:$0xff] }
0x11a4   :  { %2594 = vmatpush2.msra.mxu0 %v2514_v56  ;;  %v2669_v56 = vld [vmem:[#allocation19 + $0x390] sm:$0xff] }
0x11a5   :  { %2595 = vmatprep.subr.mxu0 %v2513_v24  ;;  %v2668_v24 = vld [vmem:[#allocation19 + $0x388] sm:$0xff] }
0x11a6   :  { %2596 = vmatpush2.msra.mxu0 %v2512_v25  ;;  %v2667_v25 = vld [vmem:[#allocation19 + $0x380] sm:$0xff] }
0x1207   :  { %v2427_v5 = vpop.xlane.xlu0 %2426 }
0x1208   :  { %v2428_v9 = vmul.f32 0.00390625, %v2427_v5  ;;  %v2620_v5 = vld [vmem:[#allocation19 + $0x208] sm:$0xff] }
0x1209   :  { %2726 = vmatprep.subr.mxu1 %v2620_v5 }
0x120a   :  { %v3604_v27 = vsub.f32 %v3596_v26, %v2428_v9  ;;  %v3607_v10 = vsub.f32 %v3599_v47, %v2428_v9  ;;  %v2511_v26 = vld [vmem:[#allocation16 + $0x358] sm:$0xff]  ;;  %v2510_v47 = vld [vmem:[#allocation16 + $0x350] sm:$0xff]  ;;  %v2619_v9 = vld [vmem:[#allocation19 + $0x200] sm:$0xff] }
0x120b   :  { %2597 = vmatprep.subr.mxu0 %v2511_v26  ;;  %2727 = vmatpush1.msra.mxu1 %v2619_v9  ;;  %v2666_v26 = vld [vmem:[#allocation19 + $0x378] sm:$0xff] }
0x120c   :  { %v2431_v4 = vmul.f32 %v3604_v27, %v3604_v27  ;;  %v2432_v28 = vmul.f32 %v3607_v10, %v3607_v10  ;;  %2598 = vmatpush2.msra.mxu0 %v2510_v47  ;;  %v2665_v47 = vld [vmem:[#allocation19 + $0x370] sm:$0xff] }
0x120d   :  { %2599 = vmatprep.subr.mxu0 %v2509_v29  ;;  %v2664_v29 = vld [vmem:[#allocation19 + $0x368] sm:$0xff] }
0x120e   :  { %v2433_v12 = vadd.f32 %v2432_v28, %v2431_v4  ;;  %2600 = vmatpush2.msra.mxu0 %v2508_v35  ;;  %v2682_v4 = vld [vmem:[#allocation19 + $0x3f8] sm:$0xff]  ;;  %v2681_v28 = vld [vmem:[#allocation19 + $0x3f0] sm:$0xff]  ;;  %v2663_v35 = vld [vmem:[#allocation19 + $0x360] sm:$0xff] }
0x120f   :  { %2601 = vmatprep.subr.mxu0 %v2507_v30  ;;  %2728 = vmatprep.subr.mxu1 %v2682_v4  ;;  %v2662_v30 = vld [vmem:[#allocation19 + $0x358] sm:$0xff] }
0x1210   :  { %2434 = vadd.xlane.f32.xlu1 %v2433_v12  ;;  %2602 = vmatpush2.msra.mxu0 %v2506_v31  ;;  %v2680_v12 = vld [vmem:[#allocation19 + $0x3e8] sm:$0xff]  ;;  %v2661_v31 = vld [vmem:[#allocation19 + $0x350] sm:$0xff] }
0x1211   :  { %2603 = vmatprep.subr.mxu0 %v2505_v32  ;;  %2729 = vmatpush2.msra.mxu1 %v2681_v28  ;;  %v2660_v32 = vld [vmem:[#allocation19 + $0x348] sm:$0xff] }
0x1212   :  { %2604 = vmatpush2.msra.mxu0 %v2504_v1  ;;  %2730 = vmatprep.subr.mxu1 %v2680_v12  ;;  %v2659_v1 = vld [vmem:[#allocation19 + $0x340] sm:$0xff] }
0x1213   :  { %2605 = vmatprep.subr.mxu0 %v2503_v63  ;;  %2731 = vmatpush2.msra.mxu1 %v2679_v11 }
0x1214   :  { %2606 = vmatpush2.msra.mxu0 %v2502_v33  ;;  %2732 = vmatprep.subr.mxu1 %v2678_v14 }
0x1215   :  { %2607 = vmatprep.subr.mxu0 %v2501_v16  ;;  %2733 = vmatpush2.msra.mxu1 %v2677_v18 }
0x1216   :  { %2608 = vmatpush2.msra.mxu0 %v2500_v15  ;;  %2734 = vmatprep.subr.mxu1 %v2676_v19  ;;  %v2422_v15 = vld [vmem:[#allocation13 + $0x2] sm:$0x3] }
0x1217   :  { %2735 = vmatpush2.msra.mxu1 %v2675_v61  ;;  %v2445_v8 = vrot.slane %v2422_v15, %v3459_v7  ;;  %v2449_v37 = vrot.slane %v2422_v15, %v3475_v34 }
0x1218   :  { %2736 = vmatprep.subr.mxu1 %v2674_v60 }
0x1219   :  { %2737 = vmatpush2.msra.mxu1 %v2673_v20 }
0x121a   :  { %2738 = vmatprep.subr.mxu1 %v2672_v21 }
0x121b   :  { %2739 = vmatpush2.msra.mxu1 %v2671_v22 }
0x121c   :  { %2740 = vmatprep.subr.mxu1 %v2670_v23 }
0x121d   :  { %2741 = vmatpush2.msra.mxu1 %v2669_v56 }
0x121e   :  { %2742 = vmatprep.subr.mxu1 %v2668_v24 }
0x121f   :  { %2743 = vmatpush2.msra.mxu1 %v2667_v25  ;;  %v2770_v25 = vld [vmem:[#allocation22 + $0x2] sm:$0x3] }
0x1220   :  { %2744 = vmatprep.subr.mxu1 %v2666_v26  ;;  %v2772_v26 = vld [vmem:[#allocation23 + $0x2] sm:$0x3] }
0x1221   :  { %2745 = vmatpush2.msra.mxu1 %v2665_v47  ;;  %v2793_v47 = vrot.slane %v2770_v25, %v3459_v7 }
0x1222   :  { %2746 = vmatprep.subr.mxu1 %v2664_v29  ;;  %v2797_v29 = vrot.slane %v2770_v25, %v3475_v34 }
0x1223   :  { %2747 = vmatpush2.msra.mxu1 %v2663_v35 }
0x1224   :  { %2748 = vmatprep.subr.mxu1 %v2662_v30 }
0x1225   :  { %2749 = vmatpush2.msra.mxu1 %v2661_v31 }
0x1226   :  { %2750 = vmatprep.subr.mxu1 %v2660_v32  ;;  %v2806_v32 = vrot.slane %v2772_v26, %v3459_v7 }
0x1227   :  { %2751 = vmatpush2.msra.mxu1 %v2659_v1  ;;  %v2810_v1 = vrot.slane %v2772_v26, %v3475_v34 }
0x1228   :  { %2752 = vmatprep.subr.mxu1 %v2658_v48 }
0x1229   :  { %2753 = vmatpush2.msra.mxu1 %v2657_v49 }
0x122a   :  { %2754 = vmatprep.subr.mxu1 %v2656_v50 }
0x122b   :  { %2755 = vmatpush2.msra.mxu1 %v2655_v51 }
0x1299   :  { %v2435_v63 = vpop.xlane.xlu1 %2434 }
0x129a   :  { %v2436_v33 = vmul.f32 0.00390625, %v2435_v63 }
0x129c   :  { %v2437_v16 = vadd.f32 1e-05, %v2436_v33 }
0x129e   :  { %2946 = vrsqrt.f32 %v2437_v16 }
0x12ab   :  { %v2947_v39 = vpop.eup %2946 }
0x12ac   :  { %v2440_v40 = vmul.f32 %v2947_v39, %v3607_v10  ;;  %v2439_v43 = vmul.f32 %v2947_v39, %v3604_v27  ;;  %v2654_v10 = vld [vmem:[#allocation19 + $0x318] sm:$0xff] }
0x12ad   :  { %2756 = vmatprep.subr.mxu1 %v2654_v10  ;;  %v2533_v27 = vld [vmem:[#allocation17 + $0x2] sm:$0x3] }
0x12ae   :  { %v2453_v44 = vmul.f32 %v2449_v37, %v2440_v40  ;;  %v2452_v45 = vmul.f32 %v2445_v8, %v2439_v43  ;;  %2757 = vmatpush2.msra.mxu1 %v2653_v52  ;;  %v2538_v55 = vrot.slane %v2533_v27, %v3459_v7  ;;  %v2542_v57 = vrot.slane %v2533_v27, %v3475_v34  ;;  %v2952_v37 = vld [vmem:[#allocation2 + $0x8] sm:$0xff] }
0x12af   :  { %2758 = vmatprep.subr.mxu1 %v2652_v53 }
0x12b0   :  { %v2466_v46 = vadd.f32 %v2462_v42, %v2453_v44  ;;  %v2465_v17 = vadd.f32 %v2458_v41, %v2452_v45  ;;  %2759 = vmatpush2.msra.mxu1 %v2651_v54 }
0x12b2   :  { %2609 = vmatprep.mubr.f32.mxu0 %v2466_v46 }
0x12b3   :  { %2610 = vmatmul.mubr.f32.vlgmr.msra.gmra.mxu0 %v2465_v17 }
0x1373   :  { %v2611_v58 = vpop.f32.mrf.mxu0 }
0x1374   :  { %v2612_v59 = vadd.f32 %v2611_v58, %v2538_v55 }
0x1375   :  { %v2613_v6 = vpop.f32.mrf.mxu0 }
0x1376   :  { %v2614_v38 = vadd.f32 %v2613_v6, %v2542_v57  ;;  %v2616_v0 = vmax.f32 %v2612_v59, 0.0 }
0x1378   :  { %v2617_v62 = vmax.f32 %v2614_v38, 0.0 }
0x137a   :  { %2760 = vmatprep.mubr.f32.mxu1 %v2617_v62 }
0x137b   :  { %2761 = vmatmul.mubr.f32.vlgmr.msra.gmra.mxu1 %v2616_v0 }
0x143b   :  { %v2762_v5 = vpop.f32.mrf.mxu1 }
0x143c   :  { %v2763_v9 = vadd.f32 %v2762_v5, %v2689_v3 }
0x143d   :  { %v2764_v4 = vpop.f32.mrf.mxu1 }
0x143e   :  { %v2765_v28 = vadd.f32 %v2764_v4, %v2693_v13  ;;  %v2767_v12 = vadd.f32 %v2763_v9, %v2465_v17 }
0x1440   :  { %v2768_v11 = vadd.f32 %v2765_v28, %v2466_v46 }
0x1442   :  { %v2773_v14 = vadd.f32 %v2768_v11, %v2767_v12 }
0x1444   :  { %2774 = vadd.xlane.f32.xlu0 %v2773_v14 }
0x14cd   :  { %v2775_v18 = vpop.xlane.xlu0 %2774 }
0x14ce   :  { %v2776_v19 = vmul.f32 0.00390625, %v2775_v18 }
0x14d0   :  { %v2777_v61 = vsub.f32 %v2767_v12, %v2776_v19  ;;  %v2778_v60 = vsub.f32 %v2768_v11, %v2776_v19 }
0x14d2   :  { %v2779_v20 = vmul.f32 %v2777_v61, %v2777_v61  ;;  %v2780_v21 = vmul.f32 %v2778_v60, %v2778_v60 }
0x14d4   :  { %v2781_v22 = vadd.f32 %v2780_v21, %v2779_v20 }
0x14d6   :  { %2782 = vadd.xlane.f32.xlu1 %v2781_v22 }
0x155f   :  { %v2783_v23 = vpop.xlane.xlu1 %2782 }
0x1560   :  { %v2784_v56 = vmul.f32 0.00390625, %v2783_v23 }
0x1562   :  { %v2785_v24 = vadd.f32 1e-05, %v2784_v56 }
0x1564   :  { %2948 = vrsqrt.f32 %v2785_v24 }
0x1571   :  { %v2949_v35 = vpop.eup %2948 }
0x1572   :  { %v2787_v30 = vmul.f32 %v2949_v35, %v2777_v61  ;;  %v2788_v31 = vmul.f32 %v2949_v35, %v2778_v60 }
0x1574   :  { %v2800_v63 = vmul.f32 %v2793_v47, %v2787_v30  ;;  %v2801_v33 = vmul.f32 %v2797_v29, %v2788_v31 }
0x1576   :  { %v2813_v16 = vadd.f32 %v2806_v32, %v2800_v63  ;;  %v2814_v15 = vadd.f32 %v2810_v1, %v2801_v33 }
0x1578   :  { %v2815_v8 = vadd.f32 %v2951_v36, %v2813_v16  ;;  %v2816_v39 = vadd.f32 %v2952_v37, %v2814_v15 }
0x157a   :  { %2817 = vst [vmem:[#allocation25] sm:$0xff] %v2815_v8  ;;  %2818 = vst [vmem:[#allocation25 + $0x8] sm:$0xff] %v2816_v39 }
0x157b   :  { %3244 = shalt.err (!%p3241_p4)
}
0x157c   :  { %2828 = dma.vmem_to_hbm [thread:$0]  %s2826_s13, 256, %s3644_s14, [#allocation4]  }
0x157d   :  { %3269 = dma.done.wait [#allocation4], 256  }
0x157e   :  { %3270 = vsyncadd [#allocation4], 4294967040 }
0x157f   :  { %2832 = vsyncpa [#allocation3], 1 }
0x1580   :  { %2833 = vsyncpa [#allocation6], 1 }
0x1581   :  { %2834 = vsyncpa [#allocation9], 1 }
0x1582   :  { %2835 = vsyncpa [#allocation12], 1 }
0x1583   :  { %2836 = vsyncpa [#allocation15], 1 }
0x1584   :  { %2837 = vsyncpa [#allocation18], 1 }
0x1585   :  { %2838 = vsyncpa [#allocation21], 1 }
0x1586   :  { %2839 = vsyncpa [#allocation24], 1 }
0x1587   :  { %2840 = vsyncpa [#allocation4], 1 }

</bundles_post_ra>
